<compile_context>
chip_gen: v7x
topology: tpu7x:2x2x1
jax: 0.10.0
libtpu: 0.0.40
codegen_flags: <defaults>
</compile_context>

<pallas_src>
import numpy as np
import jax
import jax.numpy as jnp
from jax.experimental import pallas as pl
from jax.experimental.pallas import tpu as pltpu

# ----------------------------- configuration -------------------------------
QST_DIM = 10
DEPTH_DIM = 24
D = DEPTH_DIM + QST_DIM          # per-object feature dim (34)
H = 32                           # kwargs['units_per_MLP_layer']
P = 2                            # kwargs['nbrParallelAttention']
BATCH = 2                        # batchsize
FEAT = 25                        # featuresize (default of forward())
NTOT = BATCH * FEAT              # total number of object rows (50)
WITH_SOFTMAX_WEIGHTS = True      # kwargs['withSoftmaxWeights']
WITH_LN_GENERATOR = True         # kwargs['withLNGenerator']
WITH_LEAKY_RELU = False          # kwargs['withLeakyReLU']  -> nn.ReLU
LN_EPS = 1e-5

# --------------------------- packed weight layout ---------------------------
def _build_layout():
    specs = [
        # fused attention heads (lane width P*H = 64)
        ("W1_cat", D, P * H), ("b1_cat", 1, P * H),
        ("ln1g_cat", 1, P * H), ("ln1b_cat", 1, P * H),
        ("W2_bd", P * H, P * H), ("b2_cat", 1, P * H),
        ("ln2g_cat", 1, P * H), ("ln2b_cat", 1, P * H),
        ("W3_cat", P * H, P), ("b3_cat", 1, P),
        ("m_blk", P * H, P * H),                      # per-head averaging matrix
        ("STS", NTOT, NTOT), ("S", BATCH, NTOT), ("ST", NTOT, BATCH),
    ]
    specs += [(f"g1W_att{i}", D, H) for i in range(P)]
    specs += [
        ("g1W_obj", D, H), ("g1b", 1, H), ("gln1g", 1, H), ("gln1b", 1, H),
        ("g2W", H, H), ("g2b", 1, H), ("gln2g", 1, H), ("gln2b", 1, H),
        ("g3W", H, H), ("g3b", 1, H), ("gln3g", 1, H), ("gln3b", 1, H),
        ("f1W", H, H), ("f1b", 1, H),
        ("f2W", H, H), ("f2b", 1, H),
    ]
    layout, off = {}, 0
    for name, r, c in specs:
        layout[name] = (off, r, c)
        off += ((r + 7) // 8) * 8          # 8-aligned row offsets (sublane tiles)
    return layout, off


LAYOUT, SLAB_ROWS = _build_layout()
SLAB_COLS = P * H                          # 64 lanes


def pack_params(p):
    """Pack parameters + derived constants into one (SLAB_ROWS, 64) f32 slab.

    Pure NumPy; run ONCE at init (hoisted out of the jitted forward so the
    jitted function contains nothing but the pallas_call)."""
    slab = np.zeros((SLAB_ROWS, SLAB_COLS), np.float32)
    pn = {k: np.asarray(v, np.float32) for k, v in p.items()}

    def put(name, arr):
        off, r, c = LAYOUT[name]
        slab[off:off + r, 0:c] = np.asarray(arr, np.float32).reshape(r, c)

    # fused attention-head weights
    put("W1_cat", np.concatenate([pn["aW1"][i] for i in range(P)], axis=1))
    put("b1_cat", np.concatenate([pn["ab1"][i] for i in range(P)], axis=1))
    put("ln1g_cat", np.concatenate([pn["aln1g"][i] for i in range(P)], axis=1))
    put("ln1b_cat", np.concatenate([pn["aln1b"][i] for i in range(P)], axis=1))
    W2_bd = np.zeros((P * H, P * H), np.float32)
    for i in range(P):
        W2_bd[i * H:(i + 1) * H, i * H:(i + 1) * H] = pn["aW2"][i]
    put("W2_bd", W2_bd)
    put("b2_cat", np.concatenate([pn["ab2"][i] for i in range(P)], axis=1))
    put("ln2g_cat", np.concatenate([pn["aln2g"][i] for i in range(P)], axis=1))
    put("ln2b_cat", np.concatenate([pn["aln2b"][i] for i in range(P)], axis=1))
    W3_cat = np.zeros((P * H, P), np.float32)
    for i in range(P):
        W3_cat[i * H:(i + 1) * H, i] = pn["aW3"][i][:, 0]
    put("W3_cat", W3_cat)
    put("b3_cat", np.array([pn["ab3"][i, 0, 0] for i in range(P)],
                           np.float32).reshape(1, P))

    # per-head block-averaging matrix for the fused-lane LayerNorm statistics:
    # (x @ m_blk)[n, j(head i)] = mean over head i's lanes of x[n, :]
    m_blk = np.zeros((P * H, P * H), np.float32)
    for i in range(P):
        m_blk[i * H:(i + 1) * H, i * H:(i + 1) * H] = 1.0 / H
    put("m_blk", m_blk)

    # segment (sample-membership) matrices; STS[n, m] = 1 iff same sample
    sample = np.repeat(np.arange(BATCH), FEAT)
    S = (np.arange(BATCH)[:, None] == sample[None, :]).astype(np.float32)   # (B, NTOT)
    put("S", S)
    put("ST", S.T)
    put("STS", S.T @ S)

    # g1 split: rows [i*D:(i+1)*D] multiply head i's pooled ois, rows [P*D:]
    # multiply the raw oj part -> no concat needed in-kernel.
    for i in range(P):
        put(f"g1W_att{i}", pn["g1W"][i * D:(i + 1) * D, :])
    put("g1W_obj", pn["g1W"][P * D:, :])

    for name in ("g1b", "gln1g", "gln1b", "g2W", "g2b", "gln2g", "gln2b",
                 "g3W", "g3b", "gln3g", "gln3b", "f1W", "f1b", "f2W", "f2b"):
        put(name, pn[name])
    return jnp.asarray(slab)


# ------------------------------ kernel helpers ------------------------------
def _mm(a, b):
    # weight matmul: DEFAULT precision = single-pass bf16 on the MXU
    return jnp.dot(a, b, precision=jax.lax.Precision.DEFAULT,
                   preferred_element_type=jnp.float32)


def _mm_hi(a, b):
    # reduction matmuls (LN statistics / segment sums): ~f32 accuracy; these
    # replace exact sums of the reference math and are latency-trivial here.
    return jnp.dot(a, b, precision=jax.lax.Precision.HIGHEST,
                   preferred_element_type=jnp.float32)


def _nonlin(x):
    if WITH_LEAKY_RELU:
        return jnp.where(x >= 0, x, 0.01 * x)
    return jnp.maximum(x, 0.0)


def _ln_chunked(x, gamma, beta, m_blk):
    """Per-head LayerNorm over lane-fused heads.

    m_blk is the block matrix with 1/H in each head's diagonal block, so one
    matmul per statistic yields the per-head mean / E[x^2] already broadcast
    to that head's lanes (the two matmuls are independent -> interleave)."""
    mu = _mm_hi(x, m_blk)
    sq = _mm_hi(x * x, m_blk)
    var = sq - mu * mu
    return (x - mu) * jax.lax.rsqrt(var + LN_EPS) * gamma + beta


def _ln_full(x, gamma, beta):
    """Full-width LayerNorm; lane reductions run on the (otherwise idle) XLU,
    off the MXU critical chain, and match the reference E[(x-mu)^2] form."""
    mu = jnp.mean(x, axis=-1, keepdims=True)
    var = jnp.mean((x - mu) ** 2, axis=-1, keepdims=True)
    return (x - mu) * jax.lax.rsqrt(var + LN_EPS) * gamma + beta


# --------------------------------- kernel -----------------------------------
def sarn_kernel(oj_ref, slab_ref, out_ref):
    oj = oj_ref[...]                                     # (NTOT, D)

    def w(name):
        off, r, c = LAYOUT[name]
        return slab_ref[off:off + r, 0:c]

    sts = w("STS")                                       # (NTOT, NTOT) 0/1 same-sample
    st = w("ST")                                         # (NTOT, B)

    # ---- both attention heads fused along the lane axis (width P*H = 64) ----
    m_blk = w("m_blk")
    h = _mm(oj, w("W1_cat")) + w("b1_cat")               # (NTOT, P*H)
    h = _nonlin(_ln_chunked(h, w("ln1g_cat"), w("ln1b_cat"), m_blk))
    h = _mm(h, w("W2_bd")) + w("b2_cat")                 # block-diag -> per head
    h = _nonlin(_ln_chunked(h, w("ln2g_cat"), w("ln2b_cat"), m_blk))
    scores = _mm(h, w("W3_cat")) + w("b3_cat")           # (NTOT, P), col p = head p

    if WITH_SOFTMAX_WEIGHTS:
        # per-sample softmax over the F objects; masked per-sample max keeps
        # every sample's exp() row well scaled (no cross-sample underflow).
        row_max = jnp.zeros((NTOT, P), jnp.float32)
        for b in range(BATCH):                           # BATCH is a static int
            mask_b = st[:, b:b + 1]                      # (NTOT, 1) 0/1
            m_b = jnp.max(jnp.where(mask_b > 0.0, scores, -jnp.inf),
                          axis=0, keepdims=True)         # (1, P)
            row_max = row_max + mask_b * m_b
        e = jnp.exp(scores - row_max)                    # (NTOT, P)
        denom = _mm_hi(sts, e)                           # per-sample sums, per row
        sw = e * pl.reciprocal(denom, approx=False)
    else:
        sw = scores

    # softmax-weighted pooling (+ broadcast back to rows) and the ois-part of
    # g1; one STS matmul + one weight matmul per head, heads independent.
    att = None
    for i in range(P):
        pooled_i = _mm_hi(sts, sw[:, i:i + 1] * oj)      # (NTOT, D): ois_i per row
        a_i = _mm(pooled_i, w(f"g1W_att{i}"))            # (NTOT, H)
        att = a_i if att is None else att + a_i

    # ---- g MLP (ReLU then LayerNorm, as in applyG) ----
    g = _nonlin(_mm(oj, w("g1W_obj")) + att + w("g1b"))
    if WITH_LN_GENERATOR:
        g = _ln_full(g, w("gln1g"), w("gln1b"))
    g = _nonlin(_mm(g, w("g2W")) + w("g2b"))
    if WITH_LN_GENERATOR:
        g = _ln_full(g, w("gln2g"), w("gln2b"))
    g = _nonlin(_mm(g, w("g3W")) + w("g3b"))
    if WITH_LN_GENERATOR:
        g = _ln_full(g, w("gln3g"), w("gln3b"))

    sumg = _mm_hi(w("S"), g)                             # (B, H) sum over objects

    # ---- f MLP (module applies the nonlinearity twice after f2 on purpose) ----
    f = _nonlin(_mm(sumg, w("f1W")) + w("f1b"))
    # TODO(synk): F.dropout(p=0.5, training=True) is stochastic; eval-mode identity here.
    f = _nonlin(_mm(f, w("f2W")) + w("f2b"))
    f = _nonlin(f)
    out_ref[...] = f                                     # (B, H)


@jax.jit
def sarn_forward(ojqst, slab):
    """ojqst: (B*F, D) f32; slab: pre-packed (SLAB_ROWS, 64) f32 -> (B, H) f32."""
    # grid=(1,): the whole problem is VMEM-resident (2 input DMAs total).
    # For many independent (B, F) instances on v7x, a leading 'parallel' grid
    # axis over instances would occupy the second TensorCore.
    return pl.pallas_call(
        sarn_kernel,
        out_shape=jax.ShapeDtypeStruct((BATCH, H), jnp.float32),
        grid=(1,),
        in_specs=[
            pl.BlockSpec((NTOT, D), lambda i: (0, 0)),
            pl.BlockSpec((SLAB_ROWS, SLAB_COLS), lambda i: (0, 0)),
        ],
        out_specs=pl.BlockSpec((BATCH, H), lambda i: (0, 0)),
        compiler_params=pltpu.CompilerParams(dimension_semantics=("arbitrary",)),
    )(ojqst, slab)


# --------------------------- parameter construction -------------------------
def init_params(key):
    ks = iter(jax.random.split(key, 64))

    def lin(fan_in, fan_out):
        std = float(np.sqrt(2.0 / (fan_in + fan_out)))
        W = std * jax.random.normal(next(ks), (fan_in, fan_out), jnp.float32)
        bound = float(1.0 / np.sqrt(fan_in))
        b = jax.random.uniform(next(ks), (1, fan_out), jnp.float32, -bound, bound)
        return W, b

    aW1, ab1, aW2, ab2, aW3, ab3 = [], [], [], [], [], []
    for _ in range(P):
        W1, b1 = lin(D, H)
        W2, b2 = lin(H, H)
        W3, b3 = lin(H, 1)
        aW1.append(W1); ab1.append(b1)
        aW2.append(W2); ab2.append(b2)
        aW3.append(W3); ab3.append(b3)

    params = dict(
        aW1=jnp.stack(aW1), ab1=jnp.stack(ab1),
        aln1g=jnp.ones((P, 1, H), jnp.float32), aln1b=jnp.zeros((P, 1, H), jnp.float32),
        aW2=jnp.stack(aW2), ab2=jnp.stack(ab2),
        aln2g=jnp.ones((P, 1, H), jnp.float32), aln2b=jnp.zeros((P, 1, H), jnp.float32),
        aW3=jnp.stack(aW3), ab3=jnp.stack(ab3),
    )

    g1W, g1b = lin((P + 1) * D, H)
    g2W, g2b = lin(H, H)
    g3W, g3b = lin(H, H)
    f1W, f1b = lin(H, H)
    f2W, f2b = lin(H, H)
    params.update(
        g1W=g1W, g1b=g1b, gln1g=jnp.ones((1, H), jnp.float32), gln1b=jnp.zeros((1, H), jnp.float32),
        g2W=g2W, g2b=g2b, gln2g=jnp.ones((1, H), jnp.float32), gln2b=jnp.zeros((1, H), jnp.float32),
        g3W=g3W, g3b=g3b, gln3g=jnp.ones((1, H), jnp.float32), gln3b=jnp.zeros((1, H), jnp.float32),
        f1W=f1W, f1b=f1b, f2W=f2W, f2b=f2b,
    )
    return params


# ------------------------- pure-JAX reference (module math) -----------------
def reference_forward(ojqst, p):
    """Faithful restatement of the PyTorch module's forward (eval mode).

    Uses plain `@` (DEFAULT precision), i.e. the same single-pass-bf16 MXU
    numerics class as the kernel's weight matmuls."""
    def relu(x):
        return jnp.where(x >= 0, x, 0.01 * x) if WITH_LEAKY_RELU else jnp.maximum(x, 0.0)

    def ln(x, g, b):
        mu = jnp.mean(x, axis=-1, keepdims=True)
        var = jnp.mean((x - mu) ** 2, axis=-1, keepdims=True)
        return (x - mu) / jnp.sqrt(var + LN_EPS) * g + b

    oj3 = ojqst.reshape(BATCH, FEAT, D)
    ois = []
    for i in range(P):
        h = ojqst @ p["aW1"][i] + p["ab1"][i]
        h = relu(ln(h, p["aln1g"][i], p["aln1b"][i]))
        h = h @ p["aW2"][i] + p["ab2"][i]
        h = relu(ln(h, p["aln2g"][i], p["aln2b"][i]))
        wgt = (h @ p["aW3"][i] + p["ab3"][i]).reshape(BATCH, FEAT, 1)
        if WITH_SOFTMAX_WEIGHTS:
            wgt = jax.nn.softmax(wgt, axis=1)
        ois.append(jnp.sum(wgt * oj3, axis=1, keepdims=True))      # (B, 1, D)
    ois = jnp.concatenate(ois, axis=1).reshape(BATCH, 1, P * D)
    ois = jnp.broadcast_to(ois, (BATCH, FEAT, P * D))
    x = jnp.concatenate([ois, oj3], axis=2).reshape(BATCH * FEAT, (P + 1) * D)

    g = relu(x @ p["g1W"] + p["g1b"])
    if WITH_LN_GENERATOR:
        g = ln(g, p["gln1g"], p["gln1b"])
    g = relu(g @ p["g2W"] + p["g2b"])
    if WITH_LN_GENERATOR:
        g = ln(g, p["gln2g"], p["gln2b"])
    g = relu(g @ p["g3W"] + p["g3b"])
    if WITH_LN_GENERATOR:
        g = ln(g, p["gln3g"], p["gln3b"])

    sumg = g.reshape(BATCH, FEAT, H).sum(axis=1)
    f = relu(sumg @ p["f1W"] + p["f1b"])
    f = relu(f @ p["f2W"] + p["f2b"])   # dropout treated as identity (eval mode)
    f = relu(f)
    return f


if __name__ == "__main__":
    key = jax.random.PRNGKey(0)
    k_params, k_x = jax.random.split(key)
    params = init_params(k_params)
    ojqst = jax.random.normal(k_x, (BATCH * FEAT, D), jnp.float32)

    # slab is built once, host-side, at init (hoisted out of the jitted path).
    slab = pack_params(params)

    out = jax.block_until_ready(sarn_forward(ojqst, slab))
    ref = reference_forward(ojqst, params)

    # Tolerance reflects DEFAULT (single-pass bf16) MXU precision on the weight
    # matmuls of both kernel and reference.
    np.testing.assert_allclose(np.asarray(out), np.asarray(ref), rtol=2e-2, atol=2e-2)

    print("KERNEL_OK")
</pallas_src>

<mosaic_0001>
module attributes {stable_mosaic.version = 11 : i64} {
  func.func @sarn_kernel(%arg0: i32, %arg1: memref<50x34xf32, #tpu.memory_space<vmem>>, %arg2: memref<744x64xf32, #tpu.memory_space<vmem>>, %arg3: memref<2x32xf32, #tpu.memory_space<vmem>>) attributes {dimension_semantics = [#tpu.dimension_semantics<arbitrary>], iteration_bounds = array<i64: 1>, scalar_prefetch = 0 : i64, scratch_operands = 0 : i64, tpu.core_type = #tpu.core_type<tc>, window_params = [{pipeline_mode = #tpu.pipeline_mode<synchronous>, transform_indices = @transform_0, window_bounds = array<i64: 50, 34>}, {pipeline_mode = #tpu.pipeline_mode<synchronous>, transform_indices = @transform_1, window_bounds = array<i64: 744, 64>}, {pipeline_mode = #tpu.pipeline_mode<synchronous>, transform_indices = @transform_2, window_bounds = array<i64: 2, 32>}]} {
    %c0 = arith.constant 0 : index
    %c0_0 = arith.constant 0 : index
    %0 = vector.load %arg1[%c0, %c0_0] : memref<50x34xf32, #tpu.memory_space<vmem>>, vector<50x34xf32>
    %c288 = arith.constant 288 : index
    %c0_1 = arith.constant 0 : index
    %1 = vector.load %arg2[%c288, %c0_1] : memref<744x64xf32, #tpu.memory_space<vmem>>, vector<50x50xf32>
    %c352 = arith.constant 352 : index
    %c0_2 = arith.constant 0 : index
    %2 = vector.load %arg2[%c352, %c0_2] : memref<744x64xf32, #tpu.memory_space<vmem>>, vector<50x2xf32>
    %c224 = arith.constant 224 : index
    %c0_3 = arith.constant 0 : index
    %3 = vector.load %arg2[%c224, %c0_3] : memref<744x64xf32, #tpu.memory_space<vmem>>, vector<64x64xf32>
    %c0_4 = arith.constant 0 : index
    %c0_5 = arith.constant 0 : index
    %4 = vector.load %arg2[%c0_4, %c0_5] : memref<744x64xf32, #tpu.memory_space<vmem>>, vector<34x64xf32>
    %cst = arith.constant dense<0.000000e+00> : vector<50x64xf32>
    %5 = tpu.matmul %0, %4, %cst {dimension_numbers = #tpu.dot_dimension_numbers<[1], [0], [0], [1], [0, 0, 1, 1], [], []>} : vector<50x34xf32>, vector<34x64xf32>, vector<50x64xf32> -> vector<50x64xf32>
    %c40 = arith.constant 40 : index
    %c0_6 = arith.constant 0 : index
    %6 = vector.load %arg2[%c40, %c0_6] : memref<744x64xf32, #tpu.memory_space<vmem>>, vector<1x64xf32>
    %7 = vector.broadcast %6 : vector<1x64xf32> to vector<50x64xf32>
    %8 = arith.addf %5, %7 : vector<50x64xf32>
    %c48 = arith.constant 48 : index
    %c0_7 = arith.constant 0 : index
    %9 = vector.load %arg2[%c48, %c0_7] : memref<744x64xf32, #tpu.memory_space<vmem>>, vector<1x64xf32>
    %c56 = arith.constant 56 : index
    %c0_8 = arith.constant 0 : index
    %10 = vector.load %arg2[%c56, %c0_8] : memref<744x64xf32, #tpu.memory_space<vmem>>, vector<1x64xf32>
    %cst_9 = arith.constant dense<0.000000e+00> : vector<50x64xf32>
    %11 = tpu.matmul %8, %3, %cst_9 {dimension_numbers = #tpu.dot_dimension_numbers<[1], [0], [0], [1], [0, 0, 1, 1], [], []>, precision = #tpu.contract_precision<fp32>} : vector<50x64xf32>, vector<64x64xf32>, vector<50x64xf32> -> vector<50x64xf32>
    %12 = arith.mulf %8, %8 : vector<50x64xf32>
    %cst_10 = arith.constant dense<0.000000e+00> : vector<50x64xf32>
    %13 = tpu.matmul %12, %3, %cst_10 {dimension_numbers = #tpu.dot_dimension_numbers<[1], [0], [0], [1], [0, 0, 1, 1], [], []>, precision = #tpu.contract_precision<fp32>} : vector<50x64xf32>, vector<64x64xf32>, vector<50x64xf32> -> vector<50x64xf32>
    %14 = arith.mulf %11, %11 : vector<50x64xf32>
    %15 = arith.subf %13, %14 : vector<50x64xf32>
    %16 = arith.subf %8, %11 : vector<50x64xf32>
    %cst_11 = arith.constant 9.99999974E-6 : f32
    %17 = vector.broadcast %cst_11 : f32 to vector<50x64xf32>
    %18 = arith.addf %15, %17 : vector<50x64xf32>
    %19 = math.rsqrt %18 : vector<50x64xf32>
    %20 = arith.mulf %16, %19 : vector<50x64xf32>
    %21 = vector.broadcast %9 : vector<1x64xf32> to vector<50x64xf32>
    %22 = arith.mulf %20, %21 : vector<50x64xf32>
    %23 = vector.broadcast %10 : vector<1x64xf32> to vector<50x64xf32>
    %24 = arith.addf %22, %23 : vector<50x64xf32>
    %cst_12 = arith.constant 0.000000e+00 : f32
    %25 = vector.broadcast %cst_12 : f32 to vector<50x64xf32>
    %26 = arith.maximumf %24, %25 : vector<50x64xf32>
    %c64 = arith.constant 64 : index
    %c0_13 = arith.constant 0 : index
    %27 = vector.load %arg2[%c64, %c0_13] : memref<744x64xf32, #tpu.memory_space<vmem>>, vector<64x64xf32>
    %cst_14 = arith.constant dense<0.000000e+00> : vector<50x64xf32>
    %28 = tpu.matmul %26, %27, %cst_14 {dimension_numbers = #tpu.dot_dimension_numbers<[1], [0], [0], [1], [0, 0, 1, 1], [], []>} : vector<50x64xf32>, vector<64x64xf32>, vector<50x64xf32> -> vector<50x64xf32>
    %c128 = arith.constant 128 : index
    %c0_15 = arith.constant 0 : index
    %29 = vector.load %arg2[%c128, %c0_15] : memref<744x64xf32, #tpu.memory_space<vmem>>, vector<1x64xf32>
    %30 = vector.broadcast %29 : vector<1x64xf32> to vector<50x64xf32>
    %31 = arith.addf %28, %30 : vector<50x64xf32>
    %c136 = arith.constant 136 : index
    %c0_16 = arith.constant 0 : index
    %32 = vector.load %arg2[%c136, %c0_16] : memref<744x64xf32, #tpu.memory_space<vmem>>, vector<1x64xf32>
    %c144 = arith.constant 144 : index
    %c0_17 = arith.constant 0 : index
    %33 = vector.load %arg2[%c144, %c0_17] : memref<744x64xf32, #tpu.memory_space<vmem>>, vector<1x64xf32>
    %cst_18 = arith.constant dense<0.000000e+00> : vector<50x64xf32>
    %34 = tpu.matmul %31, %3, %cst_18 {dimension_numbers = #tpu.dot_dimension_numbers<[1], [0], [0], [1], [0, 0, 1, 1], [], []>, precision = #tpu.contract_precision<fp32>} : vector<50x64xf32>, vector<64x64xf32>, vector<50x64xf32> -> vector<50x64xf32>
    %35 = arith.mulf %31, %31 : vector<50x64xf32>
    %cst_19 = arith.constant dense<0.000000e+00> : vector<50x64xf32>
    %36 = tpu.matmul %35, %3, %cst_19 {dimension_numbers = #tpu.dot_dimension_numbers<[1], [0], [0], [1], [0, 0, 1, 1], [], []>, precision = #tpu.contract_precision<fp32>} : vector<50x64xf32>, vector<64x64xf32>, vector<50x64xf32> -> vector<50x64xf32>
    %37 = arith.mulf %34, %34 : vector<50x64xf32>
    %38 = arith.subf %36, %37 : vector<50x64xf32>
    %39 = arith.subf %31, %34 : vector<50x64xf32>
    %cst_20 = arith.constant 9.99999974E-6 : f32
    %40 = vector.broadcast %cst_20 : f32 to vector<50x64xf32>
    %41 = arith.addf %38, %40 : vector<50x64xf32>
    %42 = math.rsqrt %41 : vector<50x64xf32>
    %43 = arith.mulf %39, %42 : vector<50x64xf32>
    %44 = vector.broadcast %32 : vector<1x64xf32> to vector<50x64xf32>
    %45 = arith.mulf %43, %44 : vector<50x64xf32>
    %46 = vector.broadcast %33 : vector<1x64xf32> to vector<50x64xf32>
    %47 = arith.addf %45, %46 : vector<50x64xf32>
    %cst_21 = arith.constant 0.000000e+00 : f32
    %48 = vector.broadcast %cst_21 : f32 to vector<50x64xf32>
    %49 = arith.maximumf %47, %48 : vector<50x64xf32>
    %c152 = arith.constant 152 : index
    %c0_22 = arith.constant 0 : index
    %50 = vector.load %arg2[%c152, %c0_22] : memref<744x64xf32, #tpu.memory_space<vmem>>, vector<64x2xf32>
    %cst_23 = arith.constant dense<0.000000e+00> : vector<50x2xf32>
    %51 = tpu.matmul %49, %50, %cst_23 {dimension_numbers = #tpu.dot_dimension_numbers<[1], [0], [0], [1], [0, 0, 1, 1], [], []>} : vector<50x64xf32>, vector<64x2xf32>, vector<50x2xf32> -> vector<50x2xf32>
    %c216 = arith.constant 216 : index
    %c0_24 = arith.constant 0 : index
    %52 = vector.load %arg2[%c216, %c0_24] : memref<744x64xf32, #tpu.memory_space<vmem>>, vector<1x2xf32>
    %53 = vector.broadcast %52 : vector<1x2xf32> to vector<50x2xf32>
    %54 = arith.addf %51, %53 : vector<50x2xf32>
    %cst_25 = arith.constant 0.000000e+00 : f32
    %55 = vector.broadcast %cst_25 : f32 to vector<50x2xf32>
    %56 = vector.extract_strided_slice %2 {offsets = [0, 0], sizes = [50, 1], strides = [1, 1]} : vector<50x2xf32> to vector<50x1xf32>
    %cst_26 = arith.constant 0.000000e+00 : f32
    %57 = vector.broadcast %cst_26 : f32 to vector<50x1xf32>
    %58 = arith.cmpf ogt, %56, %57 : vector<50x1xf32>
    %cst_27 = arith.constant 0xFF800000 : f32
    %59 = vector.shape_cast %58 : vector<50x1xi1> to vector<50x1xi1>
    %60 = vector.broadcast %59 : vector<50x1xi1> to vector<50x2xi1>
    %61 = vector.broadcast %cst_27 : f32 to vector<50x2xf32>
    %62 = arith.select %60, %54, %61 : vector<50x2xi1>, vector<50x2xf32>
    %cst_28 = arith.constant dense<0xFF800000> : vector<2xf32>
    %63 = vector.multi_reduction <maximumf>, %62, %cst_28 [0] : vector<50x2xf32> to vector<2xf32>
    %64 = vector.shape_cast %63 : vector<2xf32> to vector<1x2xf32>
    %65 = vector.broadcast %56 : vector<50x1xf32> to vector<50x2xf32>
    %66 = vector.broadcast %64 : vector<1x2xf32> to vector<50x2xf32>
    %67 = arith.mulf %65, %66 : vector<50x2xf32>
    %68 = arith.addf %55, %67 : vector<50x2xf32>
    %69 = vector.extract_strided_slice %2 {offsets = [0, 1], sizes = [50, 1], strides = [1, 1]} : vector<50x2xf32> to vector<50x1xf32>
    %cst_29 = arith.constant 0.000000e+00 : f32
    %70 = vector.broadcast %cst_29 : f32 to vector<50x1xf32>
    %71 = arith.cmpf ogt, %69, %70 : vector<50x1xf32>
    %cst_30 = arith.constant 0xFF800000 : f32
    %72 = vector.shape_cast %71 : vector<50x1xi1> to vector<50x1xi1>
    %73 = vector.broadcast %72 : vector<50x1xi1> to vector<50x2xi1>
    %74 = vector.broadcast %cst_30 : f32 to vector<50x2xf32>
    %75 = arith.select %73, %54, %74 : vector<50x2xi1>, vector<50x2xf32>
    %cst_31 = arith.constant dense<0xFF800000> : vector<2xf32>
    %76 = vector.multi_reduction <maximumf>, %75, %cst_31 [0] : vector<50x2xf32> to vector<2xf32>
    %77 = vector.shape_cast %76 : vector<2xf32> to vector<1x2xf32>
    %78 = vector.broadcast %69 : vector<50x1xf32> to vector<50x2xf32>
    %79 = vector.broadcast %77 : vector<1x2xf32> to vector<50x2xf32>
    %80 = arith.mulf %78, %79 : vector<50x2xf32>
    %81 = arith.addf %68, %80 : vector<50x2xf32>
    %82 = arith.subf %54, %81 : vector<50x2xf32>
    %83 = math.exp %82 : vector<50x2xf32>
    %cst_32 = arith.constant dense<0.000000e+00> : vector<50x2xf32>
    %84 = tpu.matmul %1, %83, %cst_32 {dimension_numbers = #tpu.dot_dimension_numbers<[1], [0], [0], [1], [0, 0, 1, 1], [], []>, precision = #tpu.contract_precision<fp32>} : vector<50x50xf32>, vector<50x2xf32>, vector<50x2xf32> -> vector<50x2xf32>
    %85 = tpu.reciprocal %84 : vector<50x2xf32> -> vector<50x2xf32>
    %86 = arith.mulf %83, %85 : vector<50x2xf32>
    %87 = vector.extract_strided_slice %86 {offsets = [0, 0], sizes = [50, 1], strides = [1, 1]} : vector<50x2xf32> to vector<50x1xf32>
    %88 = vector.broadcast %87 : vector<50x1xf32> to vector<50x34xf32>
    %89 = arith.mulf %88, %0 : vector<50x34xf32>
    %cst_33 = arith.constant dense<0.000000e+00> : vector<50x34xf32>
    %90 = tpu.matmul %1, %89, %cst_33 {dimension_numbers = #tpu.dot_dimension_numbers<[1], [0], [0], [1], [0, 0, 1, 1], [], []>, precision = #tpu.contract_precision<fp32>} : vector<50x50xf32>, vector<50x34xf32>, vector<50x34xf32> -> vector<50x34xf32>
    %c408 = arith.constant 408 : index
    %c0_34 = arith.constant 0 : index
    %91 = vector.load %arg2[%c408, %c0_34] : memref<744x64xf32, #tpu.memory_space<vmem>>, vector<34x32xf32>
    %cst_35 = arith.constant dense<0.000000e+00> : vector<50x32xf32>
    %92 = tpu.matmul %90, %91, %cst_35 {dimension_numbers = #tpu.dot_dimension_numbers<[1], [0], [0], [1], [0, 0, 1, 1], [], []>} : vector<50x34xf32>, vector<34x32xf32>, vector<50x32xf32> -> vector<50x32xf32>
    %93 = vector.extract_strided_slice %86 {offsets = [0, 1], sizes = [50, 1], strides = [1, 1]} : vector<50x2xf32> to vector<50x1xf32>
    %94 = vector.broadcast %93 : vector<50x1xf32> to vector<50x34xf32>
    %95 = arith.mulf %94, %0 : vector<50x34xf32>
    %cst_36 = arith.constant dense<0.000000e+00> : vector<50x34xf32>
    %96 = tpu.matmul %1, %95, %cst_36 {dimension_numbers = #tpu.dot_dimension_numbers<[1], [0], [0], [1], [0, 0, 1, 1], [], []>, precision = #tpu.contract_precision<fp32>} : vector<50x50xf32>, vector<50x34xf32>, vector<50x34xf32> -> vector<50x34xf32>
    %c448 = arith.constant 448 : index
    %c0_37 = arith.constant 0 : index
    %97 = vector.load %arg2[%c448, %c0_37] : memref<744x64xf32, #tpu.memory_space<vmem>>, vector<34x32xf32>
    %cst_38 = arith.constant dense<0.000000e+00> : vector<50x32xf32>
    %98 = tpu.matmul %96, %97, %cst_38 {dimension_numbers = #tpu.dot_dimension_numbers<[1], [0], [0], [1], [0, 0, 1, 1], [], []>} : vector<50x34xf32>, vector<34x32xf32>, vector<50x32xf32> -> vector<50x32xf32>
    %99 = arith.addf %92, %98 : vector<50x32xf32>
    %c488 = arith.constant 488 : index
    %c0_39 = arith.constant 0 : index
    %100 = vector.load %arg2[%c488, %c0_39] : memref<744x64xf32, #tpu.memory_space<vmem>>, vector<34x32xf32>
    %cst_40 = arith.constant dense<0.000000e+00> : vector<50x32xf32>
    %101 = tpu.matmul %0, %100, %cst_40 {dimension_numbers = #tpu.dot_dimension_numbers<[1], [0], [0], [1], [0, 0, 1, 1], [], []>} : vector<50x34xf32>, vector<34x32xf32>, vector<50x32xf32> -> vector<50x32xf32>
    %102 = arith.addf %101, %99 : vector<50x32xf32>
    %c528 = arith.constant 528 : index
    %c0_41 = arith.constant 0 : index
    %103 = vector.load %arg2[%c528, %c0_41] : memref<744x64xf32, #tpu.memory_space<vmem>>, vector<1x32xf32>
    %104 = vector.broadcast %103 : vector<1x32xf32> to vector<50x32xf32>
    %105 = arith.addf %102, %104 : vector<50x32xf32>
    %cst_42 = arith.constant 0.000000e+00 : f32
    %106 = vector.broadcast %cst_42 : f32 to vector<50x32xf32>
    %107 = arith.maximumf %105, %106 : vector<50x32xf32>
    %c536 = arith.constant 536 : index
    %c0_43 = arith.constant 0 : index
    %108 = vector.load %arg2[%c536, %c0_43] : memref<744x64xf32, #tpu.memory_space<vmem>>, vector<1x32xf32>
    %c544 = arith.constant 544 : index
    %c0_44 = arith.constant 0 : index
    %109 = vector.load %arg2[%c544, %c0_44] : memref<744x64xf32, #tpu.memory_space<vmem>>, vector<1x32xf32>
    %cst_45 = arith.constant dense<0.000000e+00> : vector<50xf32>
    %110 = vector.multi_reduction <add>, %107, %cst_45 [1] : vector<50x32xf32> to vector<50xf32>
    %111 = vector.shape_cast %110 : vector<50xf32> to vector<50x1xf32>
    %cst_46 = arith.constant 3.200000e+01 : f32
    %112 = vector.broadcast %cst_46 : f32 to vector<50x1xf32>
    %113 = arith.divf %111, %112 : vector<50x1xf32>
    %114 = vector.broadcast %113 : vector<50x1xf32> to vector<50x32xf32>
    %115 = arith.subf %107, %114 : vector<50x32xf32>
    %116 = arith.mulf %115, %115 : vector<50x32xf32>
    %cst_47 = arith.constant dense<0.000000e+00> : vector<50xf32>
    %117 = vector.multi_reduction <add>, %116, %cst_47 [1] : vector<50x32xf32> to vector<50xf32>
    %118 = vector.shape_cast %117 : vector<50xf32> to vector<50x1xf32>
    %cst_48 = arith.constant 3.200000e+01 : f32
    %119 = vector.broadcast %cst_48 : f32 to vector<50x1xf32>
    %120 = arith.divf %118, %119 : vector<50x1xf32>
    %121 = vector.broadcast %113 : vector<50x1xf32> to vector<50x32xf32>
    %122 = arith.subf %107, %121 : vector<50x32xf32>
    %cst_49 = arith.constant 9.99999974E-6 : f32
    %123 = vector.broadcast %cst_49 : f32 to vector<50x1xf32>
    %124 = arith.addf %120, %123 : vector<50x1xf32>
    %125 = math.rsqrt %124 : vector<50x1xf32>
    %126 = vector.broadcast %125 : vector<50x1xf32> to vector<50x32xf32>
    %127 = arith.mulf %122, %126 : vector<50x32xf32>
    %128 = vector.broadcast %108 : vector<1x32xf32> to vector<50x32xf32>
    %129 = arith.mulf %127, %128 : vector<50x32xf32>
    %130 = vector.broadcast %109 : vector<1x32xf32> to vector<50x32xf32>
    %131 = arith.addf %129, %130 : vector<50x32xf32>
    %c552 = arith.constant 552 : index
    %c0_50 = arith.constant 0 : index
    %132 = vector.load %arg2[%c552, %c0_50] : memref<744x64xf32, #tpu.memory_space<vmem>>, vector<32x32xf32>
    %cst_51 = arith.constant dense<0.000000e+00> : vector<50x32xf32>
    %133 = tpu.matmul %131, %132, %cst_51 {dimension_numbers = #tpu.dot_dimension_numbers<[1], [0], [0], [1], [0, 0, 1, 1], [], []>} : vector<50x32xf32>, vector<32x32xf32>, vector<50x32xf32> -> vector<50x32xf32>
    %c584 = arith.constant 584 : index
    %c0_52 = arith.constant 0 : index
    %134 = vector.load %arg2[%c584, %c0_52] : memref<744x64xf32, #tpu.memory_space<vmem>>, vector<1x32xf32>
    %135 = vector.broadcast %134 : vector<1x32xf32> to vector<50x32xf32>
    %136 = arith.addf %133, %135 : vector<50x32xf32>
    %cst_53 = arith.constant 0.000000e+00 : f32
    %137 = vector.broadcast %cst_53 : f32 to vector<50x32xf32>
    %138 = arith.maximumf %136, %137 : vector<50x32xf32>
    %c592 = arith.constant 592 : index
    %c0_54 = arith.constant 0 : index
    %139 = vector.load %arg2[%c592, %c0_54] : memref<744x64xf32, #tpu.memory_space<vmem>>, vector<1x32xf32>
    %c600 = arith.constant 600 : index
    %c0_55 = arith.constant 0 : index
    %140 = vector.load %arg2[%c600, %c0_55] : memref<744x64xf32, #tpu.memory_space<vmem>>, vector<1x32xf32>
    %cst_56 = arith.constant dense<0.000000e+00> : vector<50xf32>
    %141 = vector.multi_reduction <add>, %138, %cst_56 [1] : vector<50x32xf32> to vector<50xf32>
    %142 = vector.shape_cast %141 : vector<50xf32> to vector<50x1xf32>
    %cst_57 = arith.constant 3.200000e+01 : f32
    %143 = vector.broadcast %cst_57 : f32 to vector<50x1xf32>
    %144 = arith.divf %142, %143 : vector<50x1xf32>
    %145 = vector.broadcast %144 : vector<50x1xf32> to vector<50x32xf32>
    %146 = arith.subf %138, %145 : vector<50x32xf32>
    %147 = arith.mulf %146, %146 : vector<50x32xf32>
    %cst_58 = arith.constant dense<0.000000e+00> : vector<50xf32>
    %148 = vector.multi_reduction <add>, %147, %cst_58 [1] : vector<50x32xf32> to vector<50xf32>
    %149 = vector.shape_cast %148 : vector<50xf32> to vector<50x1xf32>
    %cst_59 = arith.constant 3.200000e+01 : f32
    %150 = vector.broadcast %cst_59 : f32 to vector<50x1xf32>
    %151 = arith.divf %149, %150 : vector<50x1xf32>
    %152 = vector.broadcast %144 : vector<50x1xf32> to vector<50x32xf32>
    %153 = arith.subf %138, %152 : vector<50x32xf32>
    %cst_60 = arith.constant 9.99999974E-6 : f32
    %154 = vector.broadcast %cst_60 : f32 to vector<50x1xf32>
    %155 = arith.addf %151, %154 : vector<50x1xf32>
    %156 = math.rsqrt %155 : vector<50x1xf32>
    %157 = vector.broadcast %156 : vector<50x1xf32> to vector<50x32xf32>
    %158 = arith.mulf %153, %157 : vector<50x32xf32>
    %159 = vector.broadcast %139 : vector<1x32xf32> to vector<50x32xf32>
    %160 = arith.mulf %158, %159 : vector<50x32xf32>
    %161 = vector.broadcast %140 : vector<1x32xf32> to vector<50x32xf32>
    %162 = arith.addf %160, %161 : vector<50x32xf32>
    %c608 = arith.constant 608 : index
    %c0_61 = arith.constant 0 : index
    %163 = vector.load %arg2[%c608, %c0_61] : memref<744x64xf32, #tpu.memory_space<vmem>>, vector<32x32xf32>
    %cst_62 = arith.constant dense<0.000000e+00> : vector<50x32xf32>
    %164 = tpu.matmul %162, %163, %cst_62 {dimension_numbers = #tpu.dot_dimension_numbers<[1], [0], [0], [1], [0, 0, 1, 1], [], []>} : vector<50x32xf32>, vector<32x32xf32>, vector<50x32xf32> -> vector<50x32xf32>
    %c640 = arith.constant 640 : index
    %c0_63 = arith.constant 0 : index
    %165 = vector.load %arg2[%c640, %c0_63] : memref<744x64xf32, #tpu.memory_space<vmem>>, vector<1x32xf32>
    %166 = vector.broadcast %165 : vector<1x32xf32> to vector<50x32xf32>
    %167 = arith.addf %164, %166 : vector<50x32xf32>
    %cst_64 = arith.constant 0.000000e+00 : f32
    %168 = vector.broadcast %cst_64 : f32 to vector<50x32xf32>
    %169 = arith.maximumf %167, %168 : vector<50x32xf32>
    %c648 = arith.constant 648 : index
    %c0_65 = arith.constant 0 : index
    %170 = vector.load %arg2[%c648, %c0_65] : memref<744x64xf32, #tpu.memory_space<vmem>>, vector<1x32xf32>
    %c656 = arith.constant 656 : index
    %c0_66 = arith.constant 0 : index
    %171 = vector.load %arg2[%c656, %c0_66] : memref<744x64xf32, #tpu.memory_space<vmem>>, vector<1x32xf32>
    %cst_67 = arith.constant dense<0.000000e+00> : vector<50xf32>
    %172 = vector.multi_reduction <add>, %169, %cst_67 [1] : vector<50x32xf32> to vector<50xf32>
    %173 = vector.shape_cast %172 : vector<50xf32> to vector<50x1xf32>
    %cst_68 = arith.constant 3.200000e+01 : f32
    %174 = vector.broadcast %cst_68 : f32 to vector<50x1xf32>
    %175 = arith.divf %173, %174 : vector<50x1xf32>
    %176 = vector.broadcast %175 : vector<50x1xf32> to vector<50x32xf32>
    %177 = arith.subf %169, %176 : vector<50x32xf32>
    %178 = arith.mulf %177, %177 : vector<50x32xf32>
    %cst_69 = arith.constant dense<0.000000e+00> : vector<50xf32>
    %179 = vector.multi_reduction <add>, %178, %cst_69 [1] : vector<50x32xf32> to vector<50xf32>
    %180 = vector.shape_cast %179 : vector<50xf32> to vector<50x1xf32>
    %cst_70 = arith.constant 3.200000e+01 : f32
    %181 = vector.broadcast %cst_70 : f32 to vector<50x1xf32>
    %182 = arith.divf %180, %181 : vector<50x1xf32>
    %183 = vector.broadcast %175 : vector<50x1xf32> to vector<50x32xf32>
    %184 = arith.subf %169, %183 : vector<50x32xf32>
    %cst_71 = arith.constant 9.99999974E-6 : f32
    %185 = vector.broadcast %cst_71 : f32 to vector<50x1xf32>
    %186 = arith.addf %182, %185 : vector<50x1xf32>
    %187 = math.rsqrt %186 : vector<50x1xf32>
    %188 = vector.broadcast %187 : vector<50x1xf32> to vector<50x32xf32>
    %189 = arith.mulf %184, %188 : vector<50x32xf32>
    %190 = vector.broadcast %170 : vector<1x32xf32> to vector<50x32xf32>
    %191 = arith.mulf %189, %190 : vector<50x32xf32>
    %192 = vector.broadcast %171 : vector<1x32xf32> to vector<50x32xf32>
    %193 = arith.addf %191, %192 : vector<50x32xf32>
    %c344 = arith.constant 344 : index
    %c0_72 = arith.constant 0 : index
    %194 = vector.load %arg2[%c344, %c0_72] : memref<744x64xf32, #tpu.memory_space<vmem>>, vector<2x50xf32>
    %cst_73 = arith.constant dense<0.000000e+00> : vector<2x32xf32>
    %195 = tpu.matmul %194, %193, %cst_73 {dimension_numbers = #tpu.dot_dimension_numbers<[1], [0], [0], [1], [0, 0, 1, 1], [], []>, precision = #tpu.contract_precision<fp32>} : vector<2x50xf32>, vector<50x32xf32>, vector<2x32xf32> -> vector<2x32xf32>
    %c664 = arith.constant 664 : index
    %c0_74 = arith.constant 0 : index
    %196 = vector.load %arg2[%c664, %c0_74] : memref<744x64xf32, #tpu.memory_space<vmem>>, vector<32x32xf32>
    %cst_75 = arith.constant dense<0.000000e+00> : vector<2x32xf32>
    %197 = tpu.matmul %195, %196, %cst_75 {dimension_numbers = #tpu.dot_dimension_numbers<[1], [0], [0], [1], [0, 0, 1, 1], [], []>} : vector<2x32xf32>, vector<32x32xf32>, vector<2x32xf32> -> vector<2x32xf32>
    %c696 = arith.constant 696 : index
    %c0_76 = arith.constant 0 : index
    %198 = vector.load %arg2[%c696, %c0_76] : memref<744x64xf32, #tpu.memory_space<vmem>>, vector<1x32xf32>
    %199 = vector.broadcast %198 : vector<1x32xf32> to vector<2x32xf32>
    %200 = arith.addf %197, %199 : vector<2x32xf32>
    %cst_77 = arith.constant 0.000000e+00 : f32
    %201 = vector.broadcast %cst_77 : f32 to vector<2x32xf32>
    %202 = arith.maximumf %200, %201 : vector<2x32xf32>
    %c704 = arith.constant 704 : index
    %c0_78 = arith.constant 0 : index
    %203 = vector.load %arg2[%c704, %c0_78] : memref<744x64xf32, #tpu.memory_space<vmem>>, vector<32x32xf32>
    %cst_79 = arith.constant dense<0.000000e+00> : vector<2x32xf32>
    %204 = tpu.matmul %202, %203, %cst_79 {dimension_numbers = #tpu.dot_dimension_numbers<[1], [0], [0], [1], [0, 0, 1, 1], [], []>} : vector<2x32xf32>, vector<32x32xf32>, vector<2x32xf32> -> vector<2x32xf32>
    %c736 = arith.constant 736 : index
    %c0_80 = arith.constant 0 : index
    %205 = vector.load %arg2[%c736, %c0_80] : memref<744x64xf32, #tpu.memory_space<vmem>>, vector<1x32xf32>
    %206 = vector.broadcast %205 : vector<1x32xf32> to vector<2x32xf32>
    %207 = arith.addf %204, %206 : vector<2x32xf32>
    %cst_81 = arith.constant 0.000000e+00 : f32
    %208 = vector.broadcast %cst_81 : f32 to vector<2x32xf32>
    %209 = arith.maximumf %207, %208 : vector<2x32xf32>
    %cst_82 = arith.constant 0.000000e+00 : f32
    %210 = vector.broadcast %cst_82 : f32 to vector<2x32xf32>
    %211 = arith.maximumf %209, %210 : vector<2x32xf32>
    %c0_83 = arith.constant 0 : index
    %c0_84 = arith.constant 0 : index
    %212 = vector.load %arg3[%c0_83, %c0_84] : memref<2x32xf32, #tpu.memory_space<vmem>>, vector<2x32xf32>
    tpu.vector_store %arg3[%c0_83, %c0_84], %211 {strides = array<i32>} : memref<2x32xf32, #tpu.memory_space<vmem>>, vector<2x32xf32>,
    return
  }
  func.func @transform_0(%arg0: i32) -> (i32, i32) {
    %c0_i32 = arith.constant 0 : i32
    %c0_i32_0 = arith.constant 0 : i32
    %c0_i32_1 = arith.constant 0 : i32
    return %c0_i32, %c0_i32_0 : i32, i32
  }
  func.func @transform_1(%arg0: i32) -> (i32, i32) {
    %c0_i32 = arith.constant 0 : i32
    %c0_i32_0 = arith.constant 0 : i32
    %c0_i32_1 = arith.constant 0 : i32
    return %c0_i32, %c0_i32_0 : i32, i32
  }
  func.func @transform_2(%arg0: i32) -> (i32, i32) {
    %c0_i32 = arith.constant 0 : i32
    %c0_i32_0 = arith.constant 0 : i32
    %c0_i32_1 = arith.constant 0 : i32
    return %c0_i32, %c0_i32_0 : i32, i32
  }
}

</mosaic_0001>

<bundles_post_ra>
// kernel: sarn_forward.1
= control target key start
LH: loop header
LB: loop body
LE: loop exit
PB: predicated region body
PF: predicated region fallthrough
CT: control target
= control target key end

     0   :  { %v15319_v3 = vmov 0.0|0.0   ;;  %vm12262_vm0 = vmmov 0   ;;  %v15348_v6 = vmov 0.0   ;;  %s15301_s0 = inlined_call_operand.vmem [shape: f32[50,34], index: 0, kind: input, shape index: {}]   ;;  %s15302_s1 = inlined_call_operand.vmem [shape: f32[744,64], index: 1, kind: input, shape index: {}]   ;;  %s15303_s2 = inlined_call_operand.hbm [shape: f32[2,32], index: 2, kind: output, shape index: {}]  }
   0x1   :  { %v41_v0 = vld [vmem:[%s15302_s1] sm:$0xff]  ;;  %v42_v1 = vld [vmem:[%s15302_s1 + $0x8] sm:$0xff]  ;;  %v43_v2 = vld [vmem:[%s15302_s1 + $0x10] sm:$0xff]  ;;  %11042 = vmatprep.subr.bf16.mxu0 %v15319_v3  ;;  %11048 = vmatprep.subr.bf16.mxu1 %v15319_v3 }
   0x2   :  { %v11043_v4 = vpack.c.bf16 %v42_v1, %v41_v0  ;;  %v44_v5 = vld [vmem:[%s15302_s1 + $0x18] sm:$0xff]  ;;  %9154 = vmatprep.mubr.msk.f32.mxu0 %vm12262_vm0, %v15348_v6  ;;  %9191 = vmatprep.mubr.msk.f32.mxu1 %vm12262_vm0, %v15348_v6  ;;  %v33_v8 = vld [vmem:[%s15302_s1 + $0xe0] sm:$0xff]  ;;  %v34_v9 = vld [vmem:[%s15302_s1 + $0xe8] sm:$0xff] }
   0x3   :  { %v11046_v7 = vpack.c.bf16 %v44_v5, %v43_v2  ;;  %v35_v10 = vld [vmem:[%s15302_s1 + $0xf0] sm:$0xff]  ;;  %v202_v11 = vand.u32 4294901760, %v33_v8  ;;  %v205_v12 = vand.u32 4294901760, %v34_v9  ;;  %v36_v13 = vld [vmem:[%s15302_s1 + $0xf8] sm:$0xff] }
   0x4   :  { %11044 = vmatpush3.bf16.msra.mxu0 %v11043_v4  ;;  %v208_v14 = vand.u32 4294901760, %v35_v10  ;;  %v211_v15 = vand.u32 4294901760, %v36_v13 }
   0x5   :  { %11045 = vmatprep.subr.bf16.mxu0 %v15319_v3 }
   0x6   :  { %7 = vsyncpa [#allocation3], 0  ;;  %v12313_v16 = vpack.c.bf16 %v205_v12, %v202_v11  ;;  %v12315_v17 = vsub.f32 %v33_v8, %v202_v11  ;;  %v12317_v18 = vsub.f32 %v34_v9, %v205_v12  ;;  %v12319_v19 = vsub.f32 %v35_v10, %v208_v14  ;;  %v45_v20 = vld [vmem:[%s15302_s1 + $0x20] sm:$0x3]  ;;  %v13_v32 = vld [vmem:[%s15301_s0 + $0x8] sm:$0xff]  ;;  %s12266_s24 = smov [#allocation2]  }
   0x7   :  { %vm73_vm1 = vcmask 1041408   ;;  %vm51_vm2 = vcmask 277504   ;;  %v12325_v21 = vsub.f32 %v36_v13, %v211_v15  ;;  %v12_v22 = vld [vmem:[%s15301_s0] sm:$0xff]  ;;  %v12332_v25 = vpack.c.bf16 %v211_v15, %v208_v14  ;;  %v14_v38 = vld [vmem:[%s15301_s0 + $0x10] sm:$0xff]  ;;  %v15_v40 = vld [vmem:[%s15301_s0 + $0x18] sm:$0xff] }
   0x8   :  { %11047 = vmatpush3.bf16.msra.mxu0 %v11046_v7  ;;  %v15318_v23 = vand.u32 4294901760, %v12315_v17  ;;  %v15317_v24 = vand.u32 4294901760, %v12317_v18  ;;  %v15315_v26 = vand.u32 4294901760, %v12319_v19  ;;  %11050 = vmatpush3.bf16.msra.mxu1 %v12313_v16  ;;  %v16_v41 = vld [vmem:[%s15301_s0 + $0x20] sm:$0xff]  ;;  %v17_v42 = vld [vmem:[%s15301_s0 + $0x28] sm:$0xff]  ;;  %v39_v50 = vld [vmem:[%s15302_s1 + $0x110] sm:$0xff] }
   0x9   :  { %9152 = vmatprep.subr.mxu0 %v15348_v6  ;;  %v15314_v27 = vand.u32 4294901760, %v12325_v21  ;;  %11051 = vmatprep.subr.bf16.mxu1 %v15319_v3  ;;  %v18_v43 = vld [vmem:[%s15301_s0 + $0x30] sm:$0x3]  ;;  %v37_v44 = vld [vmem:[%s15302_s1 + $0x100] sm:$0xff]  ;;  %v38_v45 = vld [vmem:[%s15302_s1 + $0x108] sm:$0xff]  ;;  %v220_v54 = vand.u32 4294901760, %v39_v50 }
   0xa   :  { %v348_v28 = vsub.f32 %v12315_v17, %v15318_v23  ;;  %v355_v29 = vsub.f32 %v12317_v18, %v15317_v24  ;;  %v362_v30 = vsub.f32 %v12319_v19, %v15315_v26  ;;  %v214_v46 = vand.u32 4294901760, %v37_v44  ;;  %v40_v51 = vld [vmem:[%s15302_s1 + $0x118] sm:$0xff]  ;;  %v12464_v12 = vld [vmem:[%s15302_s1 + $0x28] ss:$0 sm:$0xff] }
   0xb   :  { %v369_v31 = vsub.f32 %v12325_v21, %v15314_v27  ;;  %v217_v47 = vand.u32 4294901760, %v38_v45  ;;  %v223_v55 = vand.u32 4294901760, %v40_v51  ;;  %v12425_v58 = vsub.f32 %v39_v50, %v220_v54 }
   0xc   :  { %9153 = vmatpush3.msk.msra.mxu0 %vm73_vm1, %v45_v20  ;;  %v349_v33 = vand.u32 4294901760, %v348_v28  ;;  %v356_v34 = vand.u32 4294901760, %v355_v29  ;;  %v363_v35 = vand.u32 4294901760, %v362_v30  ;;  %11053 = vmatpush3.bf16.msra.mxu1 %v12332_v25  ;;  %v12407_v48 = vsub.f32 %v37_v44, %v214_v46 }
   0xd   :  { %9155 = vmatmul.mubr.msk.f32.vlgmr.msra.gmra.mrb[0].mxu0 %vm51_vm2, %v12_v22  ;;  %11132 = vmatprep.subr.bf16.mxu0 %v15319_v3  ;;  %v370_v36 = vand.u32 4294901760, %v369_v31  ;;  %v12409_v49 = vsub.f32 %v38_v45, %v217_v47  ;;  %v12427_v59 = vsub.f32 %v40_v51, %v223_v55  ;;  %v15308_v62 = vand.u32 4294901760, %v12425_v58 }
   0xe   :  { %9157 = vmatprep.mubr.msk.f32.mxu0 %vm12262_vm0, %v15348_v6  ;;  %11054 = vmatprep.subr.bf16.mxu1 %v15319_v3  ;;  %v12360_v37 = vpack.c.bf16 %v356_v34, %v349_v33  ;;  %v15310_v52 = vand.u32 4294901760, %v12407_v48  ;;  %v12443_v8 = vpack.c.bf16 %v217_v47, %v214_v46  ;;  %v12449_v9 = vpack.c.bf16 %v223_v55, %v220_v54 }
   0xf   :  { %v12369_v39 = vpack.c.bf16 %v370_v36, %v363_v35  ;;  %v15309_v53 = vand.u32 4294901760, %v12409_v49  ;;  %v15307_v63 = vand.u32 4294901760, %v12427_v59  ;;  %v390_v1 = vsub.f32 %v12425_v58, %v15308_v62 }
  0x10   :  { %15358 = vst [vmem:[#allocation5_spill] sm:$0xff] %v12360_v37  ;;  %11134 = vmatpush3.bf16.msra.mxu0 %v12360_v37  ;;  %v376_v56 = vsub.f32 %v12407_v48, %v15310_v52  ;;  %11056 = vmatpush3.bf16.msra.mxu1 %v12443_v8  ;;  %v12455_v10 = vpack.c.bf16 %v12409_v49, %v12407_v48  ;;  %vm179_vm3 = vcmask 523264   ;;  %vm3919_vm13 = vcmask 15360  }
  0x11   :  { %9158 = vmatmul.mubr.msk.f32.gmra.mrb[2].mxu0 %vm51_vm2, %v13_v32  ;;  %15359 = vst [vmem:[#allocation6_spill] sm:$0xff] %v12369_v39  ;;  %11135 = vmatprep.subr.bf16.mxu0 %v15319_v3  ;;  %v383_v57 = vsub.f32 %v12409_v49, %v15309_v53  ;;  %v397_v2 = vsub.f32 %v12427_v59, %v15307_v63  ;;  %v391_v4 = vand.u32 4294901760, %v390_v1 }
  0x12   :  { %9160 = vmatprep.mubr.msk.f32.mxu0 %vm12262_vm0, %v15348_v6  ;;  %v377_v60 = vand.u32 4294901760, %v376_v56  ;;  %11057 = vmatprep.subr.bf16.mxu1 %v15319_v3  ;;  %v12459_v11 = vpack.c.bf16 %v12427_v59, %v12425_v58  ;;  %v12481_v33 = vpack.c.bf16 %v12317_v18, %v12315_v17  ;;  %v12508_v47 = vpack.c.bf16 %v12325_v21, %v12319_v19 }
  0x13   :  { %v384_v61 = vand.u32 4294901760, %v383_v57  ;;  %v398_v5 = vand.u32 4294901760, %v397_v2 }
  0x14   :  { %11137 = vmatpush3.bf16.msra.mxu0 %v12369_v39  ;;  %11059 = vmatpush3.bf16.msra.mxu1 %v12449_v9 }
  0x15   :  { %9161 = vmatmul.mubr.msk.f32.gmra.mrb[4].mxu0 %vm51_vm2, %v14_v38  ;;  %11138 = vmatprep.subr.bf16.mxu0 %v15319_v3  ;;  %v12431_v0 = vpack.c.bf16 %v384_v61, %v377_v60  ;;  %v12441_v7 = vpack.c.bf16 %v398_v5, %v391_v4 }
  0x16   :  { %9163 = vmatprep.mubr.msk.f32.mxu0 %vm12262_vm0, %v15348_v6  ;;  %11060 = vmatprep.subr.bf16.mxu1 %v15319_v3 }
  0x17   :  { %15360 = vst [vmem:[#allocation7_spill] sm:$0xff] %v12431_v0  ;;  %15361 = vst [vmem:[#allocation8_spill] sm:$0xff] %v12441_v7 }
  0x18   :  { %11140 = vmatpush3.bf16.msra.mxu0 %v12431_v0 }
  0x19   :  { %9164 = vmatmul.mubr.msk.f32.gmra.mrb[6].mxu0 %vm51_vm2, %v15_v40  ;;  %11141 = vmatprep.subr.bf16.mxu0 %v15319_v3 }
  0x1a   :  { %9166 = vmatprep.mubr.msk.f32.mxu0 %vm12262_vm0, %v15348_v6 }
  0x1c   :  { %11143 = vmatpush3.bf16.msra.mxu0 %v12441_v7 }
  0x1d   :  { %9167 = vmatmul.mubr.msk.f32.gmra.mrb[8].mxu0 %vm51_vm2, %v16_v41  ;;  %11144 = vmatprep.subr.bf16.mxu0 %v15319_v3 }
  0x1e   :  { %9169 = vmatprep.mubr.msk.f32.mxu0 %vm12262_vm0, %v15348_v6 }
  0x21   :  { %9170 = vmatmul.mubr.msk.f32.gmra.mrb[10].mxu0 %vm51_vm2, %v17_v42 }
  0x22   :  { %9172 = vmatprep.mubr.msk.f32.mxu0 %vm12262_vm0, %v15348_v6 }
  0x25   :  { %9173 = vmatmul.mubr.msk.f32.gmra.mrb[12].mxu0 %vm51_vm2, %v18_v43 }
  0x26   :  { %9450 = vmatprep.mubr.msk.f32.mxu0 %vm12262_vm0, %v15348_v6 }
  0xe0   :  { %v143_v13 = vpop.f32.mrb[0].mxu0 }
  0xe1   :  { %v12467_v14 = vadd.f32 %v12464_v12, %v143_v13  ;;  %v9156_v15 = vpop.f32.mrb[1].mxu0 }
  0xe3   :  { %v181_v20 = vsel %vm179_vm3, %v12467_v14, 0  ;;  %v996_v22 = vmul.f32 %v12467_v14, %v12467_v14 }
  0xe4   :  { %v12473_v28 = vand.u32 4294901760, %v181_v20  ;;  %v148_v29 = vpop.f32.mrb[2].mxu0 }
  0xe5   :  { %v1004_v30 = vsel %vm179_vm3, %v996_v22, 0  ;;  %v12477_v31 = vadd.f32 %v12464_v12, %v148_v29  ;;  %v9159_v32 = vpop.f32.mrb[3].mxu0 }
  0xe6   :  { %v12484_v34 = vsub.f32 %v181_v20, %v12473_v28  ;;  %v12486_v35 = vand.u32 4294901760, %v1004_v30 }
  0xe7   :  { %v184_v36 = vsel %vm179_vm3, %v12477_v31, 0  ;;  %v997_v38 = vmul.f32 %v12477_v31, %v12477_v31 }
  0xe8   :  { %v12493_v40 = vsub.f32 %v1004_v30, %v12486_v35  ;;  %v12495_v41 = vand.u32 4294901760, %v184_v36  ;;  %v153_v42 = vpop.f32.mrb[4].mxu0  ;;  %9451 = vmatmul.mubr.f32.vlgmr.msra.gmra.mrb[14].mxu0 %v12486_v35  ;;  %v15306_v43 = vand.u32 4294901760, %v12484_v34 }
  0xe9   :  { %v1007_v44 = vsel %vm179_vm3, %v997_v38, 0  ;;  %v12501_v45 = vadd.f32 %v12464_v12, %v153_v42  ;;  %v9162_v46 = vpop.f32.mrb[5].mxu0  ;;  %9453 = vmatprep.mubr.msk.f32.mxu0 %vm12262_vm0, %v15348_v6  ;;  %11146 = vmatpush3.bf16.msra.mxu0 %v12481_v33 }
  0xea   :  { %v12511_v50 = vsub.f32 %v184_v36, %v12495_v41  ;;  %v12513_v51 = vand.u32 4294901760, %v1007_v44  ;;  %v277_v54 = vsub.f32 %v12484_v34, %v15306_v43  ;;  %11147 = vmatprep.subr.bf16.mxu0 %v15319_v3  ;;  %v15316_v55 = vand.u32 4294901760, %v12493_v40 }
  0xeb   :  { %v187_v56 = vsel %vm179_vm3, %v12501_v45, 0  ;;  %v998_v57 = vmul.f32 %v12501_v45, %v12501_v45 }
  0xec   :  { %v12524_v60 = vand.u32 4294901760, %v187_v56  ;;  %v158_v61 = vpop.f32.mrb[6].mxu0  ;;  %9454 = vmatmul.mubr.f32.gmra.mrb[16].mxu0 %v12513_v51  ;;  %v278_v1 = vand.u32 4294901760, %v277_v54  ;;  %v15304_v2 = vand.u32 4294901760, %v12511_v50  ;;  %v12529_v4 = vsub.f32 %v1007_v44, %v12513_v51 }
  0xed   :  { %v1010_v5 = vsel %vm179_vm3, %v998_v57, 0  ;;  %v12533_v13 = vadd.f32 %v12464_v12, %v158_v61  ;;  %v9165_v15 = vpop.f32.mrb[7].mxu0  ;;  %9456 = vmatprep.mubr.msk.f32.mxu0 %vm12262_vm0, %v15348_v6  ;;  %11149 = vmatpush3.bf16.msra.mxu0 %v12508_v47  ;;  %v12541_v20 = vsub.f32 %v12493_v40, %v15316_v55 }
  0xee   :  { %v12544_v22 = vsub.f32 %v187_v56, %v12524_v60  ;;  %9192 = vmatmul.mubr.f32.vlgmr.msra.gmra.mrb[0].mxu1 %v278_v1  ;;  %v12546_v29 = vand.u32 4294901760, %v1010_v5  ;;  %v287_v30 = vsub.f32 %v12511_v50, %v15304_v2  ;;  %11150 = vmatprep.subr.bf16.mxu0 %v15319_v3  ;;  %v15311_v32 = vand.u32 4294901760, %v12529_v4 }
  0xef   :  { %v190_v36 = vsel %vm179_vm3, %v12533_v13, 0  ;;  %v999_v38 = vmul.f32 %v12533_v13, %v12533_v13  ;;  %9194 = vmatprep.mubr.msk.f32.mxu1 %vm12262_vm0, %v15348_v6  ;;  %11062 = vmatpush3.bf16.msra.mxu1 %v12360_v37 }
  0xf0   :  { %v12560_v42 = vand.u32 4294901760, %v190_v36  ;;  %v163_v44 = vpop.f32.mrb[8].mxu0  ;;  %9457 = vmatmul.mubr.f32.gmra.mrb[18].mxu0 %v12546_v29  ;;  %v288_v46 = vand.u32 4294901760, %v287_v30  ;;  %v15305_v54 = vand.u32 4294901760, %v12544_v22  ;;  %11063 = vmatprep.subr.bf16.mxu1 %v15319_v3  ;;  %v12566_v56 = vsub.f32 %v1010_v5, %v12546_v29 }
  0xf1   :  { %v1013_v57 = vsel %vm179_vm3, %v999_v38, 0  ;;  %v12570_v61 = vadd.f32 %v12464_v12, %v163_v44  ;;  %v9168_v1 = vpop.f32.mrb[9].mxu0  ;;  %9459 = vmatprep.mubr.msk.f32.mxu0 %vm12262_vm0, %v15348_v6  ;;  %11152 = vmatpush3.bf16.msra.mxu0 %v12455_v10  ;;  %v12578_v15 = vsub.f32 %v12529_v4, %v15311_v32 }
  0xf2   :  { %v12581_v30 = vsub.f32 %v190_v36, %v12560_v42  ;;  %9195 = vmatmul.mubr.f32.gmra.mrb[2].mxu1 %v288_v46  ;;  %v12583_v5 = vand.u32 4294901760, %v1013_v57  ;;  %v297_v38 = vsub.f32 %v12544_v22, %v15305_v54  ;;  %11153 = vmatprep.subr.bf16.mxu0 %v15319_v3  ;;  %v15312_v44 = vand.u32 4294901760, %v12566_v56 }
  0xf3   :  { %v193_v1 = vsel %vm179_vm3, %v12570_v61, 0  ;;  %v1000_v2 = vmul.f32 %v12570_v61, %v12570_v61  ;;  %9197 = vmatprep.mubr.msk.f32.mxu1 %vm12262_vm0, %v15348_v6  ;;  %11065 = vmatpush3.bf16.msra.mxu1 %v12369_v39 }
  0xf4   :  { %v12597_v36 = vand.u32 4294901760, %v193_v1  ;;  %v168_v46 = vpop.f32.mrb[10].mxu0  ;;  %9460 = vmatmul.mubr.f32.gmra.mrb[20].mxu0 %v12583_v5  ;;  %v298_v54 = vand.u32 4294901760, %v297_v38  ;;  %v15313_v43 = vand.u32 4294901760, %v12581_v30  ;;  %11066 = vmatprep.subr.bf16.mxu1 %v15319_v3  ;;  %v12603_v63 = vsub.f32 %v1013_v57, %v12583_v5 }
  0xf5   :  { %v1016_v62 = vsel %vm179_vm3, %v1000_v2, 0  ;;  %v12607_v53 = vadd.f32 %v12464_v12, %v168_v46  ;;  %v9171_v52 = vpop.f32.mrb[11].mxu0  ;;  %9462 = vmatprep.mubr.msk.f32.mxu0 %vm12262_vm0, %v15348_v6  ;;  %11155 = vmatpush3.bf16.msra.mxu0 %v12459_v11  ;;  %v12615_v38 = vsub.f32 %v12566_v56, %v15312_v44 }
  0xf6   :  { %v12618_v32 = vsub.f32 %v193_v1, %v12597_v36  ;;  %9198 = vmatmul.mubr.f32.gmra.mrb[4].mxu1 %v298_v54  ;;  %v12620_v57 = vand.u32 4294901760, %v1016_v62  ;;  %v307_v52 = vsub.f32 %v12581_v30, %v15313_v43  ;;  %11156 = vmatprep.subr.bf16.mxu0 %v15319_v3  ;;  %v15321_v2 = vand.u32 4294901760, %v12603_v63 }
  0xf7   :  { %v196_v46 = vsel %vm179_vm3, %v12607_v53, 0  ;;  %v1001_v44 = vmul.f32 %v12607_v53, %v12607_v53  ;;  %9200 = vmatprep.mubr.msk.f32.mxu1 %vm12262_vm0, %v15348_v6  ;;  %11068 = vmatpush3.bf16.msra.mxu1 %v12431_v0 }
  0xf8   :  { %v12634_v54 = vand.u32 4294901760, %v196_v46  ;;  %v173_v1 = vpop.f32.mrb[12].mxu0  ;;  %9463 = vmatmul.mubr.f32.gmra.mrb[22].mxu0 %v12620_v57  ;;  %v308_v43 = vand.u32 4294901760, %v307_v52  ;;  %11069 = vmatprep.subr.bf16.mxu1 %v15319_v3  ;;  %v12640_v26 = vsub.f32 %v1016_v62, %v12620_v57  ;;  %v12651_v52 = vsub.f32 %v12603_v63, %v15321_v2 }
  0xf9   :  { %v1019_v55 = vsel %vm179_vm3, %v1001_v44, 0  ;;  %v12644_v24 = vadd.f32 %v12464_v12, %v173_v1  ;;  %v9174_v23 = vpop.f32.mrb[13].mxu0  ;;  %9465 = vmatprep.mubr.msk.f32.mxu0 %vm12262_vm0, %v15348_v6  ;;  %v15363_v44 = vand.u32 4294901760, %v12618_v32  ;;  %v15364_v2 = vmov 0.0|0.0  }
  0xfa   :  { %v12654_v27 = vsub.f32 %v196_v46, %v12634_v54  ;;  %9201 = vmatmul.mubr.f32.gmra.mrb[6].mxu1 %v308_v43  ;;  %v12656_v62 = vand.u32 4294901760, %v1019_v55  ;;  %v15365_v39 = vand.u32 4294901760, %v12640_v26 }
  0xfb   :  { %15362 = vst [vmem:[#allocation9_spill] sm:$0xff] %v12644_v24  ;;  %v317_v12 = vsub.f32 %v12618_v32, %v15363_v44  ;;  %v199_v1 = vsel %vm179_vm3, %v12644_v24, 0  ;;  %v1002_v3 = vmul.f32 %v12644_v24, %v12644_v24  ;;  %9203 = vmatprep.mubr.msk.f32.mxu1 %vm12262_vm0, %v15348_v6  ;;  %11071 = vmatpush3.bf16.msra.mxu1 %v12441_v7 }
  0xfc   :  { %v12669_v43 = vand.u32 4294901760, %v199_v1  ;;  %9466 = vmatmul.mubr.f32.gmra.mrb[24].mxu0 %v12656_v62  ;;  %v15331_v44 = vand.u32 4294901760, %v12654_v27  ;;  %11072 = vmatprep.subr.bf16.mxu1 %v15364_v2  ;;  %v12675_v23 = vsub.f32 %v1019_v55, %v12656_v62  ;;  %v12683_v7 = vsub.f32 %v12640_v26, %v15365_v39 }
  0xfd   :  { %v318_v46 = vand.u32 4294901760, %v317_v12  ;;  %v1022_v0 = vsel %vm179_vm3, %v1002_v3, 0  ;;  %9468 = vmatprep.mubr.msk.f32.mxu0 %vm12262_vm0, %v15348_v6 }
  0xfe   :  { %v12686_v37 = vsub.f32 %v199_v1, %v12669_v43  ;;  %v12688_v12 = vand.u32 4294901760, %v1022_v0  ;;  %v327_v55 = vsub.f32 %v12654_v27, %v15331_v44  ;;  %v15332_v3 = vand.u32 4294901760, %v12675_v23 }
  0xff   :  { %9204 = vmatmul.mubr.f32.gmra.mrb[8].mxu1 %v318_v46 }
 0x100   :  { %9206 = vmatprep.mubr.msk.f32.mxu1 %vm12262_vm0, %v15348_v6  ;;  %9469 = vmatmul.mubr.f32.gmra.mrb[26].mxu0 %v12688_v12  ;;  %v328_v24 = vand.u32 4294901760, %v327_v55  ;;  %v15333_v39 = vand.u32 4294901760, %v12686_v37  ;;  %v12699_v1 = vsub.f32 %v1022_v0, %v12688_v12  ;;  %v12704_v46 = vsub.f32 %v12675_v23, %v15332_v3 }
 0x101   :  { %9487 = vmatprep.mubr.msk.f32.mxu0 %vm12262_vm0, %v15348_v6 }
 0x102   :  { %v337_v44 = vsub.f32 %v12686_v37, %v15333_v39  ;;  %v15334_v55 = vand.u32 4294901760, %v12699_v1  ;;  %v15368_v39 = vand.u32 4294901760, %v12493_v40 }
 0x103   :  { %9207 = vmatmul.mubr.f32.gmra.mrb[10].mxu1 %v328_v24  ;;  %v15366_v24 = vand.u32 4294901760, %v12315_v17  ;;  %v15370_v17 = vand.u32 4294901760, %v12325_v21  ;;  %v15373_v21 = vand.u32 4294901760, %v12409_v49  ;;  %v15376_v49 = vand.u32 4294901760, %v12427_v59 }
 0x104   :  { %9209 = vmatprep.mubr.msk.f32.mxu1 %vm12262_vm0, %v15348_v6  ;;  %9488 = vmatmul.mubr.f32.vlgmr.msra.gmra.mrb[14].mxu0 %v12493_v40  ;;  %v338_v0 = vand.u32 4294901760, %v337_v44  ;;  %v12718_v3 = vsub.f32 %v12699_v1, %v15334_v55  ;;  %v15367_v44 = vand.u32 4294901760, %v12317_v18  ;;  %v15369_v55 = vand.u32 4294901760, %v12319_v19 }
 0x105   :  { %9490 = vmatprep.mubr.msk.f32.mxu0 %vm12262_vm0, %v15348_v6  ;;  %11158 = vmatpush3.bf16.msra.mxu0 %v12313_v16  ;;  %v15371_v40 = vand.u32 4294901760, %v12529_v4  ;;  %v15372_v19 = vand.u32 4294901760, %v12407_v48  ;;  %v15375_v48 = vand.u32 4294901760, %v12425_v58  ;;  %v15378_v58 = vand.u32 4294901760, %v12640_v26 }
 0x106   :  { %11159 = vmatprep.subr.bf16.mxu0 %v15364_v2  ;;  %v12791_v18 = vpack.c.bf16 %v15370_v17, %v15369_v55  ;;  %v15379_v59 = vand.u32 4294901760, %v12675_v23 }
 0x107   :  { %9210 = vmatmul.mubr.f32.gmra.mrb[12].mxu1 %v338_v0  ;;  %v12777_v0 = vpack.c.bf16 %v15367_v44, %v15366_v24  ;;  %v12823_v55 = vpack.c.bf16 %v15376_v49, %v15375_v48 }
 0x108   :  { %9228 = vmatprep.mubr.msk.f32.mxu1 %vm12262_vm0, %v15348_v6  ;;  %9491 = vmatmul.mubr.f32.gmra.mrb[16].mxu0 %v12529_v4  ;;  %v15374_v4 = vand.u32 4294901760, %v12566_v56 }
 0x109   :  { %9493 = vmatprep.mubr.msk.f32.mxu0 %vm12262_vm0, %v15348_v6  ;;  %11161 = vmatpush3.bf16.msra.mxu0 %v12332_v25 }
 0x10a   :  { %11162 = vmatprep.subr.bf16.mxu0 %v15364_v2 }
 0x10b   :  { %9229 = vmatmul.mubr.f32.vlgmr.msra.gmra.mrb[0].mxu1 %v12473_v28 }
 0x10c   :  { %9231 = vmatprep.mubr.msk.f32.mxu1 %vm12262_vm0, %v15348_v6  ;;  %11074 = vmatpush3.bf16.msra.mxu1 %v12481_v33 }
 0x10d   :  { %9494 = vmatmul.mubr.f32.gmra.mrb[18].mxu0 %v12566_v56  ;;  %11075 = vmatprep.subr.bf16.mxu1 %v15364_v2  ;;  %v15377_v56 = vand.u32 4294901760, %v12603_v63 }
 0x10e   :  { %9496 = vmatprep.mubr.msk.f32.mxu0 %vm12262_vm0, %v15348_v6  ;;  %11164 = vmatpush3.bf16.msra.mxu0 %v12443_v8 }
 0x10f   :  { %9232 = vmatmul.mubr.f32.gmra.mrb[2].mxu1 %v12495_v41  ;;  %11165 = vmatprep.subr.bf16.mxu0 %v15364_v2 }
 0x110   :  { %9234 = vmatprep.mubr.msk.f32.mxu1 %vm12262_vm0, %v15348_v6  ;;  %11077 = vmatpush3.bf16.msra.mxu1 %v12508_v47 }
 0x111   :  { %9497 = vmatmul.mubr.f32.gmra.mrb[20].mxu0 %v12603_v63  ;;  %11078 = vmatprep.subr.bf16.mxu1 %v15364_v2  ;;  %v15381_v63 = vand.u32 4294901760, %v12484_v34 }
 0x112   :  { %9499 = vmatprep.mubr.msk.f32.mxu0 %vm12262_vm0, %v15348_v6  ;;  %11167 = vmatpush3.bf16.msra.mxu0 %v12449_v9 }
 0x113   :  { %9235 = vmatmul.mubr.f32.gmra.mrb[4].mxu1 %v12524_v60  ;;  %11168 = vmatprep.subr.bf16.mxu0 %v15364_v2 }
 0x114   :  { %9237 = vmatprep.mubr.msk.f32.mxu1 %vm12262_vm0, %v15348_v6  ;;  %11080 = vmatpush3.bf16.msra.mxu1 %v12455_v10 }
 0x115   :  { %9500 = vmatmul.mubr.f32.gmra.mrb[22].mxu0 %v12640_v26  ;;  %11081 = vmatprep.subr.bf16.mxu1 %v15364_v2  ;;  %v15380_v26 = vand.u32 4294901760, %v12699_v1 }
 0x116   :  { %9502 = vmatprep.mubr.msk.f32.mxu0 %vm12262_vm0, %v15348_v6 }
 0x117   :  { %9238 = vmatmul.mubr.f32.gmra.mrb[6].mxu1 %v12560_v42 }
 0x118   :  { %9240 = vmatprep.mubr.msk.f32.mxu1 %vm12262_vm0, %v15348_v6  ;;  %11083 = vmatpush3.bf16.msra.mxu1 %v12459_v11 }
 0x119   :  { %9503 = vmatmul.mubr.f32.gmra.mrb[24].mxu0 %v12675_v23  ;;  %11084 = vmatprep.subr.bf16.mxu1 %v15364_v2  ;;  %v15382_v23 = vand.u32 4294901760, %v12511_v50 }
 0x11a   :  { %9505 = vmatprep.mubr.msk.f32.mxu0 %vm12262_vm0, %v15348_v6 }
 0x11b   :  { %9241 = vmatmul.mubr.f32.gmra.mrb[8].mxu1 %v12597_v36 }
 0x11c   :  { %9243 = vmatprep.mubr.msk.f32.mxu1 %vm12262_vm0, %v15348_v6 }
 0x11d   :  { %9506 = vmatmul.mubr.f32.gmra.mrb[26].mxu0 %v12699_v1 }
 0x11e   :  { %9524 = vmatprep.mubr.msk.f32.mxu0 %vm12262_vm0, %v15348_v6 }
 0x11f   :  { %9244 = vmatmul.mubr.f32.gmra.mrb[10].mxu1 %v12634_v54 }
 0x120   :  { %9246 = vmatprep.mubr.msk.f32.mxu1 %vm12262_vm0, %v15348_v6 }
 0x121   :  { %9525 = vmatmul.mubr.f32.vlgmr.msra.gmra.mrb[14].mxu0 %v15368_v39  ;;  %v12806_v39 = vpack.c.bf16 %v15373_v21, %v15372_v19 }
 0x122   :  { %9527 = vmatprep.mubr.msk.f32.mxu0 %vm12262_vm0, %v15348_v6  ;;  %11170 = vmatpush3.bf16.msra.mxu0 %v12777_v0 }
 0x123   :  { %9247 = vmatmul.mubr.f32.gmra.mrb[12].mxu1 %v12669_v43  ;;  %11171 = vmatprep.subr.bf16.mxu0 %v15364_v2 }
 0x124   :  { %9265 = vmatprep.mubr.msk.f32.mxu1 %vm12262_vm0, %v15348_v6 }
 0x125   :  { %9528 = vmatmul.mubr.f32.gmra.mrb[16].mxu0 %v15371_v40 }
 0x126   :  { %9530 = vmatprep.mubr.msk.f32.mxu0 %vm12262_vm0, %v15348_v6  ;;  %11173 = vmatpush3.bf16.msra.mxu0 %v12791_v18 }
 0x127   :  { %9266 = vmatmul.mubr.f32.vlgmr.msra.gmra.mrb[0].mxu1 %v12484_v34  ;;  %11174 = vmatprep.subr.bf16.mxu0 %v15364_v2  ;;  %v15383_v34 = vand.u32 4294901760, %v12544_v22 }
 0x128   :  { %9268 = vmatprep.mubr.msk.f32.mxu1 %vm12262_vm0, %v15348_v6  ;;  %11086 = vmatpush3.bf16.msra.mxu1 %v12313_v16 }
 0x129   :  { %9531 = vmatmul.mubr.f32.gmra.mrb[18].mxu0 %v15374_v4  ;;  %11087 = vmatprep.subr.bf16.mxu1 %v15364_v2 }
 0x12a   :  { %9533 = vmatprep.mubr.msk.f32.mxu0 %vm12262_vm0, %v15348_v6  ;;  %11176 = vmatpush3.bf16.msra.mxu0 %v12806_v39 }
 0x12b   :  { %9269 = vmatmul.mubr.f32.gmra.mrb[2].mxu1 %v12511_v50  ;;  %11177 = vmatprep.subr.bf16.mxu0 %v15364_v2  ;;  %v15384_v50 = vand.u32 4294901760, %v12581_v30 }
 0x12c   :  { %9271 = vmatprep.mubr.msk.f32.mxu1 %vm12262_vm0, %v15348_v6  ;;  %11089 = vmatpush3.bf16.msra.mxu1 %v12332_v25 }
 0x12d   :  { %9534 = vmatmul.mubr.f32.gmra.mrb[20].mxu0 %v15377_v56  ;;  %11090 = vmatprep.subr.bf16.mxu1 %v15364_v2 }
 0x12e   :  { %9536 = vmatprep.mubr.msk.f32.mxu0 %vm12262_vm0, %v15348_v6  ;;  %11179 = vmatpush3.bf16.msra.mxu0 %v12823_v55 }
 0x12f   :  { %9272 = vmatmul.mubr.f32.gmra.mrb[4].mxu1 %v12544_v22  ;;  %11180 = vmatprep.subr.bf16.mxu0 %v15364_v2  ;;  %v15385_v22 = vand.u32 4294901760, %v12618_v32 }
 0x130   :  { %9274 = vmatprep.mubr.msk.f32.mxu1 %vm12262_vm0, %v15348_v6  ;;  %11092 = vmatpush3.bf16.msra.mxu1 %v12443_v8 }
 0x131   :  { %9537 = vmatmul.mubr.f32.gmra.mrb[22].mxu0 %v15378_v58  ;;  %11093 = vmatprep.subr.bf16.mxu1 %v15364_v2 }
 0x132   :  { %9539 = vmatprep.mubr.msk.f32.mxu0 %vm12262_vm0, %v15348_v6 }
 0x133   :  { %9275 = vmatmul.mubr.f32.gmra.mrb[6].mxu1 %v12581_v30  ;;  %v15386_v30 = vand.u32 4294901760, %v12654_v27 }
 0x134   :  { %9277 = vmatprep.mubr.msk.f32.mxu1 %vm12262_vm0, %v15348_v6  ;;  %11095 = vmatpush3.bf16.msra.mxu1 %v12449_v9 }
 0x135   :  { %9540 = vmatmul.mubr.f32.gmra.mrb[24].mxu0 %v15379_v59  ;;  %11096 = vmatprep.subr.bf16.mxu1 %v15364_v2 }
 0x136   :  { %9542 = vmatprep.mubr.msk.f32.mxu0 %vm12262_vm0, %v15348_v6 }
 0x137   :  { %9278 = vmatmul.mubr.f32.gmra.mrb[8].mxu1 %v12618_v32  ;;  %v15387_v32 = vand.u32 4294901760, %v12686_v37 }
 0x138   :  { %9280 = vmatprep.mubr.msk.f32.mxu1 %vm12262_vm0, %v15348_v6 }
 0x139   :  { %9543 = vmatmul.mubr.f32.gmra.mrb[26].mxu0 %v15380_v26 }
 0x13a   :  { %9561 = vmatprep.mubr.msk.f32.mxu0 %vm12262_vm0, %v15348_v6 }
 0x13b   :  { %9281 = vmatmul.mubr.f32.gmra.mrb[10].mxu1 %v12654_v27  ;;  %v1101_v27 = vand.u32 4294901760, %v12541_v20  ;;  %v1891_v20 = vld [vmem:[%s15302_s1 + $0x48] sm:$0xff] }
 0x13c   :  { %9283 = vmatprep.mubr.msk.f32.mxu1 %vm12262_vm0, %v15348_v6 }
 0x13d   :  { %9562 = vmatmul.mubr.f32.vlgmr.msra.gmra.mrb[14].mxu0 %v12486_v35 }
 0x13e   :  { %9564 = vmatprep.mubr.msk.f32.mxu0 %vm12262_vm0, %v15348_v6  ;;  %11182 = vmatpush3.bf16.msra.mxu0 %v12313_v16 }
 0x13f   :  { %9284 = vmatmul.mubr.f32.gmra.mrb[12].mxu1 %v12686_v37  ;;  %11183 = vmatprep.subr.bf16.mxu0 %v15364_v2  ;;  %v1111_v37 = vand.u32 4294901760, %v12578_v15  ;;  %v1893_v15 = vld [vmem:[%s15302_s1 + $0x58] sm:$0xff] }
 0x140   :  { %9302 = vmatprep.mubr.msk.f32.mxu1 %vm12262_vm0, %v15348_v6 }
 0x141   :  { %9565 = vmatmul.mubr.f32.gmra.mrb[16].mxu0 %v12513_v51 }
 0x142   :  { %9567 = vmatprep.mubr.msk.f32.mxu0 %vm12262_vm0, %v15348_v6  ;;  %11185 = vmatpush3.bf16.msra.mxu0 %v12332_v25 }
 0x143   :  { %9303 = vmatmul.mubr.f32.vlgmr.msra.gmra.mrb[0].mxu1 %v15381_v63  ;;  %11186 = vmatprep.subr.bf16.mxu0 %v15364_v2 }
 0x144   :  { %9305 = vmatprep.mubr.msk.f32.mxu1 %vm12262_vm0, %v15348_v6  ;;  %11098 = vmatpush3.bf16.msra.mxu1 %v12777_v0 }
 0x145   :  { %9568 = vmatmul.mubr.f32.gmra.mrb[18].mxu0 %v12546_v29  ;;  %11099 = vmatprep.subr.bf16.mxu1 %v15364_v2 }
 0x146   :  { %9570 = vmatprep.mubr.msk.f32.mxu0 %vm12262_vm0, %v15348_v6  ;;  %11188 = vmatpush3.bf16.msra.mxu0 %v12443_v8 }
 0x147   :  { %9306 = vmatmul.mubr.f32.gmra.mrb[2].mxu1 %v15382_v23  ;;  %11189 = vmatprep.subr.bf16.mxu0 %v15364_v2 }
 0x148   :  { %9308 = vmatprep.mubr.msk.f32.mxu1 %vm12262_vm0, %v15348_v6  ;;  %11101 = vmatpush3.bf16.msra.mxu1 %v12791_v18 }
 0x149   :  { %9571 = vmatmul.mubr.f32.gmra.mrb[20].mxu0 %v12583_v5  ;;  %11102 = vmatprep.subr.bf16.mxu1 %v15364_v2 }
 0x14a   :  { %9573 = vmatprep.mubr.msk.f32.mxu0 %vm12262_vm0, %v15348_v6  ;;  %11191 = vmatpush3.bf16.msra.mxu0 %v12449_v9 }
 0x14b   :  { %9309 = vmatmul.mubr.f32.gmra.mrb[4].mxu1 %v15383_v34  ;;  %11204 = vmatprep.subr.bf16.mxu0 %v15364_v2 }
 0x14c   :  { %9311 = vmatprep.mubr.msk.f32.mxu1 %vm12262_vm0, %v15348_v6  ;;  %11104 = vmatpush3.bf16.msra.mxu1 %v12806_v39 }
 0x14d   :  { %9574 = vmatmul.mubr.f32.gmra.mrb[22].mxu0 %v12620_v57  ;;  %11105 = vmatprep.subr.bf16.mxu1 %v15364_v2 }
 0x14e   :  { %9576 = vmatprep.mubr.msk.f32.mxu0 %vm12262_vm0, %v15348_v6 }
 0x14f   :  { %9312 = vmatmul.mubr.f32.gmra.mrb[6].mxu1 %v15384_v50 }
 0x150   :  { %9314 = vmatprep.mubr.msk.f32.mxu1 %vm12262_vm0, %v15348_v6  ;;  %11107 = vmatpush3.bf16.msra.mxu1 %v12823_v55 }
 0x151   :  { %9577 = vmatmul.mubr.f32.gmra.mrb[24].mxu0 %v12656_v62  ;;  %11108 = vmatprep.subr.bf16.mxu1 %v15364_v2 }
 0x152   :  { %9579 = vmatprep.mubr.msk.f32.mxu0 %vm12262_vm0, %v15348_v6 }
 0x153   :  { %9315 = vmatmul.mubr.f32.gmra.mrb[8].mxu1 %v15385_v22 }
 0x154   :  { %9317 = vmatprep.mubr.msk.f32.mxu1 %vm12262_vm0, %v15348_v6 }
 0x155   :  { %9580 = vmatmul.mubr.f32.gmra.mrb[26].mxu0 %v12688_v12 }
 0x156   :  { %9598 = vmatprep.mubr.msk.f32.mxu0 %vm12262_vm0, %v15348_v6 }
 0x157   :  { %9318 = vmatmul.mubr.f32.gmra.mrb[10].mxu1 %v15386_v30 }
 0x158   :  { %9320 = vmatprep.mubr.msk.f32.mxu1 %vm12262_vm0, %v15348_v6 }
 0x159   :  { %9599 = vmatmul.mubr.f32.vlgmr.msra.gmra.mrb[14].mxu0 %v12486_v35  ;;  %v1131_v35 = vand.u32 4294901760, %v12651_v52  ;;  %v1897_v52 = vld [vmem:[%s15302_s1 + $0x78] sm:$0xff] }
 0x15a   :  { %9601 = vmatprep.mubr.msk.f32.mxu0 %vm12262_vm0, %v15348_v6  ;;  %11206 = vmatpush3.bf16.msra.mxu0 %v12313_v16 }
 0x15b   :  { %9321 = vmatmul.mubr.f32.gmra.mrb[12].mxu1 %v15387_v32  ;;  %11207 = vmatprep.subr.bf16.mxu0 %v15364_v2 }
 0x15c   :  { %9339 = vmatprep.mubr.msk.f32.mxu1 %vm12262_vm0, %v15348_v6 }
 0x15d   :  { %9602 = vmatmul.mubr.f32.gmra.mrb[16].mxu0 %v12513_v51  ;;  %v1151_v51 = vand.u32 4294901760, %v12704_v46 }
 0x15e   :  { %9604 = vmatprep.mubr.msk.f32.mxu0 %vm12262_vm0, %v15348_v6  ;;  %11209 = vmatpush3.bf16.msra.mxu0 %v12332_v25 }
 0x15f   :  { %9340 = vmatmul.mubr.f32.vlgmr.msra.gmra.mrb[0].mxu1 %v12473_v28  ;;  %11210 = vmatprep.subr.bf16.mxu0 %v15364_v2 }
 0x160   :  { %9342 = vmatprep.mubr.msk.f32.mxu1 %vm12262_vm0, %v15348_v6  ;;  %11110 = vmatpush3.bf16.msra.mxu1 %v12313_v16 }
 0x161   :  { %9605 = vmatmul.mubr.f32.gmra.mrb[18].mxu0 %v12546_v29  ;;  %11111 = vmatprep.subr.bf16.mxu1 %v15364_v2 }
 0x162   :  { %9607 = vmatprep.mubr.msk.f32.mxu0 %vm12262_vm0, %v15348_v6  ;;  %11212 = vmatpush3.bf16.msra.mxu0 %v12443_v8 }
 0x163   :  { %9343 = vmatmul.mubr.f32.gmra.mrb[2].mxu1 %v12495_v41  ;;  %11213 = vmatprep.subr.bf16.mxu0 %v15364_v2 }
 0x164   :  { %9345 = vmatprep.mubr.msk.f32.mxu1 %vm12262_vm0, %v15348_v6  ;;  %11113 = vmatpush3.bf16.msra.mxu1 %v12332_v25 }
 0x165   :  { %9608 = vmatmul.mubr.f32.gmra.mrb[20].mxu0 %v12583_v5  ;;  %11114 = vmatprep.subr.bf16.mxu1 %v15364_v2 }
 0x166   :  { %9610 = vmatprep.mubr.msk.f32.mxu0 %vm12262_vm0, %v15348_v6  ;;  %11215 = vmatpush3.bf16.msra.mxu0 %v12449_v9 }
 0x167   :  { %9346 = vmatmul.mubr.f32.gmra.mrb[4].mxu1 %v12524_v60  ;;  %11216 = vmatprep.subr.bf16.mxu0 %v15364_v2 }
 0x168   :  { %9348 = vmatprep.mubr.msk.f32.mxu1 %vm12262_vm0, %v15348_v6  ;;  %11116 = vmatpush3.bf16.msra.mxu1 %v12443_v8 }
 0x169   :  { %9611 = vmatmul.mubr.f32.gmra.mrb[22].mxu0 %v12620_v57  ;;  %11117 = vmatprep.subr.bf16.mxu1 %v15364_v2 }
 0x16a   :  { %9613 = vmatprep.mubr.msk.f32.mxu0 %vm12262_vm0, %v15348_v6 }
 0x16b   :  { %9349 = vmatmul.mubr.f32.gmra.mrb[6].mxu1 %v12560_v42 }
 0x16c   :  { %9351 = vmatprep.mubr.msk.f32.mxu1 %vm12262_vm0, %v15348_v6  ;;  %11119 = vmatpush3.bf16.msra.mxu1 %v12449_v9 }
 0x16d   :  { %9614 = vmatmul.mubr.f32.gmra.mrb[24].mxu0 %v12656_v62  ;;  %11120 = vmatprep.subr.bf16.mxu1 %v15364_v2 }
 0x16e   :  { %9616 = vmatprep.mubr.msk.f32.mxu0 %vm12262_vm0, %v15348_v6 }
 0x16f   :  { %9352 = vmatmul.mubr.f32.gmra.mrb[8].mxu1 %v12597_v36 }
 0x170   :  { %9354 = vmatprep.mubr.msk.f32.mxu1 %vm12262_vm0, %v15348_v6 }
 0x171   :  { %9617 = vmatmul.mubr.f32.gmra.mrb[26].mxu0 %v12688_v12 }
 0x172   :  { %9672 = vmatprep.mubr.msk.f32.mxu0 %vm12262_vm0, %v15348_v6 }
 0x173   :  { %9355 = vmatmul.mubr.f32.gmra.mrb[10].mxu1 %v12634_v54 }
 0x174   :  { %9357 = vmatprep.mubr.msk.f32.mxu1 %vm12262_vm0, %v15348_v6 }
 0x177   :  { %9358 = vmatmul.mubr.f32.gmra.mrb[12].mxu1 %v12669_v43 }
 0x178   :  { %9376 = vmatprep.mubr.msk.f32.mxu1 %vm12262_vm0, %v15348_v6 }
 0x17b   :  { %9377 = vmatmul.mubr.f32.vlgmr.msra.gmra.mrb[0].mxu1 %v12473_v28  ;;  %v1121_v28 = vand.u32 4294901760, %v12615_v38  ;;  %v1895_v38 = vld [vmem:[%s15302_s1 + $0x68] sm:$0xff] }
 0x17c   :  { %9379 = vmatprep.mubr.msk.f32.mxu1 %vm12262_vm0, %v15348_v6  ;;  %11122 = vmatpush3.bf16.msra.mxu1 %v12313_v16 }
 0x17d   :  { %11123 = vmatprep.subr.bf16.mxu1 %v15364_v2 }
 0x17f   :  { %9380 = vmatmul.mubr.f32.gmra.mrb[2].mxu1 %v12495_v41  ;;  %v1141_v41 = vand.u32 4294901760, %v12683_v7  ;;  %v1890_v7 = vld [vmem:[%s15302_s1 + $0x40] sm:$0xff] }
 0x180   :  { %9382 = vmatprep.mubr.msk.f32.mxu1 %vm12262_vm0, %v15348_v6  ;;  %11125 = vmatpush3.bf16.msra.mxu1 %v12332_v25  ;;  %v11193_v29 = vpack.c.bf16 %v1891_v20, %v1890_v7 }
 0x181   :  { %11126 = vmatprep.subr.bf16.mxu1 %v15364_v2 }
 0x183   :  { %9383 = vmatmul.mubr.f32.gmra.mrb[4].mxu1 %v12524_v60  ;;  %v1161_v60 = vand.u32 4294901760, %v12718_v3 }
 0x184   :  { %9385 = vmatprep.mubr.msk.f32.mxu1 %vm12262_vm0, %v15348_v6  ;;  %11128 = vmatpush3.bf16.msra.mxu1 %v12443_v8 }
 0x185   :  { %11129 = vmatprep.subr.bf16.mxu1 %v15364_v2 }
 0x187   :  { %9386 = vmatmul.mubr.f32.gmra.mrb[6].mxu1 %v12560_v42  ;;  %v1892_v42 = vld [vmem:[%s15302_s1 + $0x50] sm:$0xff] }
 0x188   :  { %9388 = vmatprep.mubr.msk.f32.mxu1 %vm12262_vm0, %v15348_v6  ;;  %11131 = vmatpush3.bf16.msra.mxu1 %v12449_v9  ;;  %v11196_v5 = vpack.c.bf16 %v1893_v15, %v1892_v42 }
 0x189   :  { %11192 = vmatprep.subr.bf16.mxu1 %v15364_v2 }
 0x18b   :  { %9389 = vmatmul.mubr.f32.gmra.mrb[8].mxu1 %v12597_v36  ;;  %v1894_v36 = vld [vmem:[%s15302_s1 + $0x60] sm:$0xff] }
 0x18c   :  { %9391 = vmatprep.mubr.msk.f32.mxu1 %vm12262_vm0, %v15348_v6  ;;  %v11199_v57 = vpack.c.bf16 %v1895_v38, %v1894_v36 }
 0x18f   :  { %9392 = vmatmul.mubr.f32.gmra.mrb[10].mxu1 %v12634_v54  ;;  %v1896_v54 = vld [vmem:[%s15302_s1 + $0x70] sm:$0xff] }
 0x190   :  { %9394 = vmatprep.mubr.msk.f32.mxu1 %vm12262_vm0, %v15348_v6  ;;  %v11202_v62 = vpack.c.bf16 %v1897_v52, %v1896_v54 }
 0x193   :  { %9395 = vmatmul.mubr.f32.gmra.mrb[12].mxu1 %v12669_v43 }
 0x194   :  { %9413 = vmatprep.mubr.msk.f32.mxu1 %vm12262_vm0, %v15348_v6 }
 0x197   :  { %9414 = vmatmul.mubr.f32.vlgmr.msra.gmra.mrb[14].mxu1 %v1101_v27 }
 0x198   :  { %9416 = vmatprep.mubr.msk.f32.mxu1 %vm12262_vm0, %v15348_v6  ;;  %11194 = vmatpush3.bf16.msra.mxu1 %v11193_v29 }
 0x199   :  { %11195 = vmatprep.subr.bf16.mxu1 %v15364_v2 }
 0x19b   :  { %9417 = vmatmul.mubr.f32.gmra.mrb[16].mxu1 %v1111_v37 }
 0x19c   :  { %9419 = vmatprep.mubr.msk.f32.mxu1 %vm12262_vm0, %v15348_v6  ;;  %11197 = vmatpush3.bf16.msra.mxu1 %v11196_v5 }
 0x19d   :  { %11198 = vmatprep.subr.bf16.mxu1 %v15364_v2 }
 0x19f   :  { %9420 = vmatmul.mubr.f32.gmra.mrb[18].mxu1 %v1121_v28 }
 0x1a0   :  { %9422 = vmatprep.mubr.msk.f32.mxu1 %vm12262_vm0, %v15348_v6  ;;  %11200 = vmatpush3.bf16.msra.mxu1 %v11199_v57 }
 0x1a1   :  { %11201 = vmatprep.subr.bf16.mxu1 %v15364_v2 }
 0x1a3   :  { %9423 = vmatmul.mubr.f32.gmra.mrb[20].mxu1 %v1131_v35 }
 0x1a4   :  { %9425 = vmatprep.mubr.msk.f32.mxu1 %vm12262_vm0, %v15348_v6  ;;  %11203 = vmatpush3.bf16.msra.mxu1 %v11202_v62 }
 0x1a5   :  { %11276 = vmatprep.subr.bf16.mxu1 %v15364_v2 }
 0x1a7   :  { %9426 = vmatmul.mubr.f32.gmra.mrb[22].mxu1 %v1141_v41 }
 0x1a8   :  { %9428 = vmatprep.mubr.msk.f32.mxu1 %vm12262_vm0, %v15348_v6 }
 0x1ab   :  { %9429 = vmatmul.mubr.f32.gmra.mrb[24].mxu1 %v1151_v51 }
 0x1ac   :  { %9431 = vmatprep.mubr.msk.f32.mxu1 %vm12262_vm0, %v15348_v6 }
 0x1af   :  { %9432 = vmatmul.mubr.f32.gmra.mrb[26].mxu1 %v1161_v60 }
 0x1b0   :  { %9635 = vmatprep.mubr.msk.f32.mxu1 %vm12262_vm0, %v15348_v6 }
 0x22c   :  { %v1779_v43 = vpop.f32.mrb[14].mxu0 }
 0x22d   :  { %v9600_v12 = vpop.f32.mrb[15].mxu0 }
 0x230   :  { %v1785_v3 = vpop.f32.mrb[16].mxu0 }
 0x231   :  { %v9603_v1 = vpop.f32.mrb[17].mxu0 }
 0x234   :  { %v1791_v46 = vpop.f32.mrb[18].mxu0 }
 0x235   :  { %v9606_v24 = vpop.f32.mrb[19].mxu0 }
 0x238   :  { %v1797_v44 = vpop.f32.mrb[20].mxu0 }
 0x239   :  { %v9609_v17 = vpop.f32.mrb[21].mxu0 }
 0x23c   :  { %v1803_v40 = vpop.f32.mrb[22].mxu0 }
 0x23d   :  { %v9612_v19 = vpop.f32.mrb[23].mxu0 }
 0x240   :  { %v1809_v21 = vpop.f32.mrb[24].mxu0 }
 0x241   :  { %v9615_v4 = vpop.f32.mrb[25].mxu0 }
 0x244   :  { %v13069_v48 = vpop.f32.mrb[26].mxu0 }
 0x245   :  { %v9618_v49 = vpop.f32.mrb[27].mxu0 }
 0x24e   :  { %v956_v56 = vpop.f32.mrb[0].mxu1 }
 0x24f   :  { %v9378_v58 = vpop.f32.mrb[1].mxu1  ;;  %v1819_v41 = vmul.f32 %v956_v56, %v956_v56  ;;  %v1833_v4 = vsub.f32 %v12467_v14, %v956_v56  ;;  %v13096_v14 = vld [vmem:[%s15302_s1 + $0x38] ss:$0 sm:$0xff] }
 0x252   :  { %v962_v59 = vpop.f32.mrb[2].mxu1 }
 0x253   :  { %v9381_v26 = vpop.f32.mrb[3].mxu1  ;;  %v1820_v29 = vmul.f32 %v962_v59, %v962_v59  ;;  %v1834_v56 = vsub.f32 %v12477_v31, %v962_v59 }
 0x256   :  { %v13071_v63 = vpop.f32.mrb[4].mxu1 }
 0x257   :  { %v9384_v23 = vpop.f32.mrb[5].mxu1  ;;  %v1821_v57 = vmul.f32 %v13071_v63, %v13071_v63 }
 0x25a   :  { %v13073_v34 = vpop.f32.mrb[6].mxu1 }
 0x25b   :  { %v9387_v50 = vpop.f32.mrb[7].mxu1 }
 0x25e   :  { %v13075_v22 = vpop.f32.mrb[8].mxu1 }
 0x25f   :  { %v9390_v30 = vpop.f32.mrb[9].mxu1  ;;  %v1823_v26 = vmul.f32 %v13075_v22, %v13075_v22 }
 0x262   :  { %v13077_v32 = vpop.f32.mrb[10].mxu1 }
 0x263   :  { %v9393_v27 = vpop.f32.mrb[11].mxu1 }
 0x266   :  { %v13079_v37 = vpop.f32.mrb[12].mxu1 }
 0x267   :  { %v9396_v28 = vpop.f32.mrb[13].mxu1 }
 0x26a   :  { %v1103_v35 = vpop.f32.mrb[14].mxu1 }
 0x26b   :  { %v11618_v51 = vadd.f32 %v1779_v43, %v1103_v35  ;;  %v9415_v60 = vpop.f32.mrb[15].mxu1  ;;  %v1822_v43 = vmul.f32 %v13073_v34, %v13073_v34 }
 0x26d   :  { %v1826_v7 = vsub.f32 %v11618_v51, %v1819_v41  ;;  %v1824_v51 = vmul.f32 %v13077_v32, %v13077_v32 }
 0x26e   :  { %v1113_v20 = vpop.f32.mrb[16].mxu1 }
 0x26f   :  { %v1840_v42 = vadd.f32 1e-05, %v1826_v7  ;;  %v11619_v15 = vadd.f32 %v1785_v3, %v1113_v20  ;;  %v9418_v5 = vpop.f32.mrb[17].mxu1 }
 0x271   :  { %12132 = vrsqrt.f32 %v1840_v42  ;;  %v1827_v36 = vsub.f32 %v11619_v15, %v1820_v29  ;;  %v1835_v15 = vsub.f32 %v12501_v45, %v13071_v63  ;;  %v1836_v45 = vsub.f32 %v12533_v13, %v13073_v34 }
 0x272   :  { %v1123_v38 = vpop.f32.mrb[18].mxu1  ;;  %v1837_v13 = vsub.f32 %v12570_v61, %v13075_v22 }
 0x273   :  { %v1841_v54 = vadd.f32 1e-05, %v1827_v36  ;;  %v11620_v52 = vadd.f32 %v1791_v46, %v1123_v38  ;;  %v9421_v62 = vpop.f32.mrb[19].mxu1  ;;  %v13091_v46 = vld [vmem:[%s15302_s1 + $0x30] ss:$0 sm:$0xff]  ;;  %v1825_v38 = vmul.f32 %v13079_v37, %v13079_v37 }
 0x275   :  { %12134 = vrsqrt.f32 %v1841_v54  ;;  %v1828_v12 = vsub.f32 %v11620_v52, %v1821_v57 }
 0x276   :  { %v1133_v1 = vpop.f32.mrb[20].mxu1 }
 0x277   :  { %v1842_v24 = vadd.f32 1e-05, %v1828_v12  ;;  %v11621_v17 = vadd.f32 %v1797_v44, %v1133_v1  ;;  %v9424_v19 = vpop.f32.mrb[21].mxu1 }
 0x279   :  { %12136 = vrsqrt.f32 %v1842_v24  ;;  %v1829_v3 = vsub.f32 %v11621_v17, %v1822_v43 }
 0x27a   :  { %v1143_v49 = vpop.f32.mrb[22].mxu1 }
 0x27b   :  { %v12133_v58 = vpop.eup %12132  ;;  %v1843_v23 = vadd.f32 1e-05, %v1829_v3  ;;  %v11622_v50 = vadd.f32 %v1803_v40, %v1143_v49  ;;  %v9427_v30 = vpop.f32.mrb[23].mxu1 }
 0x27c   :  { %v1854_v27 = vmul.f32 %v12133_v58, %v1833_v4  ;;  %v1838_v58 = vsub.f32 %v12607_v53, %v13077_v32  ;;  %v15388_v30 = vld [vmem:[#allocation9_spill] sm:$0xff] }
 0x27d   :  { %12138 = vrsqrt.f32 %v1843_v23  ;;  %v1830_v44 = vsub.f32 %v11622_v50, %v1823_v26 }
 0x27e   :  { %v1865_v28 = vmul.f32 %v13091_v46, %v1854_v27  ;;  %v1153_v35 = vpop.f32.mrb[24].mxu1  ;;  %v1839_v27 = vsub.f32 %v15388_v30, %v13079_v37 }
 0x27f   :  { %v12135_v41 = vpop.eup %12134  ;;  %v1844_v60 = vadd.f32 1e-05, %v1830_v44  ;;  %v11623_v40 = vadd.f32 %v1809_v21, %v1153_v35  ;;  %v9430_v7 = vpop.f32.mrb[25].mxu1 }
 0x280   :  { %v1876_v20 = vadd.f32 %v13096_v14, %v1865_v28  ;;  %v1855_v29 = vmul.f32 %v12135_v41, %v1834_v56 }
 0x281   :  { %12140 = vrsqrt.f32 %v1844_v60  ;;  %v1831_v42 = vsub.f32 %v11623_v40, %v1824_v51  ;;  %v13160_v60 = vld [vmem:[%s15302_s1 + $0x80] ss:$0 sm:$0xff] }
 0x282   :  { %v1163_v5 = vpop.f32.mrb[26].mxu1  ;;  %v1883_v31 = vmax.f32 %v1876_v20, 0.0  ;;  %v1866_v59 = vmul.f32 %v13091_v46, %v1855_v29 }
 0x283   :  { %v12137_v36 = vpop.eup %12136  ;;  %v1845_v57 = vadd.f32 1e-05, %v1831_v42  ;;  %v11624_v21 = vadd.f32 %v13069_v48, %v1163_v5  ;;  %v9433_v54 = vpop.f32.mrb[27].mxu1 }
 0x284   :  { %9636 = vmatmul.mubr.msk.f32.vlgmr.msra.gmra.mrb[28].mxu1 %vm179_vm3, %v1883_v31  ;;  %v1877_v52 = vadd.f32 %v13096_v14, %v1866_v59  ;;  %v1856_v62 = vmul.f32 %v12137_v36, %v1835_v15 }
 0x285   :  { %12142 = vrsqrt.f32 %v1845_v57  ;;  %v1832_v12 = vsub.f32 %v11624_v21, %v1825_v38  ;;  %9638 = vmatprep.mubr.msk.f32.mxu1 %vm12262_vm0, %v15348_v6  ;;  %11278 = vmatpush3.bf16.msra.mxu1 %v12313_v16 }
 0x286   :  { %v1884_v63 = vmax.f32 %v1877_v52, 0.0  ;;  %v1867_v1 = vmul.f32 %v13091_v46, %v1856_v62  ;;  %11279 = vmatprep.subr.bf16.mxu1 %v15364_v2 }
 0x287   :  { %v12139_v48 = vpop.eup %12138  ;;  %v1846_v43 = vadd.f32 1e-05, %v1832_v12 }
 0x288   :  { %9639 = vmatmul.mubr.msk.f32.gmra.mrb[30].mxu1 %vm179_vm3, %v1884_v63  ;;  %v1878_v24 = vadd.f32 %v13096_v14, %v1867_v1  ;;  %v1857_v17 = vmul.f32 %v12139_v48, %v1836_v45 }
 0x289   :  { %12144 = vrsqrt.f32 %v1846_v43  ;;  %9641 = vmatprep.mubr.msk.f32.mxu1 %vm12262_vm0, %v15348_v6  ;;  %11281 = vmatpush3.bf16.msra.mxu1 %v12332_v25 }
 0x28a   :  { %v1885_v34 = vmax.f32 %v1878_v24, 0.0  ;;  %v1868_v19 = vmul.f32 %v13091_v46, %v1857_v17  ;;  %11282 = vmatprep.subr.bf16.mxu1 %v15364_v2 }
 0x28b   :  { %v12141_v3 = vpop.eup %12140 }
 0x28c   :  { %9642 = vmatmul.mubr.msk.f32.gmra.mrb[32].mxu1 %vm179_vm3, %v1885_v34  ;;  %v1879_v4 = vadd.f32 %v13096_v14, %v1868_v19  ;;  %v1858_v49 = vmul.f32 %v12141_v3, %v1837_v13 }
 0x28d   :  { %9644 = vmatprep.mubr.msk.f32.mxu1 %vm12262_vm0, %v15348_v6  ;;  %11284 = vmatpush3.bf16.msra.mxu1 %v12443_v8 }
 0x28e   :  { %v1886_v61 = vmax.f32 %v1879_v4, 0.0  ;;  %v1869_v22 = vmul.f32 %v13091_v46, %v1858_v49  ;;  %11285 = vmatprep.subr.bf16.mxu1 %v15364_v2 }
 0x28f   :  { %v12143_v26 = vpop.eup %12142 }
 0x290   :  { %9645 = vmatmul.mubr.msk.f32.gmra.mrb[34].mxu1 %vm179_vm3, %v1886_v61  ;;  %v1880_v23 = vadd.f32 %v13096_v14, %v1869_v22  ;;  %v1859_v50 = vmul.f32 %v12143_v26, %v1838_v58 }
 0x291   :  { %9647 = vmatprep.mubr.msk.f32.mxu1 %vm12262_vm0, %v15348_v6  ;;  %11287 = vmatpush3.bf16.msra.mxu1 %v12449_v9 }
 0x292   :  { %v1887_v53 = vmax.f32 %v1880_v23, 0.0  ;;  %v1870_v32 = vmul.f32 %v13091_v46, %v1859_v50  ;;  %11288 = vmatprep.subr.bf16.mxu1 %v15364_v2 }
 0x293   :  { %v12145_v44 = vpop.eup %12144 }
 0x294   :  { %9648 = vmatmul.mubr.msk.f32.gmra.mrb[36].mxu1 %vm179_vm3, %v1887_v53  ;;  %v1881_v56 = vadd.f32 %v13096_v14, %v1870_v32  ;;  %v1860_v28 = vmul.f32 %v12145_v44, %v1839_v27 }
 0x295   :  { %9650 = vmatprep.mubr.msk.f32.mxu1 %vm12262_vm0, %v15348_v6 }
 0x296   :  { %v1888_v35 = vmax.f32 %v1881_v56, 0.0  ;;  %v1871_v41 = vmul.f32 %v13091_v46, %v1860_v28  ;;  %v15389_v56 = vld [vmem:[#allocation5_spill] sm:$0xff] }
 0x298   :  { %9651 = vmatmul.mubr.msk.f32.gmra.mrb[38].mxu1 %vm179_vm3, %v1888_v35  ;;  %v1882_v37 = vadd.f32 %v13096_v14, %v1871_v41 }
 0x299   :  { %9653 = vmatprep.mubr.msk.f32.mxu1 %vm12262_vm0, %v15348_v6 }
 0x29a   :  { %v1889_v51 = vmax.f32 %v1882_v37, 0.0 }
 0x29c   :  { %9654 = vmatmul.mubr.msk.f32.gmra.mrb[40].mxu1 %vm179_vm3, %v1889_v51 }
 0x29d   :  { %9894 = vmatprep.mubr.msk.f32.mxu1 %vm12262_vm0, %v15348_v6 }
 0x357   :  { %v1990_v40 = vpop.f32.mrb[28].mxu1 }
 0x358   :  { %v13163_v46 = vadd.f32 %v13160_v60, %v1990_v40  ;;  %v9637_v7 = vpop.f32.mrb[29].mxu1 }
 0x35a   :  { %v2027_v14 = vsel %vm179_vm3, %v13163_v46, 0  ;;  %v2842_v20 = vmul.f32 %v13163_v46, %v13163_v46 }
 0x35b   :  { %v13169_v29 = vand.u32 4294901760, %v2027_v14  ;;  %v1995_v42 = vpop.f32.mrb[30].mxu1 }
 0x35c   :  { %v2850_v15 = vsel %vm179_vm3, %v2842_v20, 0  ;;  %v13173_v5 = vadd.f32 %v13160_v60, %v1995_v42  ;;  %v9640_v31 = vpop.f32.mrb[31].mxu1 }
 0x35d   :  { %v13176_v59 = vsub.f32 %v2027_v14, %v13169_v29  ;;  %v13178_v36 = vand.u32 4294901760, %v2850_v15 }
 0x35e   :  { %v2030_v38 = vsel %vm179_vm3, %v13173_v5, 0  ;;  %v2843_v57 = vmul.f32 %v13173_v5, %v13173_v5 }
 0x35f   :  { %v2122_v21 = vand.u32 4294901760, %v13176_v59  ;;  %v13186_v54 = vsub.f32 %v2850_v15, %v13178_v36  ;;  %v13188_v52 = vand.u32 4294901760, %v2030_v38  ;;  %v2000_v62 = vpop.f32.mrb[32].mxu1 }
 0x360   :  { %v2853_v12 = vsel %vm179_vm3, %v2843_v57, 0  ;;  %v13192_v45 = vadd.f32 %v13160_v60, %v2000_v62  ;;  %v9643_v63 = vpop.f32.mrb[33].mxu1 }
 0x361   :  { %v2123_v1 = vsub.f32 %v13176_v59, %v2122_v21  ;;  %v2945_v48 = vand.u32 4294901760, %v13186_v54  ;;  %v13199_v43 = vsub.f32 %v2030_v38, %v13188_v52  ;;  %v13201_v24 = vand.u32 4294901760, %v2853_v12 }
 0x362   :  { %v2033_v17 = vsel %vm179_vm3, %v13192_v45, 0  ;;  %v2844_v13 = vmul.f32 %v13192_v45, %v13192_v45 }
 0x363   :  { %v2124_v34 = vand.u32 4294901760, %v2123_v1  ;;  %v13208_v19 = vsub.f32 %v2853_v12, %v13201_v24  ;;  %v13210_v3 = vand.u32 4294901760, %v2033_v17  ;;  %v2005_v4 = vpop.f32.mrb[34].mxu1  ;;  %v2946_v49 = vsub.f32 %v13186_v54, %v2945_v48 }
 0x364   :  { %v2856_v58 = vsel %vm179_vm3, %v2844_v13, 0  ;;  %v13217_v61 = vadd.f32 %v13160_v60, %v2005_v4  ;;  %v9646_v22 = vpop.f32.mrb[35].mxu1  ;;  %v2132_v26 = vand.u32 4294901760, %v13199_v43 }
 0x365   :  { %v13221_v23 = vsub.f32 %v2033_v17, %v13210_v3  ;;  %v13223_v50 = vand.u32 4294901760, %v2856_v58  ;;  %9673 = vmatmul.mubr.f32.vlgmr.msra.gmra.mrb[28].mxu0 %v2124_v34  ;;  %v2947_v30 = vand.u32 4294901760, %v2946_v49  ;;  %v2955_v27 = vand.u32 4294901760, %v13208_v19 }
 0x366   :  { %v2036_v53 = vsel %vm179_vm3, %v13217_v61, 0  ;;  %v2845_v32 = vmul.f32 %v13217_v61, %v13217_v61  ;;  %9675 = vmatprep.mubr.msk.f32.mxu0 %vm12262_vm0, %v15348_v6  ;;  %v2133_v44 = vsub.f32 %v13199_v43, %v2132_v26  ;;  %11218 = vmatpush3.bf16.msra.mxu0 %v15389_v56 }
 0x367   :  { %v13237_v28 = vsub.f32 %v2856_v58, %v13223_v50  ;;  %v13239_v35 = vand.u32 4294901760, %v2036_v53  ;;  %v2010_v41 = vpop.f32.mrb[36].mxu1  ;;  %9895 = vmatmul.mubr.f32.vlgmr.msra.gmra.mrb[42].mxu1 %v2947_v30  ;;  %v2956_v37 = vsub.f32 %v13208_v19, %v2955_v27  ;;  %v2142_v51 = vand.u32 4294901760, %v13221_v23  ;;  %11219 = vmatprep.subr.bf16.mxu0 %v15364_v2  ;;  %v15390_v30 = vld [vmem:[#allocation6_spill] sm:$0xff] }
 0x368   :  { %v2859_v40 = vsel %vm179_vm3, %v2845_v32, 0  ;;  %v13248_v7 = vadd.f32 %v13160_v60, %v2010_v41  ;;  %v9649_v14 = vpop.f32.mrb[37].mxu1  ;;  %v2134_v20 = vand.u32 4294901760, %v2133_v44  ;;  %9897 = vmatprep.mubr.msk.f32.mxu1 %vm12262_vm0, %v15348_v6  ;;  %11290 = vmatpush3.bf16.msra.mxu1 %v15389_v56 }
 0x369   :  { %v13254_v42 = vsub.f32 %v2036_v53, %v13239_v35  ;;  %v13256_v15 = vand.u32 4294901760, %v2859_v40  ;;  %v2957_v31 = vand.u32 4294901760, %v2956_v37  ;;  %v2143_v38 = vsub.f32 %v13221_v23, %v2142_v51  ;;  %11291 = vmatprep.subr.bf16.mxu1 %v15364_v2 }
 0x36a   :  { %v2039_v57 = vsel %vm179_vm3, %v13248_v7, 0  ;;  %v2846_v62 = vmul.f32 %v13248_v7, %v13248_v7  ;;  %9676 = vmatmul.mubr.f32.gmra.mrb[30].mxu0 %v2134_v20  ;;  %v15338_v12 = vand.u32 4294901760, %v13237_v28 }
 0x36b   :  { %v13268_v63 = vsub.f32 %v2859_v40, %v13256_v15  ;;  %v13270_v1 = vand.u32 4294901760, %v2039_v57  ;;  %v2015_v17 = vpop.f32.mrb[38].mxu1  ;;  %9898 = vmatmul.mubr.f32.gmra.mrb[44].mxu1 %v2957_v31  ;;  %9678 = vmatprep.mubr.msk.f32.mxu0 %vm12262_vm0, %v15348_v6  ;;  %v2144_v13 = vand.u32 4294901760, %v2143_v38  ;;  %v15337_v34 = vand.u32 4294901760, %v13254_v42 }
 0x36c   :  { %v2862_v4 = vsel %vm179_vm3, %v2846_v62, 0  ;;  %v13277_v49 = vadd.f32 %v13160_v60, %v2015_v17  ;;  %v9652_v58 = vpop.f32.mrb[39].mxu1  ;;  %9900 = vmatprep.mubr.msk.f32.mxu1 %vm12262_vm0, %v15348_v6  ;;  %v2966_v22 = vsub.f32 %v13237_v28, %v15338_v12  ;;  %11221 = vmatpush3.bf16.msra.mxu0 %v15390_v30 }
 0x36d   :  { %v13286_v53 = vsub.f32 %v2039_v57, %v13270_v1  ;;  %v13288_v32 = vand.u32 4294901760, %v2862_v4  ;;  %v2153_v44 = vsub.f32 %v13254_v42, %v15337_v34  ;;  %v15336_v56 = vand.u32 4294901760, %v13268_v63  ;;  %11293 = vmatpush3.bf16.msra.mxu1 %v15390_v30  ;;  %11222 = vmatprep.subr.bf16.mxu0 %v15364_v2  ;;  %v15391_v58 = vld [vmem:[#allocation7_spill] sm:$0xff] }
 0x36e   :  { %v2042_v41 = vsel %vm179_vm3, %v13277_v49, 0  ;;  %v2847_v37 = vmul.f32 %v13277_v49, %v13277_v49  ;;  %9679 = vmatmul.mubr.f32.gmra.mrb[32].mxu0 %v2144_v13  ;;  %v2967_v40 = vand.u32 4294901760, %v2966_v22  ;;  %11294 = vmatprep.subr.bf16.mxu1 %v15364_v2 }
 0x36f   :  { %v13302_v14 = vsub.f32 %v2862_v4, %v13288_v32  ;;  %v13304_v20 = vand.u32 4294901760, %v2042_v41  ;;  %v2020_v31 = vpop.f32.mrb[40].mxu1  ;;  %9681 = vmatprep.mubr.msk.f32.mxu0 %vm12262_vm0, %v15348_v6  ;;  %v2154_v38 = vand.u32 4294901760, %v2153_v44  ;;  %v2976_v57 = vsub.f32 %v13268_v63, %v15336_v56  ;;  %v15392_v56 = vld [vmem:[#allocation8_spill] sm:$0xff] }
 0x370   :  { %v2865_v62 = vsel %vm179_vm3, %v2847_v37, 0  ;;  %v13313_v17 = vadd.f32 %v13160_v60, %v2020_v31  ;;  %9901 = vmatmul.mubr.f32.gmra.mrb[46].mxu1 %v2967_v40  ;;  %v9655_v13 = vpop.f32.mrb[41].mxu1  ;;  %v15335_v4 = vand.u32 4294901760, %v13286_v53  ;;  %11224 = vmatpush3.bf16.msra.mxu0 %v15391_v58 }
 0x371   :  { %v13318_v22 = vsub.f32 %v2042_v41, %v13304_v20  ;;  %v13320_v30 = vand.u32 4294901760, %v2865_v62  ;;  %9903 = vmatprep.mubr.msk.f32.mxu1 %vm12262_vm0, %v15348_v6  ;;  %v2977_v44 = vand.u32 4294901760, %v2976_v57  ;;  %v15339_v37 = vand.u32 4294901760, %v13302_v14  ;;  %11296 = vmatpush3.bf16.msra.mxu1 %v15391_v58 }
 0x372   :  { %v2045_v60 = vsel %vm179_vm3, %v13313_v17, 0  ;;  %v2848_v40 = vmul.f32 %v13313_v17, %v13313_v17  ;;  %9682 = vmatmul.mubr.f32.gmra.mrb[34].mxu0 %v2154_v38  ;;  %v2163_v41 = vsub.f32 %v13286_v53, %v15335_v4  ;;  %11225 = vmatprep.subr.bf16.mxu0 %v15364_v2 }
 0x373   :  { %v13335_v31 = vsub.f32 %v2865_v62, %v13320_v30  ;;  %v13337_v57 = vand.u32 4294901760, %v2045_v60  ;;  %9684 = vmatprep.mubr.msk.f32.mxu0 %vm12262_vm0, %v15348_v6  ;;  %v2986_v13 = vsub.f32 %v13302_v14, %v15339_v37  ;;  %v2172_v38 = vand.u32 4294901760, %v13318_v22  ;;  %11297 = vmatprep.subr.bf16.mxu1 %v15364_v2 }
 0x374   :  { %v2868_v58 = vsel %vm179_vm3, %v2848_v40, 0  ;;  %9904 = vmatmul.mubr.f32.gmra.mrb[48].mxu1 %v2977_v44  ;;  %v2164_v4 = vand.u32 4294901760, %v2163_v41  ;;  %11227 = vmatpush3.bf16.msra.mxu0 %v15392_v56 }
 0x375   :  { %v13349_v62 = vsub.f32 %v2045_v60, %v13337_v57  ;;  %v13351_v34 = vand.u32 4294901760, %v2868_v58  ;;  %9906 = vmatprep.mubr.msk.f32.mxu1 %vm12262_vm0, %v15348_v6  ;;  %v2987_v12 = vand.u32 4294901760, %v2986_v13  ;;  %v2173_v37 = vsub.f32 %v13318_v22, %v2172_v38  ;;  %11299 = vmatpush3.bf16.msra.mxu1 %v15392_v56 }
 0x376   :  { %9685 = vmatmul.mubr.f32.gmra.mrb[36].mxu0 %v2164_v4  ;;  %v15340_v44 = vand.u32 4294901760, %v13335_v31  ;;  %11228 = vmatprep.subr.bf16.mxu0 %v15364_v2 }
 0x377   :  { %v13362_v60 = vsub.f32 %v2868_v58, %v13351_v34  ;;  %9687 = vmatprep.mubr.msk.f32.mxu0 %vm12262_vm0, %v15348_v6  ;;  %v2174_v40 = vand.u32 4294901760, %v2173_v37  ;;  %v2182_v41 = vand.u32 4294901760, %v13349_v62  ;;  %11300 = vmatprep.subr.bf16.mxu1 %v15364_v2 }
 0x378   :  { %9907 = vmatmul.mubr.f32.gmra.mrb[50].mxu1 %v2987_v12  ;;  %v2996_v56 = vsub.f32 %v13335_v31, %v15340_v44 }
 0x379   :  { %9909 = vmatprep.mubr.msk.f32.mxu1 %vm12262_vm0, %v15348_v6  ;;  %v2183_v4 = vsub.f32 %v13349_v62, %v2182_v41  ;;  %v3005_v13 = vand.u32 4294901760, %v13362_v60 }
 0x37a   :  { %9688 = vmatmul.mubr.f32.gmra.mrb[38].mxu0 %v2174_v40  ;;  %v2997_v37 = vand.u32 4294901760, %v2996_v56 }
 0x37b   :  { %9690 = vmatprep.mubr.msk.f32.mxu0 %vm12262_vm0, %v15348_v6  ;;  %v2184_v58 = vand.u32 4294901760, %v2183_v4  ;;  %v3006_v12 = vsub.f32 %v13362_v60, %v3005_v13 }
 0x37c   :  { %9910 = vmatmul.mubr.f32.gmra.mrb[52].mxu1 %v2997_v37 }
 0x37d   :  { %9912 = vmatprep.mubr.msk.f32.mxu1 %vm12262_vm0, %v15348_v6  ;;  %v3007_v44 = vand.u32 4294901760, %v3006_v12 }
 0x37e   :  { %9691 = vmatmul.mubr.f32.gmra.mrb[40].mxu0 %v2184_v58 }
 0x37f   :  { %9709 = vmatprep.mubr.msk.f32.mxu0 %vm12262_vm0, %v15348_v6 }
 0x380   :  { %9913 = vmatmul.mubr.f32.gmra.mrb[54].mxu1 %v3007_v44 }
 0x381   :  { %9931 = vmatprep.mubr.msk.f32.mxu1 %vm12262_vm0, %v15348_v6 }
 0x382   :  { %9710 = vmatmul.mubr.f32.vlgmr.msra.gmra.mrb[28].mxu0 %v13169_v29 }
 0x383   :  { %9712 = vmatprep.mubr.msk.f32.mxu0 %vm12262_vm0, %v15348_v6  ;;  %11230 = vmatpush3.bf16.msra.mxu0 %v12481_v33 }
 0x384   :  { %9932 = vmatmul.mubr.f32.vlgmr.msra.gmra.mrb[42].mxu1 %v13178_v36  ;;  %11231 = vmatprep.subr.bf16.mxu0 %v15364_v2 }
 0x385   :  { %9934 = vmatprep.mubr.msk.f32.mxu1 %vm12262_vm0, %v15348_v6  ;;  %11302 = vmatpush3.bf16.msra.mxu1 %v12481_v33  ;;  %v15395_v33 = vand.u32 4294901760, %v13268_v63 }
 0x386   :  { %9713 = vmatmul.mubr.f32.gmra.mrb[30].mxu0 %v13188_v52  ;;  %11303 = vmatprep.subr.bf16.mxu1 %v15364_v2 }
 0x387   :  { %9715 = vmatprep.mubr.msk.f32.mxu0 %vm12262_vm0, %v15348_v6  ;;  %11233 = vmatpush3.bf16.msra.mxu0 %v12508_v47 }
 0x388   :  { %9935 = vmatmul.mubr.f32.gmra.mrb[44].mxu1 %v13201_v24  ;;  %11234 = vmatprep.subr.bf16.mxu0 %v15364_v2 }
 0x389   :  { %9937 = vmatprep.mubr.msk.f32.mxu1 %vm12262_vm0, %v15348_v6  ;;  %11305 = vmatpush3.bf16.msra.mxu1 %v12508_v47  ;;  %v15396_v47 = vand.u32 4294901760, %v13286_v53 }
 0x38a   :  { %9716 = vmatmul.mubr.f32.gmra.mrb[32].mxu0 %v13210_v3  ;;  %11306 = vmatprep.subr.bf16.mxu1 %v15364_v2 }
 0x38b   :  { %9718 = vmatprep.mubr.msk.f32.mxu0 %vm12262_vm0, %v15348_v6  ;;  %11236 = vmatpush3.bf16.msra.mxu0 %v12455_v10 }
 0x38c   :  { %9938 = vmatmul.mubr.f32.gmra.mrb[46].mxu1 %v13223_v50  ;;  %11237 = vmatprep.subr.bf16.mxu0 %v15364_v2 }
 0x38d   :  { %9940 = vmatprep.mubr.msk.f32.mxu1 %vm12262_vm0, %v15348_v6  ;;  %11308 = vmatpush3.bf16.msra.mxu1 %v12455_v10  ;;  %v15393_v10 = vand.u32 4294901760, %v13237_v28 }
 0x38e   :  { %9719 = vmatmul.mubr.f32.gmra.mrb[34].mxu0 %v13239_v35  ;;  %11309 = vmatprep.subr.bf16.mxu1 %v15364_v2 }
 0x38f   :  { %9721 = vmatprep.mubr.msk.f32.mxu0 %vm12262_vm0, %v15348_v6  ;;  %11239 = vmatpush3.bf16.msra.mxu0 %v12459_v11 }
 0x390   :  { %9941 = vmatmul.mubr.f32.gmra.mrb[48].mxu1 %v13256_v15  ;;  %11240 = vmatprep.subr.bf16.mxu0 %v15364_v2 }
 0x391   :  { %9943 = vmatprep.mubr.msk.f32.mxu1 %vm12262_vm0, %v15348_v6  ;;  %11311 = vmatpush3.bf16.msra.mxu1 %v12459_v11  ;;  %v15394_v11 = vand.u32 4294901760, %v13254_v42 }
 0x392   :  { %9722 = vmatmul.mubr.f32.gmra.mrb[36].mxu0 %v13270_v1  ;;  %11312 = vmatprep.subr.bf16.mxu1 %v15364_v2 }
 0x393   :  { %9724 = vmatprep.mubr.msk.f32.mxu0 %vm12262_vm0, %v15348_v6 }
 0x394   :  { %9944 = vmatmul.mubr.f32.gmra.mrb[50].mxu1 %v13288_v32 }
 0x395   :  { %9946 = vmatprep.mubr.msk.f32.mxu1 %vm12262_vm0, %v15348_v6 }
 0x396   :  { %9725 = vmatmul.mubr.f32.gmra.mrb[38].mxu0 %v13304_v20 }
 0x397   :  { %9727 = vmatprep.mubr.msk.f32.mxu0 %vm12262_vm0, %v15348_v6 }
 0x398   :  { %9947 = vmatmul.mubr.f32.gmra.mrb[52].mxu1 %v13320_v30 }
 0x399   :  { %9949 = vmatprep.mubr.msk.f32.mxu1 %vm12262_vm0, %v15348_v6 }
 0x39a   :  { %9728 = vmatmul.mubr.f32.gmra.mrb[40].mxu0 %v13337_v57 }
 0x39b   :  { %9746 = vmatprep.mubr.msk.f32.mxu0 %vm12262_vm0, %v15348_v6 }
 0x39c   :  { %9950 = vmatmul.mubr.f32.gmra.mrb[54].mxu1 %v13351_v34 }
 0x39d   :  { %9968 = vmatprep.mubr.msk.f32.mxu1 %vm12262_vm0, %v15348_v6 }
 0x39e   :  { %9747 = vmatmul.mubr.f32.vlgmr.msra.gmra.mrb[28].mxu0 %v13176_v59  ;;  %v3741_v59 = vld [vmem:[%s15302_s1 + $0xc0] sm:$0xff] }
 0x39f   :  { %9749 = vmatprep.mubr.msk.f32.mxu0 %vm12262_vm0, %v15348_v6  ;;  %11242 = vmatpush3.bf16.msra.mxu0 %v12313_v16 }
 0x3a0   :  { %9969 = vmatmul.mubr.f32.vlgmr.msra.gmra.mrb[42].mxu1 %v13186_v54  ;;  %11243 = vmatprep.subr.bf16.mxu0 %v15364_v2  ;;  %v3743_v54 = vld [vmem:[%s15302_s1 + $0xd0] sm:$0xff] }
 0x3a1   :  { %9971 = vmatprep.mubr.msk.f32.mxu1 %vm12262_vm0, %v15348_v6  ;;  %11314 = vmatpush3.bf16.msra.mxu1 %v12313_v16 }
 0x3a2   :  { %9750 = vmatmul.mubr.f32.gmra.mrb[30].mxu0 %v13199_v43  ;;  %11315 = vmatprep.subr.bf16.mxu1 %v15364_v2  ;;  %v30_v43 = vld [vmem:[%s15302_s1 + $0x180] sm:$0xff] }
 0x3a3   :  { %9752 = vmatprep.mubr.msk.f32.mxu0 %vm12262_vm0, %v15348_v6  ;;  %11245 = vmatpush3.bf16.msra.mxu0 %v12332_v25  ;;  %vm3874_vm5 = vcmp.gt.f32.partialorder %v30_v43, 0.0 }
 0x3a4   :  { %9972 = vmatmul.mubr.f32.gmra.mrb[44].mxu1 %v13208_v19  ;;  %11246 = vmatprep.subr.bf16.mxu0 %v15364_v2  ;;  %v12264_v19 = vmov 0  }
 0x3a5   :  { %9974 = vmatprep.mubr.msk.f32.mxu1 %vm12262_vm0, %v15348_v6  ;;  %11317 = vmatpush3.bf16.msra.mxu1 %v12332_v25 }
 0x3a6   :  { %9753 = vmatmul.mubr.f32.gmra.mrb[32].mxu0 %v13221_v23  ;;  %11318 = vmatprep.subr.bf16.mxu1 %v15364_v2 }
 0x3a7   :  { %9755 = vmatprep.mubr.msk.f32.mxu0 %vm12262_vm0, %v15348_v6  ;;  %11248 = vmatpush3.bf16.msra.mxu0 %v12443_v8 }
 0x3a8   :  { %9975 = vmatmul.mubr.f32.gmra.mrb[46].mxu1 %v13237_v28  ;;  %11249 = vmatprep.subr.bf16.mxu0 %v15364_v2  ;;  %v3881_v28 = vsel %vm3874_vm5, 1, %v12264_v19 }
 0x3a9   :  { %9977 = vmatprep.mubr.msk.f32.mxu1 %vm12262_vm0, %v15348_v6  ;;  %11320 = vmatpush3.bf16.msra.mxu1 %v12443_v8 }
 0x3aa   :  { %9756 = vmatmul.mubr.f32.gmra.mrb[34].mxu0 %v13254_v42  ;;  %11321 = vmatprep.subr.bf16.mxu1 %v15364_v2 }
 0x3ab   :  { %9758 = vmatprep.mubr.msk.f32.mxu0 %vm12262_vm0, %v15348_v6  ;;  %11251 = vmatpush3.bf16.msra.mxu0 %v12449_v9 }
 0x3ac   :  { %9978 = vmatmul.mubr.f32.gmra.mrb[48].mxu1 %v13268_v63  ;;  %11252 = vmatprep.subr.bf16.mxu0 %v15364_v2  ;;  %v29_v63 = vld [vmem:[%s15302_s1 + $0x178] sm:$0xff] }
 0x3ad   :  { %9980 = vmatprep.mubr.msk.f32.mxu1 %vm12262_vm0, %v15348_v6  ;;  %11323 = vmatpush3.bf16.msra.mxu1 %v12449_v9  ;;  %vm3873_vm10 = vcmp.gt.f32.partialorder %v29_v63, 0.0 }
 0x3ae   :  { %9759 = vmatmul.mubr.f32.gmra.mrb[36].mxu0 %v13286_v53  ;;  %11324 = vmatprep.subr.bf16.mxu1 %v15364_v2 }
 0x3af   :  { %9761 = vmatprep.mubr.msk.f32.mxu0 %vm12262_vm0, %v15348_v6  ;;  %12118 = vset.pattern.permute.xlu1 %v12264_v19 }
 0x3b0   :  { %9981 = vmatmul.mubr.f32.gmra.mrb[50].mxu1 %v13302_v14  ;;  %12117 = vset.pattern.permute.xlu0 %v12264_v19 }
 0x3b1   :  { %9983 = vmatprep.mubr.msk.f32.mxu1 %vm12262_vm0, %v15348_v6 }
 0x3b2   :  { %9762 = vmatmul.mubr.f32.gmra.mrb[38].mxu0 %v13318_v22 }
 0x3b3   :  { %9764 = vmatprep.mubr.msk.f32.mxu0 %vm12262_vm0, %v15348_v6 }
 0x3b4   :  { %9984 = vmatmul.mubr.f32.gmra.mrb[52].mxu1 %v13335_v31 }
 0x3b5   :  { %9986 = vmatprep.mubr.msk.f32.mxu1 %vm12262_vm0, %v15348_v6 }
 0x3b6   :  { %9765 = vmatmul.mubr.f32.gmra.mrb[40].mxu0 %v13349_v62 }
 0x3b7   :  { %9783 = vmatprep.mubr.msk.f32.mxu0 %vm12262_vm0, %v15348_v6 }
 0x3b8   :  { %9987 = vmatmul.mubr.f32.gmra.mrb[54].mxu1 %v13362_v60 }
 0x3b9   :  { %10005 = vmatprep.mubr.msk.f32.mxu1 %vm12262_vm0, %v15348_v6 }
 0x3ba   :  { %9784 = vmatmul.mubr.f32.vlgmr.msra.gmra.mrb[28].mxu0 %v2122_v21  ;;  %v3742_v21 = vld [vmem:[%s15302_s1 + $0xc8] sm:$0xff] }
 0x3bb   :  { %9786 = vmatprep.mubr.msk.f32.mxu0 %vm12262_vm0, %v15348_v6  ;;  %11254 = vmatpush3.bf16.msra.mxu0 %v12777_v0 }
 0x3bc   :  { %10006 = vmatmul.mubr.f32.vlgmr.msra.gmra.mrb[42].mxu1 %v2945_v48  ;;  %11255 = vmatprep.subr.bf16.mxu0 %v15364_v2  ;;  %v28_v48 = vld [vmem:[%s15302_s1 + $0x170] sm:$0xff] }
 0x3bd   :  { %10008 = vmatprep.mubr.msk.f32.mxu1 %vm12262_vm0, %v15348_v6  ;;  %11326 = vmatpush3.bf16.msra.mxu1 %v12777_v0  ;;  %v15397_v0 = vand.u32 4294901760, %v13302_v14  ;;  %vm3872_vm4 = vcmp.gt.f32.partialorder %v28_v48, 0.0 }
 0x3be   :  { %9787 = vmatmul.mubr.f32.gmra.mrb[30].mxu0 %v2132_v26  ;;  %11327 = vmatprep.subr.bf16.mxu1 %v15364_v2  ;;  %v3879_v26 = vsel %vm3872_vm4, 1, %v12264_v19 }
 0x3bf   :  { %9789 = vmatprep.mubr.msk.f32.mxu0 %vm12262_vm0, %v15348_v6  ;;  %11257 = vmatpush3.bf16.msra.mxu0 %v12791_v18 }
 0x3c0   :  { %10009 = vmatmul.mubr.f32.gmra.mrb[44].mxu1 %v2955_v27  ;;  %11258 = vmatprep.subr.bf16.mxu0 %v15364_v2  ;;  %v31_v27 = vld [vmem:[%s15302_s1 + $0x188] sm:$0xff] }
 0x3c1   :  { %10011 = vmatprep.mubr.msk.f32.mxu1 %vm12262_vm0, %v15348_v6  ;;  %11329 = vmatpush3.bf16.msra.mxu1 %v12791_v18  ;;  %v15398_v18 = vand.u32 4294901760, %v13335_v31  ;;  %vm3875_vm9 = vcmp.gt.f32.partialorder %v31_v27, 0.0 }
 0x3c2   :  { %9790 = vmatmul.mubr.f32.gmra.mrb[32].mxu0 %v2142_v51  ;;  %11330 = vmatprep.subr.bf16.mxu1 %v15364_v2  ;;  %v3882_v42 = vsel %vm3875_vm9, 1, %v12264_v19 }
 0x3c3   :  { %9792 = vmatprep.mubr.msk.f32.mxu0 %vm12262_vm0, %v15348_v6  ;;  %11260 = vmatpush3.bf16.msra.mxu0 %v12806_v39 }
 0x3c4   :  { %10012 = vmatmul.mubr.f32.gmra.mrb[46].mxu1 %v15393_v10  ;;  %11261 = vmatprep.subr.bf16.mxu0 %v15364_v2 }
 0x3c5   :  { %10014 = vmatprep.mubr.msk.f32.mxu1 %vm12262_vm0, %v15348_v6  ;;  %11332 = vmatpush3.bf16.msra.mxu1 %v12806_v39  ;;  %v3739_v39 = vld [vmem:[%s15302_s1 + $0xb0] sm:$0xff] }
 0x3c6   :  { %9793 = vmatmul.mubr.f32.gmra.mrb[34].mxu0 %v15394_v11  ;;  %11333 = vmatprep.subr.bf16.mxu1 %v15364_v2 }
 0x3c7   :  { %9795 = vmatprep.mubr.msk.f32.mxu0 %vm12262_vm0, %v15348_v6  ;;  %11263 = vmatpush3.bf16.msra.mxu0 %v12823_v55 }
 0x3c8   :  { %10015 = vmatmul.mubr.f32.gmra.mrb[48].mxu1 %v15395_v33  ;;  %11264 = vmatprep.subr.bf16.mxu0 %v15364_v2 }
 0x3c9   :  { %10017 = vmatprep.mubr.msk.f32.mxu1 %vm12262_vm0, %v15348_v6  ;;  %11335 = vmatpush3.bf16.msra.mxu1 %v12823_v55 }
 0x3ca   :  { %9796 = vmatmul.mubr.f32.gmra.mrb[36].mxu0 %v15396_v47  ;;  %11336 = vmatprep.subr.bf16.mxu1 %v15364_v2 }
 0x3cb   :  { %9798 = vmatprep.mubr.msk.f32.mxu0 %vm12262_vm0, %v15348_v6  ;;  %3891 = vperm.xlu1 %12118, %v3879_v26  }
 0x3cc   :  { %10018 = vmatmul.mubr.f32.gmra.mrb[50].mxu1 %v15397_v0 }
 0x3cd   :  { %10020 = vmatprep.mubr.msk.f32.mxu1 %vm12262_vm0, %v15348_v6 }
 0x3ce   :  { %9799 = vmatmul.mubr.f32.gmra.mrb[38].mxu0 %v2172_v38 }
 0x3cf   :  { %9801 = vmatprep.mubr.msk.f32.mxu0 %vm12262_vm0, %v15348_v6  ;;  %3897 = vperm.xlu1 %12118, %v3881_v28  }
 0x3d0   :  { %10021 = vmatmul.mubr.f32.gmra.mrb[52].mxu1 %v15398_v18 }
 0x3d1   :  { %10023 = vmatprep.mubr.msk.f32.mxu1 %vm12262_vm0, %v15348_v6 }
 0x3d2   :  { %9802 = vmatmul.mubr.f32.gmra.mrb[40].mxu0 %v2182_v41 }
 0x3d3   :  { %9820 = vmatprep.mubr.msk.f32.mxu0 %vm12262_vm0, %v15348_v6 }
 0x3d4   :  { %10024 = vmatmul.mubr.f32.gmra.mrb[54].mxu1 %v3005_v13 }
 0x3d5   :  { %10042 = vmatprep.mubr.msk.f32.mxu1 %vm12262_vm0, %v15348_v6 }
 0x3d6   :  { %9821 = vmatmul.mubr.f32.vlgmr.msra.gmra.mrb[28].mxu0 %v13169_v29 }
 0x3d7   :  { %9823 = vmatprep.mubr.msk.f32.mxu0 %vm12262_vm0, %v15348_v6  ;;  %11266 = vmatpush3.bf16.msra.mxu0 %v12313_v16 }
 0x3d8   :  { %10043 = vmatmul.mubr.f32.vlgmr.msra.gmra.mrb[42].mxu1 %v13178_v36  ;;  %11267 = vmatprep.subr.bf16.mxu0 %v15364_v2 }
 0x3d9   :  { %10045 = vmatprep.mubr.msk.f32.mxu1 %vm12262_vm0, %v15348_v6  ;;  %11338 = vmatpush3.bf16.msra.mxu1 %v12313_v16  ;;  %v3736_v16 = vld [vmem:[%s15302_s1 + $0x98] sm:$0xff] }
 0x3da   :  { %9824 = vmatmul.mubr.f32.gmra.mrb[30].mxu0 %v13188_v52  ;;  %11339 = vmatprep.subr.bf16.mxu1 %v15364_v2 }
 0x3db   :  { %9826 = vmatprep.mubr.msk.f32.mxu0 %vm12262_vm0, %v15348_v6  ;;  %11269 = vmatpush3.bf16.msra.mxu0 %v12332_v25 }
 0x3dc   :  { %10046 = vmatmul.mubr.f32.gmra.mrb[44].mxu1 %v13201_v24  ;;  %11270 = vmatprep.subr.bf16.mxu0 %v15364_v2 }
 0x3dd   :  { %10048 = vmatprep.mubr.msk.f32.mxu1 %vm12262_vm0, %v15348_v6  ;;  %11341 = vmatpush3.bf16.msra.mxu1 %v12332_v25  ;;  %v3737_v25 = vld [vmem:[%s15302_s1 + $0xa0] sm:$0xff] }
 0x3de   :  { %9827 = vmatmul.mubr.f32.gmra.mrb[32].mxu0 %v13210_v3  ;;  %11342 = vmatprep.subr.bf16.mxu1 %v15364_v2 }
 0x3df   :  { %9829 = vmatprep.mubr.msk.f32.mxu0 %vm12262_vm0, %v15348_v6  ;;  %11272 = vmatpush3.bf16.msra.mxu0 %v12443_v8 }
 0x3e0   :  { %10049 = vmatmul.mubr.f32.gmra.mrb[46].mxu1 %v13223_v50  ;;  %11273 = vmatprep.subr.bf16.mxu0 %v15364_v2 }
 0x3e1   :  { %10051 = vmatprep.mubr.msk.f32.mxu1 %vm12262_vm0, %v15348_v6  ;;  %11344 = vmatpush3.bf16.msra.mxu1 %v12443_v8  ;;  %v11349_v8 = vpack.c.bf16 %v3737_v25, %v3736_v16 }
 0x3e2   :  { %9830 = vmatmul.mubr.f32.gmra.mrb[34].mxu0 %v13239_v35  ;;  %11345 = vmatprep.subr.bf16.mxu1 %v15364_v2 }
 0x3e3   :  { %9832 = vmatprep.mubr.msk.f32.mxu0 %vm12262_vm0, %v15348_v6  ;;  %11275 = vmatpush3.bf16.msra.mxu0 %v12449_v9 }
 0x3e4   :  { %10052 = vmatmul.mubr.f32.gmra.mrb[48].mxu1 %v13256_v15  ;;  %11348 = vmatprep.subr.bf16.mxu0 %v15364_v2 }
 0x3e5   :  { %10054 = vmatprep.mubr.msk.f32.mxu1 %vm12262_vm0, %v15348_v6  ;;  %11347 = vmatpush3.bf16.msra.mxu1 %v12449_v9  ;;  %v3738_v9 = vld [vmem:[%s15302_s1 + $0xa8] sm:$0xff] }
 0x3e6   :  { %9833 = vmatmul.mubr.f32.gmra.mrb[36].mxu0 %v13270_v1  ;;  %11360 = vmatprep.subr.bf16.mxu1 %v15364_v2  ;;  %v11352_v55 = vpack.c.bf16 %v3739_v39, %v3738_v9  ;;  %v13748_v9 = vld [vmem:[%s15302_s1 + $0x88] ss:$0 sm:$0xff] }
 0x3e7   :  { %9835 = vmatprep.mubr.msk.f32.mxu0 %vm12262_vm0, %v15348_v6 }
 0x3e8   :  { %10055 = vmatmul.mubr.f32.gmra.mrb[50].mxu1 %v13288_v32 }
 0x3e9   :  { %10057 = vmatprep.mubr.msk.f32.mxu1 %vm12262_vm0, %v15348_v6 }
 0x3ea   :  { %9836 = vmatmul.mubr.f32.gmra.mrb[38].mxu0 %v13304_v20 }
 0x3eb   :  { %9838 = vmatprep.mubr.msk.f32.mxu0 %vm12262_vm0, %v15348_v6 }
 0x3ec   :  { %10058 = vmatmul.mubr.f32.gmra.mrb[52].mxu1 %v13320_v30 }
 0x3ed   :  { %10060 = vmatprep.mubr.msk.f32.mxu1 %vm12262_vm0, %v15348_v6 }
 0x3ee   :  { %9839 = vmatmul.mubr.f32.gmra.mrb[40].mxu0 %v13337_v57 }
 0x3ef   :  { %9857 = vmatprep.mubr.msk.f32.mxu0 %vm12262_vm0, %v15348_v6 }
 0x3f0   :  { %10061 = vmatmul.mubr.f32.gmra.mrb[54].mxu1 %v13351_v34 }
 0x3f1   :  { %10079 = vmatprep.mubr.msk.f32.mxu1 %vm12262_vm0, %v15348_v6 }
 0x3f2   :  { %9858 = vmatmul.mubr.f32.vlgmr.msra.gmra.mrb[28].mxu0 %v13169_v29  ;;  %v3740_v29 = vld [vmem:[%s15302_s1 + $0xb8] sm:$0xff] }
 0x3f3   :  { %9860 = vmatprep.mubr.msk.f32.mxu0 %vm12262_vm0, %v15348_v6  ;;  %11350 = vmatpush3.bf16.msra.mxu0 %v11349_v8 }
 0x3f4   :  { %10080 = vmatmul.mubr.f32.vlgmr.msra.gmra.mrb[42].mxu1 %v13178_v36  ;;  %11351 = vmatprep.subr.bf16.mxu0 %v15364_v2  ;;  %v11355_v36 = vpack.c.bf16 %v3741_v59, %v3740_v29 }
 0x3f5   :  { %10082 = vmatprep.mubr.msk.f32.mxu1 %vm12262_vm0, %v15348_v6 }
 0x3f6   :  { %9861 = vmatmul.mubr.f32.gmra.mrb[30].mxu0 %v13188_v52  ;;  %v11358_v52 = vpack.c.bf16 %v3743_v54, %v3742_v21  ;;  %v13753_v21 = vld [vmem:[%s15302_s1 + $0x90] ss:$0 sm:$0xff] }
 0x3f7   :  { %9863 = vmatprep.mubr.msk.f32.mxu0 %vm12262_vm0, %v15348_v6  ;;  %11353 = vmatpush3.bf16.msra.mxu0 %v11352_v55 }
 0x3f8   :  { %10083 = vmatmul.mubr.f32.gmra.mrb[44].mxu1 %v13201_v24  ;;  %11354 = vmatprep.subr.bf16.mxu0 %v15364_v2  ;;  %v26_v24 = vld [vmem:[%s15302_s1 + $0x160] sm:$0xff] }
 0x3f9   :  { %10085 = vmatprep.mubr.msk.f32.mxu1 %vm12262_vm0, %v15348_v6  ;;  %vm3870_vm6 = vcmp.gt.f32.partialorder %v26_v24, 0.0 }
 0x3fa   :  { %9864 = vmatmul.mubr.f32.gmra.mrb[32].mxu0 %v13210_v3  ;;  %v27_v3 = vld [vmem:[%s15302_s1 + $0x168] sm:$0xff]  ;;  %v3877_v23 = vsel %vm3870_vm6, 1, %v12264_v19 }
 0x3fb   :  { %9866 = vmatprep.mubr.msk.f32.mxu0 %vm12262_vm0, %v15348_v6  ;;  %11356 = vmatpush3.bf16.msra.mxu0 %v11355_v36  ;;  %vm3871_vm7 = vcmp.gt.f32.partialorder %v27_v3, 0.0 }
 0x3fc   :  { %10086 = vmatmul.mubr.f32.gmra.mrb[46].mxu1 %v13223_v50  ;;  %11357 = vmatprep.subr.bf16.mxu0 %v15364_v2  ;;  %v32_v50 = vld [vmem:[%s15302_s1 + $0x190] sm:$0x3] }
 0x3fd   :  { %10088 = vmatprep.mubr.msk.f32.mxu1 %vm12262_vm0, %v15348_v6  ;;  %3885 = vperm.xlu0 %12117, %v3877_v23   ;;  %vm3876_vm8 = vcmp.gt.f32.partialorder %v32_v50, 0.0 }
 0x3fe   :  { %9867 = vmatmul.mubr.f32.gmra.mrb[34].mxu0 %v13239_v35  ;;  %v3878_v35 = vsel %vm3871_vm7, 1, %v12264_v19  ;;  %v3883_v51 = vsel %vm3876_vm8, 1, %v12264_v19 }
 0x3ff   :  { %9869 = vmatprep.mubr.msk.f32.mxu0 %vm12262_vm0, %v15348_v6  ;;  %11359 = vmatpush3.bf16.msra.mxu0 %v11358_v52 }
 0x400   :  { %10089 = vmatmul.mubr.f32.gmra.mrb[48].mxu1 %v13256_v15  ;;  %11414 = vmatprep.subr.bf16.mxu0 %v15364_v2  ;;  %v12265_v15 = vmov 1  }
 0x401   :  { %10091 = vmatprep.mubr.msk.f32.mxu1 %vm12262_vm0, %v15348_v6  ;;  %3888 = vperm.xlu0 %12117, %v3878_v35  }
 0x402   :  { %9870 = vmatmul.mubr.f32.gmra.mrb[36].mxu0 %v13270_v1  ;;  %3903 = vperm.xlu1 %12118, %v3883_v51   ;;  %v3880_v1 = vsel %vm3873_vm10, 1, %v12264_v19 }
 0x403   :  { %9872 = vmatprep.mubr.msk.f32.mxu0 %vm12262_vm0, %v15348_v6 }
 0x404   :  { %10092 = vmatmul.mubr.f32.gmra.mrb[50].mxu1 %v13288_v32 }
 0x405   :  { %10094 = vmatprep.mubr.msk.f32.mxu1 %vm12262_vm0, %v15348_v6  ;;  %3900 = vperm.xlu0 %12117, %v3882_v42  }
 0x406   :  { %9873 = vmatmul.mubr.f32.gmra.mrb[38].mxu0 %v13304_v20  ;;  %12120 = vset.pattern.permute.xlu1 %v12265_v15 }
 0x407   :  { %9875 = vmatprep.mubr.msk.f32.mxu0 %vm12262_vm0, %v15348_v6  ;;  %3993 = vperm.xlu1 %12120, %v3878_v35  }
 0x408   :  { %10095 = vmatmul.mubr.f32.gmra.mrb[52].mxu1 %v13320_v30 }
 0x409   :  { %10097 = vmatprep.mubr.msk.f32.mxu1 %vm12262_vm0, %v15348_v6  ;;  %12119 = vset.pattern.permute.xlu0 %v12265_v15 }
 0x40a   :  { %9876 = vmatmul.mubr.f32.gmra.mrb[40].mxu0 %v13337_v57  ;;  %3990 = vperm.xlu0 %12119, %v3877_v23  }
 0x40b   :  { %10116 = vmatprep.mubr.msk.f32.mxu0 %vm12262_vm0, %v15348_v6  ;;  %3996 = vperm.xlu1 %12120, %v3879_v26  }
 0x40c   :  { %10098 = vmatmul.mubr.f32.gmra.mrb[54].mxu1 %v13351_v34 }
 0x40d   :  { %10151 = vmatprep.mubr.msk.f32.mxu1 %vm12262_vm0, %v15348_v6 }
 0x40e   :  { %4002 = vperm.xlu0 %12119, %v3881_v28  }
 0x40f   :  { %4005 = vperm.xlu1 %12120, %v3882_v42  }
 0x412   :  { %4008 = vperm.xlu0 %12119, %v3883_v51  }
 0x413   :  { %12121 = vset.pattern.permute.xlu1 %v12264_v19 }
 0x414   :  { %3894 = vperm.xlu1 %12121, %v3880_v1  }
 0x416   :  { %3999 = vperm.xlu0 %12119, %v3880_v1  }
 0x418   :  { %3942 = vperm.xlu1 %12121, %v26_v24  }
 0x41a   :  { %4052 = vperm.xlu0 %12119, %v28_v48  }
 0x41c   :  { %12122 = vset.pattern.permute.xlu1 %v12265_v15 }
 0x41d   :  { %4044 = vperm.xlu1 %12122, %v26_v24  }
 0x41e   :  { %12124 = vset.pattern.permute.xlu0 %v12264_v19 }
 0x41f   :  { %3947 = vperm.xlu0 %12124, %v27_v3  }
 0x421   :  { %4048 = vperm.xlu1 %12122, %v27_v3  }
 0x423   :  { %3952 = vperm.xlu0 %12124, %v28_v48  }
 0x425   :  { %12123 = vset.pattern.permute.xlu1 %v12264_v19 }
 0x426   :  { %3957 = vperm.xlu1 %12123, %v29_v63  }
 0x427   :  { %3967 = vperm.xlu0 %12124, %v31_v27  }
 0x42a   :  { %12125 = vset.pattern.permute.xlu1 %v12265_v15 }
 0x42b   :  { %3972 = vperm.xlu0 %12124, %v32_v50   ;;  %4056 = vperm.xlu1 %12125, %v29_v63  }
 0x42f   :  { %12128 = vset.pattern.permute.xlu0 %v12265_v15  ;;  %12126 = vset.pattern.permute.xlu1 %v12264_v19 }
 0x430   :  { %3962 = vperm.xlu1 %12126, %v30_v43  }
 0x434   :  { %12127 = vset.pattern.permute.xlu1 %v12265_v15 }
 0x435   :  { %4060 = vperm.xlu1 %12127, %v30_v43  }
 0x439   :  { %4064 = vperm.xlu1 %12127, %v31_v27  }
 0x43d   :  { %4068 = vperm.xlu1 %12127, %v32_v50  }
 0x4c5   :  { %v2802_v34 = vpop.f32.mrb[28].mxu0 }
 0x4c6   :  { %v3665_v53 = vmul.f32 %v2802_v34, %v2802_v34  ;;  %v9859_v32 = vpop.f32.mrb[29].mxu0  ;;  %v3679_v16 = vsub.f32 %v13163_v46, %v2802_v34 }
 0x4c7   :  { %v3625_v14 = vpop.f32.mrb[42].mxu1 }
 0x4c8   :  { %v3672_v20 = vsub.f32 %v3625_v14, %v3665_v53  ;;  %v10081_v22 = vpop.f32.mrb[43].mxu1 }
 0x4c9   :  { %v2808_v30 = vpop.f32.mrb[30].mxu0 }
 0x4ca   :  { %v3686_v31 = vadd.f32 1e-05, %v3672_v20  ;;  %v3666_v57 = vmul.f32 %v2808_v30, %v2808_v30  ;;  %v9862_v38 = vpop.f32.mrb[31].mxu0  ;;  %v3680_v48 = vsub.f32 %v13173_v5, %v2808_v30 }
 0x4cb   :  { %v3631_v62 = vpop.f32.mrb[44].mxu1 }
 0x4cc   :  { %12146 = vrsqrt.f32 %v3686_v31  ;;  %v3673_v44 = vsub.f32 %v3631_v62, %v3666_v57  ;;  %v10084_v60 = vpop.f32.mrb[45].mxu1 }
 0x4cd   :  { %v2814_v40 = vpop.f32.mrb[32].mxu0 }
 0x4ce   :  { %v3687_v41 = vadd.f32 1e-05, %v3673_v44  ;;  %v3667_v56 = vmul.f32 %v2814_v40, %v2814_v40  ;;  %v9865_v4 = vpop.f32.mrb[33].mxu0  ;;  %v3681_v63 = vsub.f32 %v13192_v45, %v2814_v40 }
 0x4cf   :  { %v3637_v13 = vpop.f32.mrb[46].mxu1 }
 0x4d0   :  { %12148 = vrsqrt.f32 %v3687_v41  ;;  %v3674_v37 = vsub.f32 %v3637_v13, %v3667_v56  ;;  %v10087_v58 = vpop.f32.mrb[47].mxu1 }
 0x4d1   :  { %v2820_v12 = vpop.f32.mrb[34].mxu0 }
 0x4d2   :  { %v3688_v10 = vadd.f32 1e-05, %v3674_v37  ;;  %v3668_v11 = vmul.f32 %v2820_v12, %v2820_v12  ;;  %v9868_v33 = vpop.f32.mrb[35].mxu0  ;;  %v3682_v45 = vsub.f32 %v13217_v61, %v2820_v12 }
 0x4d3   :  { %v3643_v47 = vpop.f32.mrb[48].mxu1 }
 0x4d4   :  { %12150 = vrsqrt.f32 %v3688_v10  ;;  %v3675_v0 = vsub.f32 %v3643_v47, %v3668_v11  ;;  %v10090_v18 = vpop.f32.mrb[49].mxu1 }
 0x4d5   :  { %v2826_v25 = vpop.f32.mrb[36].mxu0 }
 0x4d6   :  { %v12147_v8 = vpop.eup %12146  ;;  %v3689_v39 = vadd.f32 1e-05, %v3675_v0  ;;  %v3669_v55 = vmul.f32 %v2826_v25, %v2826_v25  ;;  %v9871_v29 = vpop.f32.mrb[37].mxu0  ;;  %v3683_v56 = vsub.f32 %v13248_v7, %v2826_v25 }
 0x4d7   :  { %v3700_v59 = vmul.f32 %v12147_v8, %v3679_v16  ;;  %v3649_v36 = vpop.f32.mrb[50].mxu1 }
 0x4d8   :  { %12152 = vrsqrt.f32 %v3689_v39  ;;  %v3676_v54 = vsub.f32 %v3649_v36, %v3669_v55  ;;  %v10093_v46 = vpop.f32.mrb[51].mxu1 }
 0x4d9   :  { %v3711_v52 = vmul.f32 %v13748_v9, %v3700_v59  ;;  %v2832_v43 = vpop.f32.mrb[38].mxu0  ;;  %v13796_v59 = vpop.permute.xlu1 %3891 }
 0x4da   :  { %v12149_v24 = vpop.eup %12148  ;;  %v3690_v3 = vadd.f32 1e-05, %v3676_v54  ;;  %v3670_v26 = vmul.f32 %v2832_v43, %v2832_v43  ;;  %v9874_v23 = vpop.f32.mrb[39].mxu0  ;;  %v3684_v12 = vsub.f32 %v13277_v49, %v2832_v43  ;;  %vm3907_vm14 = vcmp.eq.s32.totalorder %v13796_v59, 1 }
 0x4db   :  { %v3722_v50 = vadd.f32 %v13753_v21, %v3711_v52  ;;  %v3655_v27 = vpop.f32.mrb[52].mxu1  ;;  %v3701_v28 = vmul.f32 %v12149_v24, %v3680_v48  ;;  %v3886_v52 = vpop.permute.xlu0 %3885 }
 0x4dc   :  { %12154 = vrsqrt.f32 %v3690_v3  ;;  %v3677_v35 = vsub.f32 %v3655_v27, %v3670_v26  ;;  %v10096_v51 = vpop.f32.mrb[53].mxu1  ;;  %vm3905_vm11 = vcmp.eq.s32.totalorder %v3886_v52, 1 }
 0x4dd   :  { %v3729_v42 = vmax.f32 %v3722_v50, 0.0  ;;  %v2838_v1 = vpop.f32.mrb[40].mxu0  ;;  %v3712_v34 = vmul.f32 %v13748_v9, %v3701_v28  ;;  %v3898_v36 = vpop.permute.xlu1 %3897 }
 0x4de   :  { %v12151_v53 = vpop.eup %12150  ;;  %v3691_v5 = vadd.f32 1e-05, %v3677_v35  ;;  %v3671_v32 = vmul.f32 %v2838_v1, %v2838_v1  ;;  %v9877_v14 = vpop.f32.mrb[41].mxu0  ;;  %v3685_v0 = vsub.f32 %v13313_v17, %v2838_v1  ;;  %vm3909_vm15 = vcmp.eq.s32.totalorder %v3898_v36, 1 }
 0x4df   :  { %v3661_v20 = vpop.f32.mrb[54].mxu1  ;;  %10117 = vmatmul.mubr.msk.f32.vlgmr.msra.gmra.mrb[42].mxu0 %vm179_vm3, %v3729_v42  ;;  %v3723_v22 = vadd.f32 %v13753_v21, %v3712_v34  ;;  %v3702_v30 = vmul.f32 %v12151_v53, %v3681_v63  ;;  %v8315_v63 = vld [vmem:[%s15302_s1 + $0xd8] ss:$0 sm:$0xff] }
 0x4e0   :  { %12156 = vrsqrt.f32 %v3691_v5  ;;  %v3678_v31 = vsub.f32 %v3661_v20, %v3671_v32  ;;  %v10099_v57 = vpop.f32.mrb[55].mxu1  ;;  %10119 = vmatprep.mubr.msk.f32.mxu0 %vm12262_vm0, %v15348_v6 }
 0x4e1   :  { %v3730_v38 = vmax.f32 %v3723_v22, 0.0  ;;  %v3713_v62 = vmul.f32 %v13748_v9, %v3702_v30  ;;  %v13798_v54 = vpop.permute.xlu1 %3903 }
 0x4e2   :  { %v12153_v44 = vpop.eup %12152  ;;  %v3692_v60 = vadd.f32 1e-05, %v3678_v31 }
 0x4e3   :  { %10120 = vmatmul.mubr.msk.f32.gmra.mrb[44].mxu0 %vm179_vm3, %v3730_v38  ;;  %v3724_v40 = vadd.f32 %v13753_v21, %v3713_v62  ;;  %v3703_v41 = vmul.f32 %v12153_v44, %v3682_v45 }
 0x4e4   :  { %12158 = vrsqrt.f32 %v3692_v60  ;;  %10122 = vmatprep.mubr.msk.f32.mxu0 %vm12262_vm0, %v15348_v6 }
 0x4e5   :  { %v3731_v4 = vmax.f32 %v3724_v40, 0.0  ;;  %v3714_v13 = vmul.f32 %v13748_v9, %v3703_v41  ;;  %v3994_v46 = vpop.permute.xlu1 %3993 }
 0x4e6   :  { %v12155_v61 = vpop.eup %12154  ;;  %vm4011_vm5 = vcmp.eq.s32.totalorder %v3994_v46, 1 }
 0x4e7   :  { %10123 = vmatmul.mubr.msk.f32.gmra.mrb[46].mxu0 %vm179_vm3, %v3731_v4  ;;  %v3725_v37 = vadd.f32 %v13753_v21, %v3714_v13  ;;  %v3704_v58 = vmul.f32 %v12155_v61, %v3683_v56 }
 0x4e8   :  { %10125 = vmatprep.mubr.msk.f32.mxu0 %vm12262_vm0, %v15348_v6 }
 0x4e9   :  { %v3732_v10 = vmax.f32 %v3725_v37, 0.0  ;;  %v3715_v11 = vmul.f32 %v13748_v9, %v3704_v58 }
 0x4ea   :  { %v12157_v33 = vpop.eup %12156 }
 0x4eb   :  { %10126 = vmatmul.mubr.msk.f32.gmra.mrb[48].mxu0 %vm179_vm3, %v3732_v10  ;;  %v3726_v7 = vadd.f32 %v13753_v21, %v3715_v11  ;;  %v3705_v47 = vmul.f32 %v12157_v33, %v3684_v12 }
 0x4ec   :  { %10128 = vmatprep.mubr.msk.f32.mxu0 %vm12262_vm0, %v15348_v6 }
 0x4ed   :  { %v3733_v18 = vmax.f32 %v3726_v7, 0.0  ;;  %v3716_v16 = vmul.f32 %v13748_v9, %v3705_v47 }
 0x4ee   :  { %v12159_v25 = vpop.eup %12158 }
 0x4ef   :  { %10129 = vmatmul.mubr.msk.f32.gmra.mrb[50].mxu0 %vm179_vm3, %v3733_v18  ;;  %v3727_v49 = vadd.f32 %v13753_v21, %v3716_v16  ;;  %v3706_v8 = vmul.f32 %v12159_v25, %v3685_v0 }
 0x4f0   :  { %10131 = vmatprep.mubr.msk.f32.mxu0 %vm12262_vm0, %v15348_v6 }
 0x4f1   :  { %v3734_v39 = vmax.f32 %v3727_v49, 0.0  ;;  %v3717_v55 = vmul.f32 %v13748_v9, %v3706_v8  ;;  %v13800_v9 = vpop.permute.xlu1 %3996 }
 0x4f2   :  { %vm4012_vm6 = vcmp.eq.s32.totalorder %v13800_v9, 1 }
 0x4f3   :  { %10132 = vmatmul.mubr.msk.f32.gmra.mrb[52].mxu0 %vm179_vm3, %v3734_v39  ;;  %v3728_v29 = vadd.f32 %v13753_v21, %v3717_v55  ;;  %v3889_v21 = vpop.permute.xlu0 %3888 }
 0x4f4   :  { %10134 = vmatprep.mubr.msk.f32.mxu0 %vm12262_vm0, %v15348_v6 }
 0x4f5   :  { %v3735_v17 = vmax.f32 %v3728_v29, 0.0  ;;  %v4006_v48 = vpop.permute.xlu1 %4005 }
 0x4f6   :  { %vm4015_vm8 = vcmp.eq.s32.totalorder %v4006_v48, 1 }
 0x4f7   :  { %10135 = vmatmul.mubr.msk.f32.gmra.mrb[54].mxu0 %vm179_vm3, %v3735_v17  ;;  %v3901_v24 = vpop.permute.xlu0 %3900  ;;  %vm3906_vm3 = vcmp.eq.s32.totalorder %v3889_v21, 1 }
 0x4f8   :  { %10361 = vmatprep.mubr.msk.f32.mxu0 %vm12262_vm0, %v15348_v6  ;;  %vm3910_vm4 = vcmp.eq.s32.totalorder %v3901_v24, 1 }
 0x4f9   :  { %v13802_v43 = vpop.permute.xlu1 %3894 }
 0x4fa   :  { %vm3908_vm9 = vcmp.eq.s32.totalorder %v13802_v43, 1 }
 0x4fb   :  { %v3991_v23 = vpop.permute.xlu0 %3990 }
 0x4fc   :  { %vm4010_vm12 = vcmp.eq.s32.totalorder %v3991_v23, 1 }
 0x4fd   :  { %v13804_v3 = vpop.permute.xlu1 %3942 }
 0x4ff   :  { %v4003_v51 = vpop.permute.xlu0 %4002 }
 0x500   :  { %vm4014_vm7 = vcmp.eq.s32.totalorder %v4003_v51, 1 }
 0x501   :  { %v13806_v28 = vpop.permute.xlu1 %4044 }
 0x503   :  { %v4009_v32 = vpop.permute.xlu0 %4008 }
 0x505   :  { %v13811_v34 = vpop.permute.xlu1 %4048 }
 0x507   :  { %v4000_v60 = vpop.permute.xlu0 %3999 }
 0x508   :  { %vm4013_vm10 = vcmp.eq.s32.totalorder %v4000_v60, 1 }
 0x509   :  { %v13819_v57 = vpop.permute.xlu1 %3957 }
 0x50b   :  { %v4053_v17 = vpop.permute.xlu0 %4052 }
 0x50d   :  { %v4057_v47 = vpop.permute.xlu1 %4056 }
 0x511   :  { %v3963_v51 = vpop.permute.xlu1 %3962 }
 0x5b2   :  { %v3836_v26 = vpop.f32.mrb[42].mxu0 }
 0x5b3   :  { %v10118_v50 = vpop.f32.mrb[43].mxu0  ;;  %v13813_v53 = vadd.f32 %v8315_v63, %v3836_v26 }
 0x5b5   :  { %v3912_v20 = vsel %vm3905_vm11, %v13813_v53, -inf  ;;  %v4017_v22 = vsel %vm4010_vm12, %v13813_v53, -inf  ;;  %vm3928_vm11 = vcmask 9216   ;;  %vm3911_vm12 = vcmp.eq.s32.totalorder %v13798_v54, 1 }
 0x5b6   :  { %v3841_v27 = vpop.f32.mrb[44].mxu0  ;;  %v3920_v62 = vsel %vm3919_vm13, %v3912_v20, -inf  ;;  %v4024_v44 = vsel %vm3919_vm13, %v4017_v22, -inf }
 0x5b7   :  { %v10121_v35 = vpop.f32.mrb[45].mxu0  ;;  %v13817_v30 = vadd.f32 %v8315_v63, %v3841_v27 }
 0x5b9   :  { %v3913_v56 = vsel %vm3906_vm3, %v13817_v30, -inf  ;;  %v4018_v58 = vsel %vm4011_vm5, %v13817_v30, -inf }
 0x5ba   :  { %v3846_v42 = vpop.f32.mrb[46].mxu0  ;;  %v3921_v0 = vsel %vm3919_vm13, %v3913_v56, -inf  ;;  %v4025_v25 = vsel %vm3919_vm13, %v4018_v58, -inf }
 0x5bb   :  { %v10124_v1 = vpop.f32.mrb[47].mxu0  ;;  %v13830_v4 = vadd.f32 %v8315_v63, %v3846_v42 }
 0x5bd   :  { %v3914_v49 = vsel %vm3907_vm14, %v13830_v4, -inf  ;;  %v4019_v29 = vsel %vm4012_vm6, %v13830_v4, -inf  ;;  %vm6980_vm14 = vcmask 254976  }
 0x5be   :  { %v3851_v5 = vpop.f32.mrb[48].mxu0  ;;  %v3922_v50 = vsel %vm3919_vm13, %v3914_v49, -inf  ;;  %v4026_v27 = vsel %vm3919_vm13, %v4019_v29, -inf }
 0x5bf   :  { %v10127_v14 = vpop.f32.mrb[49].mxu0  ;;  %v13838_v7 = vadd.f32 %v8315_v63, %v3851_v5 }
 0x5c1   :  { %v3915_v59 = vsel %vm3908_vm9, %v13838_v7, -inf  ;;  %v4020_v21 = vsel %vm4013_vm10, %v13838_v7, -inf }
 0x5c2   :  { %v3856_v31 = vpop.f32.mrb[50].mxu0  ;;  %v3923_v1 = vsel %vm3919_vm13, %v3915_v59, -inf  ;;  %v4027_v5 = vsel %vm3919_vm13, %v4020_v21, -inf }
 0x5c3   :  { %v13822_v45 = vadd.f32 %v8315_v63, %v3856_v31  ;;  %v10130_v38 = vpop.f32.mrb[51].mxu0  ;;  %v4061_v31 = vpop.permute.xlu1 %4060 }
 0x5c5   :  { %v3916_v40 = vsel %vm3909_vm15, %v13822_v45, -inf  ;;  %v4021_v41 = vsel %vm4014_vm7, %v13822_v45, -inf  ;;  %vm4016_vm15 = vcmp.eq.s32.totalorder %v4009_v32, 1 }
 0x5c6   :  { %v3924_v13 = vsel %vm3919_vm13, %v3916_v40, -inf  ;;  %v4028_v61 = vsel %vm3919_vm13, %v4021_v41, -inf  ;;  %v3861_v37 = vpop.f32.mrb[52].mxu0 }
 0x5c7   :  { %v3925_v12 = vmax.f32 %v3920_v62, %v3924_v13  ;;  %v4029_v10 = vmax.f32 %v4024_v44, %v4028_v61  ;;  %v13835_v11 = vadd.f32 %v8315_v63, %v3861_v37  ;;  %v10133_v33 = vpop.f32.mrb[53].mxu0  ;;  %v4065_v13 = vpop.permute.xlu1 %4064 }
 0x5c9   :  { %v3917_v18 = vsel %vm3910_vm4, %v13835_v11, -inf  ;;  %v4022_v16 = vsel %vm4015_vm8, %v13835_v11, -inf }
 0x5ca   :  { %v3926_v8 = vsel %vm3919_vm13, %v3917_v18, -inf  ;;  %v4030_v39 = vsel %vm3919_vm13, %v4022_v16, -inf  ;;  %v3866_v55 = vpop.f32.mrb[54].mxu0  ;;  %vm4106_vm13 = vcmask 408576  }
 0x5cb   :  { %v3927_v36 = vmax.f32 %v3921_v0, %v3926_v8  ;;  %v4031_v46 = vmax.f32 %v4025_v25, %v4030_v39  ;;  %v13853_v52 = vadd.f32 %v8315_v63, %v3866_v55  ;;  %v10136_v48 = vpop.f32.mrb[55].mxu0  ;;  %v3948_v63 = vpop.permute.xlu0 %3947 }
 0x5cc   :  { %v4069_v18 = vpop.permute.xlu1 %4068 }
 0x5cd   :  { %v3931_v24 = vmax.f32 %v3925_v12, %v3927_v36  ;;  %v4034_v26 = vmax.f32 %v4029_v10, %v4031_v46  ;;  %v3918_v9 = vsel %vm3911_vm12, %v13853_v52, -inf  ;;  %v4023_v23 = vsel %vm4016_vm15, %v13853_v52, -inf }
 0x5ce   :  { %v3929_v54 = vsel %vm3928_vm11, %v3918_v9, -inf  ;;  %v4032_v35 = vsel %vm3928_vm11, %v4023_v23, -inf }
 0x5cf   :  { %v3930_v43 = vmax.f32 %v3922_v50, %v3929_v54  ;;  %v4033_v42 = vmax.f32 %v4026_v27, %v4032_v35  ;;  %v3953_v44 = vpop.permute.xlu0 %3952 }
 0x5d1   :  { %v3932_v32 = vmax.f32 %v3930_v43, %v3923_v1  ;;  %v4035_v14 = vmax.f32 %v4033_v42, %v4027_v5 }
 0x5d3   :  { %v3933_v20 = vmax.f32 %v3931_v24, %v3932_v32  ;;  %v4036_v22 = vmax.f32 %v4034_v26, %v4035_v14  ;;  %v3968_v58 = vpop.permute.xlu0 %3967 }
 0x5d5   :  { %v3934_v38 = vrot.slane %v3933_v20, 4  ;;  %v4037_v62 = vrot.slane %v4036_v22, 4 }
 0x5d7   :  { %v3935_v60 = vmax.f32 %v3933_v20, %v3934_v38  ;;  %v4038_v40 = vmax.f32 %v4036_v22, %v4037_v62  ;;  %v3973_v39 = vpop.permute.xlu0 %3972 }
 0x5d9   :  { %v3936_v41 = vrot.slane %v3935_v60, 2  ;;  %v4039_v56 = vrot.slane %v4038_v40, 2 }
 0x5db   :  { %v3937_v61 = vmax.f32 %v3935_v60, %v3936_v41  ;;  %v4040_v37 = vmax.f32 %v4038_v40, %v4039_v56 }
 0x5dd   :  { %v3938_v12 = vrot.slane %v3937_v61, 1  ;;  %v4041_v10 = vrot.slane %v4040_v37, 1 }
 0x5df   :  { %v3939_v33 = vmax.f32 %v3937_v61, %v3938_v12  ;;  %v4042_v0 = vmax.f32 %v4040_v37, %v4041_v10 }
 0x5e1   :  { %v3978_v16 = vmul.f32 %v13819_v57, %v3939_v33  ;;  %v4074_v25 = vmul.f32 %v4057_v47, %v4042_v0  ;;  %v3979_v49 = vmul.f32 %v3963_v51, %v3939_v33  ;;  %v3976_v8 = vmul.f32 %v3948_v63, %v3939_v33 }
 0x5e2   :  { %v4072_v55 = vmul.f32 %v13811_v34, %v4042_v0  ;;  %v4075_v29 = vmul.f32 %v4061_v31, %v4042_v0  ;;  %v3977_v36 = vmul.f32 %v3953_v44, %v3939_v33  ;;  %v4073_v46 = vmul.f32 %v4053_v17, %v4042_v0  ;;  %v20_v31 = vld [vmem:[%s15302_s1 + $0x128] sm:$0xff]  ;;  %v21_v44 = vld [vmem:[%s15302_s1 + $0x130] sm:$0xff] }
 0x5e3   :  { %v4081_v48 = vadd.f32 %v4074_v25, %v3978_v16  ;;  %v4076_v59 = vmul.f32 %v4065_v13, %v4042_v0  ;;  %v3980_v21 = vmul.f32 %v3968_v58, %v3939_v33  ;;  %v4077_v24 = vmul.f32 %v4069_v18, %v4042_v0 }
 0x5e4   :  { %v4079_v26 = vadd.f32 %v4072_v55, %v3976_v8  ;;  %v4082_v9 = vadd.f32 %v4075_v29, %v3979_v49  ;;  %v4080_v23 = vadd.f32 %v4073_v46, %v3977_v36  ;;  %v3981_v50 = vmul.f32 %v3973_v39, %v3939_v33 }
 0x5e5   :  { %v4088_v27 = vsub.f32 %v13838_v7, %v4081_v48  ;;  %v4083_v57 = vadd.f32 %v4076_v59, %v3980_v21  ;;  %v3975_v47 = vmul.f32 %v13804_v3, %v3939_v33  ;;  %v4071_v54 = vmul.f32 %v13806_v28, %v4042_v0  ;;  %v22_v59 = vld [vmem:[%s15302_s1 + $0x138] sm:$0xff] }
 0x5e6   :  { %v4086_v34 = vsub.f32 %v13817_v30, %v4079_v26  ;;  %v4089_v35 = vsub.f32 %v13822_v45, %v4082_v9  ;;  %v4087_v17 = vsub.f32 %v13830_v4, %v4080_v23  ;;  %v4084_v51 = vadd.f32 %v4077_v24, %v3981_v50  ;;  %v19_v4 = vld [vmem:[%s15302_s1 + $0x120] sm:$0xff] }
 0x5e7   :  { %v4098_v43 = vmul.f32 1.442695, %v4088_v27  ;;  %v4090_v42 = vsub.f32 %v13835_v11, %v4083_v57  ;;  %v4078_v63 = vadd.f32 %v4071_v54, %v3975_v47  ;;  %v4111_v61 = vsel %vm4106_vm13, %v20_v31, 0  ;;  %v23_v47 = vld [vmem:[%s15302_s1 + $0x140] sm:$0xff] }
 0x5e8   :  { %v4094_v1 = vmul.f32 1.442695, %v4086_v34  ;;  %v4100_v5 = vmul.f32 1.442695, %v4089_v35  ;;  %v4096_v32 = vmul.f32 1.442695, %v4087_v17  ;;  %v4091_v7 = vsub.f32 %v13853_v52, %v4084_v51 }
 0x5e9   :  { %12160 = vpow2.f32 %v4098_v43  ;;  %v4102_v3 = vmul.f32 1.442695, %v4090_v42  ;;  %v4085_v28 = vsub.f32 %v13813_v53, %v4078_v63  ;;  %v4108_v52 = vsel %vm4106_vm13, %v19_v4, 0 }
 0x5ea   :  { %12162 = vpow2.f32 %v4094_v1  ;;  %v4104_v45 = vmul.f32 1.442695, %v4091_v7  ;;  %v13904_v41 = vand.u32 4294901760, %v4108_v52  ;;  %v4114_v33 = vsel %vm4106_vm13, %v21_v44, 0 }
 0x5eb   :  { %12164 = vpow2.f32 %v4100_v5  ;;  %v4092_v30 = vmul.f32 1.442695, %v4085_v28  ;;  %v13930_v25 = vand.u32 4294901760, %v4111_v61  ;;  %v13938_v55 = vand.u32 4294901760, %v4114_v33  ;;  %v24_v28 = vld [vmem:[%s15302_s1 + $0x148] sm:$0xff] }
 0x5ec   :  { %12166 = vpow2.f32 %v4096_v32  ;;  %v13928_v16 = vsub.f32 %v4108_v52, %v13904_v41  ;;  %v4117_v50 = vsel %vm4106_vm13, %v22_v59, 0  ;;  %v4120_v5 = vsel %vm4106_vm13, %v23_v47, 0 }
 0x5ed   :  { %12168 = vpow2.f32 %v4102_v3  ;;  %v13956_v9 = vsub.f32 %v4111_v61, %v13930_v25  ;;  %v13964_v57 = vsub.f32 %v4114_v33, %v13938_v55  ;;  %v13984_v63 = vand.u32 4294901760, %v4117_v50  ;;  %v25_v61 = vld [vmem:[%s15302_s1 + $0x150] sm:$0x3] }
 0x5ee   :  { %12170 = vpow2.f32 %v4092_v30  ;;  %v13953_v26 = vand.u32 4294901760, %v13928_v16  ;;  %v14008_v31 = vand.u32 4294901760, %v4120_v5 }
 0x5ef   :  { %12172 = vpow2.f32 %v4104_v45  ;;  %v13982_v42 = vand.u32 4294901760, %v13956_v9  ;;  %v13993_v3 = vand.u32 4294901760, %v13964_v57 }
 0x5f0   :  { %v4206_v43 = vsub.f32 %v13928_v16, %v13953_v26 }
 0x5f2   :  { %v14001_v52 = vand.u32 4294901760, %v4206_v43 }
 0x5f3   :  { %v13883_v11 = vpop.eup %12160 }
 0x5f4   :  { %v13885_v14 = vpop.eup %12162  ;;  %v4141_v22 = vand.u32 4294901760, %v13883_v11 }
 0x5f5   :  { %v13888_v20 = vpop.eup %12164  ;;  %v4135_v53 = vand.u32 4294901760, %v13885_v14 }
 0x5f6   :  { %v13895_v38 = vpop.eup %12166  ;;  %v4144_v62 = vand.u32 4294901760, %v13888_v20  ;;  %v13917_v12 = vsub.f32 %v13883_v11, %v4141_v22 }
 0x5f7   :  { %v13901_v60 = vpop.eup %12168  ;;  %v4138_v40 = vand.u32 4294901760, %v13895_v38  ;;  %v13907_v56 = vsub.f32 %v13885_v14, %v4135_v53 }
 0x5f8   :  { %v4147_v13 = vand.u32 4294901760, %v13901_v60  ;;  %v13911_v37 = vpop.eup %12170  ;;  %v13920_v10 = vsub.f32 %v13888_v20, %v4144_v62  ;;  %v4297_v36 = vand.u32 4294901760, %v13917_v12 }
 0x5f9   :  { %v13914_v58 = vsub.f32 %v13895_v38, %v4138_v40  ;;  %v4132_v0 = vand.u32 4294901760, %v13911_v37  ;;  %v4283_v39 = vand.u32 4294901760, %v13907_v56  ;;  %v13949_v24 = vpop.eup %12172  ;;  %v13958_v23 = vpack.c.bf16 %v4141_v22, %v4138_v40 }
 0x5fa   :  { %v13925_v18 = vsub.f32 %v13901_v60, %v4147_v13  ;;  %v4304_v46 = vand.u32 4294901760, %v13920_v10  ;;  %v4129_v35 = vsel %vm73_vm1, %v13949_v24, 0  ;;  %v13986_v1 = vpack.c.bf16 %v4147_v13, %v4144_v62 }
 0x5fb   :  { %v13932_v49 = vpack.c.bf16 %v4135_v53, %v4132_v0  ;;  %v13935_v8 = vsub.f32 %v13911_v37, %v4132_v0  ;;  %v4290_v29 = vand.u32 4294901760, %v13914_v58  ;;  %v4284_v51 = vsub.f32 %v13907_v56, %v4283_v39 }
 0x5fc   :  { %v4311_v48 = vand.u32 4294901760, %v13925_v18  ;;  %v13989_v32 = vand.u32 4294901760, %v4129_v35  ;;  %v4298_v7 = vsub.f32 %v13917_v12, %v4297_v36  ;;  %v4216_v53 = vsub.f32 %v13956_v9, %v13982_v42 }
 0x5fd   :  { %11362 = vmatpush3.bf16.msra.mxu1 %v13932_v49  ;;  %v4276_v21 = vand.u32 4294901760, %v13935_v8  ;;  %v13969_v54 = vpack.c.bf16 %v4297_v36, %v4290_v29  ;;  %v4285_v45 = vand.u32 4294901760, %v4284_v51  ;;  %v4291_v4 = vsub.f32 %v13914_v58, %v4290_v29 }
 0x5fe   :  { %11363 = vmatprep.subr.bf16.mxu1 %v15364_v2  ;;  %v13971_v34 = vpack.c.bf16 %v4311_v48, %v4304_v46  ;;  %v14006_v22 = vsub.f32 %v4117_v50, %v13984_v63  ;;  %v4123_v62 = vsel %vm4106_vm13, %v24_v28, 0  ;;  %v14012_v44 = vsub.f32 %v4129_v35, %v13989_v32 }
 0x5ff   :  { %v13961_v27 = vpack.c.bf16 %v4283_v39, %v4276_v21  ;;  %v4277_v17 = vsub.f32 %v13935_v8, %v4276_v21  ;;  %v4299_v40 = vand.u32 4294901760, %v4298_v7  ;;  %v4226_v13 = vsub.f32 %v13964_v57, %v13993_v3 }
 0x600   :  { %v4292_v0 = vand.u32 4294901760, %v4291_v4  ;;  %v4305_v39 = vsub.f32 %v13920_v10, %v4304_v46  ;;  %v4312_v29 = vsub.f32 %v13925_v18, %v4311_v48  ;;  %v14024_v36 = vand.u32 4294901760, %v4216_v53 }
 0x601   :  { %11365 = vmatpush3.bf16.msra.mxu1 %v13958_v23  ;;  %v4278_v30 = vand.u32 4294901760, %v4277_v17  ;;  %v14027_v59 = vand.u32 4294901760, %v14006_v22  ;;  %v14030_v21 = vsub.f32 %v4120_v5, %v14008_v31  ;;  %v14032_v50 = vand.u32 4294901760, %v4123_v62 }
 0x602   :  { %11366 = vmatprep.subr.bf16.mxu1 %v15364_v2  ;;  %v4126_v46 = vsel %vm4106_vm13, %v25_v61, 0  ;;  %v14038_v48 = vand.u32 4294901760, %v4226_v13  ;;  %v11373_v47 = vpack.c.bf16 %v4299_v40, %v4292_v0  ;;  %v4306_v35 = vand.u32 4294901760, %v4305_v39 }
 0x603   :  { %v11370_v33 = vpack.c.bf16 %v4285_v45, %v4278_v30  ;;  %15399 = vst [vmem:[#allocation9_spill] sm:$0xff] %v14027_v59  ;;  %v4313_v17 = vand.u32 4294901760, %v4312_v29  ;;  %v4318_v51 = vand.u32 4294901760, %v14012_v44  ;;  %v4236_v43 = vsub.f32 %v14006_v22, %v14027_v59 }
 0x604   :  { %v14045_v5 = vand.u32 4294901760, %v14030_v21  ;;  %v14048_v7 = vsub.f32 %v4123_v62, %v14032_v50  ;;  %v14050_v28 = vand.u32 4294901760, %v4126_v46 }
 0x605   :  { %11368 = vmatpush3.bf16.msra.mxu1 %v13986_v1  ;;  %v11376_v30 = vpack.c.bf16 %v4313_v17, %v4306_v35  ;;  %v4319_v45 = vsub.f32 %v14012_v44, %v4318_v51  ;;  %v14059_v4 = vand.u32 4294901760, %v4236_v43  ;;  %v11382_v35 = vpack.c.bf16 %v13917_v12, %v13914_v58 }
 0x606   :  { %10149 = vmatprep.subr.mxu1 %v15348_v6  ;;  %15400 = vst [vmem:[#allocation5_spill] sm:$0xff] %v14045_v5  ;;  %v4246_v53 = vsub.f32 %v14030_v21, %v14045_v5  ;;  %v14064_v62 = vand.u32 4294901760, %v14048_v7  ;;  %v14067_v40 = vsub.f32 %v4126_v46, %v14050_v28 }
 0x607   :  { %v4320_v13 = vand.u32 4294901760, %v4319_v45 }
 0x608   :  { %15401 = vst [vmem:[#allocation6_spill] sm:$0xff] %v14064_v62  ;;  %v14073_v61 = vand.u32 4294901760, %v4246_v53  ;;  %v14078_v0 = vand.u32 4294901760, %v14067_v40 }
 0x609   :  { %10150 = vmatpush3.msra.mxu1 %v13989_v32 }
 0x60a   :  { %10152 = vmatmul.mubr.f32.vlgmr.msra.gmra.mrb[56].mxu1 %v14001_v52  ;;  %11369 = vmatprep.subr.bf16.mxu1 %v15364_v2  ;;  %15402 = vst [vmem:[#allocation7_spill] sm:$0xff] %v14078_v0  ;;  %v4266_v29 = vsub.f32 %v14067_v40, %v14078_v0 }
 0x60b   :  { %11371 = vmatpush3.bf16.msra.mxu1 %v11370_v33  ;;  %10154 = vmatprep.mubr.msk.f32.mxu1 %vm12262_vm0, %v15348_v6  ;;  %v4256_v33 = vsub.f32 %v14048_v7, %v14064_v62 }
 0x60c   :  { %11372 = vmatprep.subr.bf16.mxu1 %v15364_v2  ;;  %v14091_v46 = vand.u32 4294901760, %v4266_v29 }
 0x60d   :  { %v14084_v39 = vand.u32 4294901760, %v4256_v33 }
 0x60e   :  { %10155 = vmatmul.mubr.f32.gmra.mrb[58].mxu1 %v14024_v36 }
 0x60f   :  { %11374 = vmatpush3.bf16.msra.mxu1 %v11373_v47  ;;  %10157 = vmatprep.mubr.msk.f32.mxu1 %vm12262_vm0, %v15348_v6  ;;  %v11379_v47 = vpack.c.bf16 %v13907_v56, %v13935_v8  ;;  %v11385_v56 = vpack.c.bf16 %v13925_v18, %v13920_v10 }
 0x610   :  { %11375 = vmatprep.subr.bf16.mxu1 %v15364_v2 }
 0x612   :  { %10158 = vmatmul.mubr.f32.gmra.mrb[60].mxu1 %v14038_v48 }
 0x613   :  { %11377 = vmatpush3.bf16.msra.mxu1 %v11376_v30  ;;  %10160 = vmatprep.mubr.msk.f32.mxu1 %vm12262_vm0, %v15348_v6 }
 0x614   :  { %10184 = vmatprep.subr.mxu1 %v15348_v6 }
 0x616   :  { %10161 = vmatmul.mubr.f32.gmra.mrb[62].mxu1 %v14059_v4 }
 0x617   :  { %10185 = vmatpush3.msra.mxu1 %v4320_v13  ;;  %10163 = vmatprep.mubr.msk.f32.mxu1 %vm12262_vm0, %v15348_v6 }
 0x618   :  { %11378 = vmatprep.subr.bf16.mxu1 %v15364_v2 }
 0x61a   :  { %10164 = vmatmul.mubr.f32.gmra.mrb[64].mxu1 %v14073_v61 }
 0x61b   :  { %10166 = vmatprep.mubr.msk.f32.mxu1 %vm12262_vm0, %v15348_v6 }
 0x61e   :  { %10167 = vmatmul.mubr.f32.gmra.mrb[66].mxu1 %v14084_v39 }
 0x61f   :  { %10169 = vmatprep.mubr.msk.f32.mxu1 %vm12262_vm0, %v15348_v6 }
 0x622   :  { %10170 = vmatmul.mubr.f32.gmra.mrb[68].mxu1 %v14091_v46 }
 0x623   :  { %10186 = vmatprep.mubr.msk.f32.mxu1 %vm12262_vm0, %v15348_v6 }
 0x626   :  { %10187 = vmatmul.mubr.f32.vlgmr.msra.gmra.mrb[56].mxu1 %v13904_v41 }
 0x627   :  { %11380 = vmatpush3.bf16.msra.mxu1 %v11379_v47  ;;  %10189 = vmatprep.mubr.msk.f32.mxu1 %vm12262_vm0, %v15348_v6 }
 0x628   :  { %11381 = vmatprep.subr.bf16.mxu1 %v15364_v2 }
 0x62a   :  { %10190 = vmatmul.mubr.f32.gmra.mrb[58].mxu1 %v13930_v25 }
 0x62b   :  { %11383 = vmatpush3.bf16.msra.mxu1 %v11382_v35  ;;  %10192 = vmatprep.mubr.msk.f32.mxu1 %vm12262_vm0, %v15348_v6 }
 0x62c   :  { %11384 = vmatprep.subr.bf16.mxu1 %v15364_v2 }
 0x62e   :  { %10193 = vmatmul.mubr.f32.gmra.mrb[60].mxu1 %v13938_v55 }
 0x62f   :  { %11386 = vmatpush3.bf16.msra.mxu1 %v11385_v56  ;;  %10195 = vmatprep.mubr.msk.f32.mxu1 %vm12262_vm0, %v15348_v6 }
 0x630   :  { %10219 = vmatprep.subr.mxu1 %v15348_v6 }
 0x632   :  { %10196 = vmatmul.mubr.f32.gmra.mrb[62].mxu1 %v13984_v63 }
 0x633   :  { %10220 = vmatpush3.msra.mxu1 %v14012_v44  ;;  %10198 = vmatprep.mubr.msk.f32.mxu1 %vm12262_vm0, %v15348_v6 }
 0x634   :  { %11387 = vmatprep.subr.bf16.mxu1 %v15364_v2 }
 0x636   :  { %10199 = vmatmul.mubr.f32.gmra.mrb[64].mxu1 %v14008_v31 }
 0x637   :  { %10201 = vmatprep.mubr.msk.f32.mxu1 %vm12262_vm0, %v15348_v6 }
 0x63a   :  { %10202 = vmatmul.mubr.f32.gmra.mrb[66].mxu1 %v14032_v50 }
 0x63b   :  { %10204 = vmatprep.mubr.msk.f32.mxu1 %vm12262_vm0, %v15348_v6 }
 0x63e   :  { %10205 = vmatmul.mubr.f32.gmra.mrb[68].mxu1 %v14050_v28 }
 0x63f   :  { %10221 = vmatprep.mubr.msk.f32.mxu1 %vm12262_vm0, %v15348_v6 }
 0x642   :  { %10222 = vmatmul.mubr.f32.vlgmr.msra.gmra.mrb[56].mxu1 %v13928_v16 }
 0x643   :  { %11389 = vmatpush3.bf16.msra.mxu1 %v13932_v49  ;;  %10224 = vmatprep.mubr.msk.f32.mxu1 %vm12262_vm0, %v15348_v6 }
 0x644   :  { %11390 = vmatprep.subr.bf16.mxu1 %v15364_v2 }
 0x646   :  { %10225 = vmatmul.mubr.f32.gmra.mrb[58].mxu1 %v13956_v9 }
 0x647   :  { %11392 = vmatpush3.bf16.msra.mxu1 %v13958_v23  ;;  %10227 = vmatprep.mubr.msk.f32.mxu1 %vm12262_vm0, %v15348_v6 }
 0x648   :  { %11393 = vmatprep.subr.bf16.mxu1 %v15364_v2 }
 0x64a   :  { %10228 = vmatmul.mubr.f32.gmra.mrb[60].mxu1 %v13964_v57 }
 0x64b   :  { %11395 = vmatpush3.bf16.msra.mxu1 %v13986_v1  ;;  %10230 = vmatprep.mubr.msk.f32.mxu1 %vm12262_vm0, %v15348_v6 }
 0x64c   :  { %10254 = vmatprep.subr.mxu1 %v15348_v6 }
 0x64e   :  { %10231 = vmatmul.mubr.f32.gmra.mrb[62].mxu1 %v14006_v22 }
 0x64f   :  { %10255 = vmatpush3.msra.mxu1 %v13989_v32  ;;  %10233 = vmatprep.mubr.msk.f32.mxu1 %vm12262_vm0, %v15348_v6 }
 0x650   :  { %11396 = vmatprep.subr.bf16.mxu1 %v15364_v2 }
 0x652   :  { %10234 = vmatmul.mubr.f32.gmra.mrb[64].mxu1 %v14030_v21 }
 0x653   :  { %10236 = vmatprep.mubr.msk.f32.mxu1 %vm12262_vm0, %v15348_v6 }
 0x656   :  { %10237 = vmatmul.mubr.f32.gmra.mrb[66].mxu1 %v14048_v7 }
 0x657   :  { %10239 = vmatprep.mubr.msk.f32.mxu1 %vm12262_vm0, %v15348_v6 }
 0x65a   :  { %10240 = vmatmul.mubr.f32.gmra.mrb[68].mxu1 %v14067_v40 }
 0x65b   :  { %10256 = vmatprep.mubr.msk.f32.mxu1 %vm12262_vm0, %v15348_v6 }
 0x65e   :  { %10257 = vmatmul.mubr.f32.vlgmr.msra.gmra.mrb[56].mxu1 %v13953_v26 }
 0x65f   :  { %11398 = vmatpush3.bf16.msra.mxu1 %v13961_v27  ;;  %10259 = vmatprep.mubr.msk.f32.mxu1 %vm12262_vm0, %v15348_v6 }
 0x660   :  { %11399 = vmatprep.subr.bf16.mxu1 %v15364_v2 }
 0x662   :  { %10260 = vmatmul.mubr.f32.gmra.mrb[58].mxu1 %v13982_v42 }
 0x663   :  { %11401 = vmatpush3.bf16.msra.mxu1 %v13969_v54  ;;  %10262 = vmatprep.mubr.msk.f32.mxu1 %vm12262_vm0, %v15348_v6 }
 0x664   :  { %11402 = vmatprep.subr.bf16.mxu1 %v15364_v2 }
 0x666   :  { %10263 = vmatmul.mubr.f32.gmra.mrb[60].mxu1 %v13993_v3 }
 0x667   :  { %11404 = vmatpush3.bf16.msra.mxu1 %v13971_v34  ;;  %10265 = vmatprep.mubr.msk.f32.mxu1 %vm12262_vm0, %v15348_v6 }
 0x668   :  { %10289 = vmatprep.subr.mxu1 %v15348_v6 }
 0x66a   :  { %10266 = vmatmul.mubr.f32.gmra.mrb[62].mxu1 %v14027_v59 }
 0x66b   :  { %10290 = vmatpush3.msra.mxu1 %v4318_v51  ;;  %10268 = vmatprep.mubr.msk.f32.mxu1 %vm12262_vm0, %v15348_v6 }
 0x66c   :  { %11405 = vmatprep.subr.bf16.mxu1 %v15364_v2 }
 0x66e   :  { %10269 = vmatmul.mubr.f32.gmra.mrb[64].mxu1 %v14045_v5 }
 0x66f   :  { %10271 = vmatprep.mubr.msk.f32.mxu1 %vm12262_vm0, %v15348_v6 }
 0x672   :  { %10272 = vmatmul.mubr.f32.gmra.mrb[66].mxu1 %v14064_v62 }
 0x673   :  { %10274 = vmatprep.mubr.msk.f32.mxu1 %vm12262_vm0, %v15348_v6 }
 0x676   :  { %10275 = vmatmul.mubr.f32.gmra.mrb[68].mxu1 %v14078_v0 }
 0x677   :  { %10291 = vmatprep.mubr.msk.f32.mxu1 %vm12262_vm0, %v15348_v6 }
 0x67a   :  { %10292 = vmatmul.mubr.f32.vlgmr.msra.gmra.mrb[56].mxu1 %v13904_v41 }
 0x67b   :  { %11407 = vmatpush3.bf16.msra.mxu1 %v13932_v49  ;;  %10294 = vmatprep.mubr.msk.f32.mxu1 %vm12262_vm0, %v15348_v6 }
 0x67c   :  { %11408 = vmatprep.subr.bf16.mxu1 %v15364_v2 }
 0x67e   :  { %10295 = vmatmul.mubr.f32.gmra.mrb[58].mxu1 %v13930_v25 }
 0x67f   :  { %11410 = vmatpush3.bf16.msra.mxu1 %v13958_v23  ;;  %10297 = vmatprep.mubr.msk.f32.mxu1 %vm12262_vm0, %v15348_v6 }
 0x680   :  { %11411 = vmatprep.subr.bf16.mxu1 %v15364_v2 }
 0x682   :  { %10298 = vmatmul.mubr.f32.gmra.mrb[60].mxu1 %v13938_v55 }
 0x683   :  { %11413 = vmatpush3.bf16.msra.mxu1 %v13986_v1  ;;  %10300 = vmatprep.mubr.msk.f32.mxu1 %vm12262_vm0, %v15348_v6 }
 0x684   :  { %10324 = vmatprep.subr.mxu1 %v15348_v6 }
 0x686   :  { %10301 = vmatmul.mubr.f32.gmra.mrb[62].mxu1 %v13984_v63 }
 0x687   :  { %10325 = vmatpush3.msra.mxu1 %v13989_v32  ;;  %10303 = vmatprep.mubr.msk.f32.mxu1 %vm12262_vm0, %v15348_v6 }
 0x688   :  { %11468 = vmatprep.subr.bf16.mxu1 %v15364_v2 }
 0x68a   :  { %10304 = vmatmul.mubr.f32.gmra.mrb[64].mxu1 %v14008_v31 }
 0x68b   :  { %10306 = vmatprep.mubr.msk.f32.mxu1 %vm12262_vm0, %v15348_v6 }
 0x68e   :  { %10307 = vmatmul.mubr.f32.gmra.mrb[66].mxu1 %v14032_v50 }
 0x68f   :  { %10309 = vmatprep.mubr.msk.f32.mxu1 %vm12262_vm0, %v15348_v6 }
 0x692   :  { %10310 = vmatmul.mubr.f32.gmra.mrb[68].mxu1 %v14050_v28 }
 0x693   :  { %10326 = vmatprep.mubr.msk.f32.mxu1 %vm12262_vm0, %v15348_v6 }
 0x696   :  { %10327 = vmatmul.mubr.f32.vlgmr.msra.gmra.mrb[56].mxu1 %v13904_v41 }
 0x697   :  { %10329 = vmatprep.mubr.msk.f32.mxu1 %vm12262_vm0, %v15348_v6 }
 0x69a   :  { %10330 = vmatmul.mubr.f32.gmra.mrb[58].mxu1 %v13930_v25 }
 0x69b   :  { %10332 = vmatprep.mubr.msk.f32.mxu1 %vm12262_vm0, %v15348_v6 }
 0x69e   :  { %10333 = vmatmul.mubr.f32.gmra.mrb[60].mxu1 %v13938_v55 }
 0x69f   :  { %10335 = vmatprep.mubr.msk.f32.mxu1 %vm12262_vm0, %v15348_v6 }
 0x6a2   :  { %10336 = vmatmul.mubr.f32.gmra.mrb[62].mxu1 %v13984_v63 }
 0x6a3   :  { %10338 = vmatprep.mubr.msk.f32.mxu1 %vm12262_vm0, %v15348_v6 }
 0x6a6   :  { %10339 = vmatmul.mubr.f32.gmra.mrb[64].mxu1 %v14008_v31 }
 0x6a7   :  { %10341 = vmatprep.mubr.msk.f32.mxu1 %vm12262_vm0, %v15348_v6 }
 0x6aa   :  { %10342 = vmatmul.mubr.f32.gmra.mrb[66].mxu1 %v14032_v50 }
 0x6ab   :  { %10344 = vmatprep.mubr.msk.f32.mxu1 %vm12262_vm0, %v15348_v6 }
 0x6ae   :  { %10345 = vmatmul.mubr.f32.gmra.mrb[68].mxu1 %v14050_v28 }
 0x6af   :  { %10571 = vmatprep.mubr.msk.f32.mxu1 %vm12262_vm0, %v15348_v6 }
 0x769   :  { %v4873_v58 = vpop.f32.mrb[56].mxu1 }
 0x76a   :  { %12174 = vrcp.f32 %v4873_v58  ;;  %v10328_v12 = vpop.f32.mrb[57].mxu1 }
 0x76d   :  { %v4879_v10 = vpop.f32.mrb[58].mxu1 }
 0x76e   :  { %12176 = vrcp.f32 %v4879_v10  ;;  %v10331_v18 = vpop.f32.mrb[59].mxu1 }
 0x771   :  { %v4885_v49 = vpop.f32.mrb[60].mxu1 }
 0x772   :  { %12178 = vrcp.f32 %v4885_v49  ;;  %v10334_v8 = vpop.f32.mrb[61].mxu1 }
 0x774   :  { %v12175_v23 = vpop.eup %12174 }
 0x775   :  { %v4891_v27 = vpop.f32.mrb[62].mxu1  ;;  %v4920_v54 = vmul.f32 %v12175_v23, %v13911_v37  ;;  %v14270_v23 = vld [vmem:[%s15301_s0 + $0x10] sm:$0xff] }
 0x776   :  { %12180 = vrcp.f32 %v4891_v27  ;;  %v10337_v34 = vpop.f32.mrb[63].mxu1  ;;  %15405 = vst [vmem:[#allocation11_spill] sm:$0xff] %v14270_v23 }
 0x777   :  { %5760 = vperm.xlu0 %12128, %v4920_v54  }
 0x778   :  { %v12177_v1 = vpop.eup %12176 }
 0x779   :  { %v4897_v32 = vpop.f32.mrb[64].mxu1  ;;  %v4921_v44 = vmul.f32 %v12177_v1, %v13885_v14 }
 0x77a   :  { %12182 = vrcp.f32 %v4897_v32  ;;  %v10340_v17 = vpop.f32.mrb[65].mxu1 }
 0x77b   :  { %5764 = vperm.xlu1 %12127, %v4921_v44  }
 0x77c   :  { %v12179_v51 = vpop.eup %12178 }
 0x77d   :  { %v4903_v43 = vpop.f32.mrb[66].mxu1  ;;  %v4922_v30 = vmul.f32 %v12179_v51, %v13895_v38 }
 0x77e   :  { %12184 = vrcp.f32 %v4903_v43  ;;  %v10343_v45 = vpop.f32.mrb[67].mxu1 }
 0x77f   :  { %5768 = vperm.xlu1 %12127, %v4922_v30  }
 0x780   :  { %v12181_v53 = vpop.eup %12180 }
 0x781   :  { %v4909_v13 = vpop.f32.mrb[68].mxu1  ;;  %v4923_v37 = vmul.f32 %v12181_v53, %v13883_v11 }
 0x782   :  { %12186 = vrcp.f32 %v4909_v13  ;;  %v10346_v33 = vpop.f32.mrb[69].mxu1 }
 0x783   :  { %5772 = vperm.xlu0 %12128, %v4923_v37  }
 0x784   :  { %v12183_v29 = vpop.eup %12182 }
 0x785   :  { %v4924_v14 = vmul.f32 %v12183_v29, %v13888_v20  ;;  %v14252_v20 = vld [vmem:[%s15301_s0] sm:$0xff] }
 0x786   :  { %15403 = vst [vmem:[#allocation8_spill] sm:$0xff] %v14252_v20 }
 0x787   :  { %5776 = vperm.xlu1 %12127, %v4924_v14  }
 0x788   :  { %v12185_v47 = vpop.eup %12184 }
 0x789   :  { %v4925_v35 = vmul.f32 %v12185_v47, %v13901_v60 }
 0x78b   :  { %5780 = vperm.xlu0 %12128, %v4925_v35  }
 0x78c   :  { %v12187_v56 = vpop.eup %12186 }
 0x78d   :  { %v4926_v38 = vmul.f32 %v12187_v56, %v13949_v24  ;;  %v14304_v56 = vld [vmem:[%s15301_s0 + $0x28] sm:$0xff] }
 0x78e   :  { %15408 = vst [vmem:[#allocation14_spill] sm:$0xff] %v14304_v56 }
 0x78f   :  { %12129 = vset.pattern.permute.xlu0 %v12264_v19  ;;  %5784 = vperm.xlu1 %12127, %v4926_v38  }
 0x790   :  { %4929 = vperm.xlu0 %12129, %v4920_v54  }
 0x793   :  { %12130 = vset.pattern.permute.xlu1 %v12264_v19  ;;  %v14258_v19 = vld [vmem:[%s15301_s0 + $0x8] sm:$0xff] }
 0x794   :  { %4944 = vperm.xlu0 %12129, %v4923_v37   ;;  %4934 = vperm.xlu1 %12130, %v4921_v44   ;;  %15404 = vst [vmem:[#allocation10_spill] sm:$0xff] %v14258_v19  ;;  %v14280_v44 = vld [vmem:[%s15301_s0 + $0x18] sm:$0xff]  ;;  %v14294_v37 = vld [vmem:[%s15301_s0 + $0x20] sm:$0xff] }
 0x795   :  { %15406 = vst [vmem:[#allocation12_spill] sm:$0xff] %v14280_v44  ;;  %15407 = vst [vmem:[#allocation13_spill] sm:$0xff] %v14294_v37 }
 0x798   :  { %4954 = vperm.xlu0 %12129, %v4925_v35   ;;  %4939 = vperm.xlu1 %12130, %v4922_v30  }
 0x79c   :  { %4949 = vperm.xlu1 %12130, %v4924_v14   ;;  %12131 = vset.pattern.permute.xlu0 %v12265_v15 }
 0x7a0   :  { %4959 = vperm.xlu1 %12130, %v4926_v38  }
 0x7f6   :  { %v5761_v11 = vpop.permute.xlu0 %5760 }
 0x7f7   :  { %v5787_v60 = vmul.f32 %v14252_v20, %v5761_v11 }
 0x7f9   :  { %v5798_v24 = vand.u32 4294901760, %v5787_v60 }
 0x7fa   :  { %v5765_v58 = vpop.permute.xlu1 %5764 }
 0x7fb   :  { %v5788_v12 = vmul.f32 %v14258_v19, %v5765_v58  ;;  %v14261_v10 = vsub.f32 %v5787_v60, %v5798_v24 }
 0x7fd   :  { %v5801_v15 = vand.u32 4294901760, %v5788_v12  ;;  %v5942_v54 = vand.u32 4294901760, %v14261_v10 }
 0x7fe   :  { %v5769_v18 = vpop.permute.xlu1 %5768 }
 0x7ff   :  { %v14263_v49 = vpack.c.bf16 %v5801_v15, %v5798_v24  ;;  %v14265_v8 = vsub.f32 %v5788_v12, %v5801_v15  ;;  %v5789_v27 = vmul.f32 %v14270_v23, %v5769_v18  ;;  %v5943_v15 = vsub.f32 %v14261_v10, %v5942_v54 }
 0x801   :  { %v5949_v34 = vand.u32 4294901760, %v14265_v8  ;;  %v5804_v1 = vand.u32 4294901760, %v5789_v27  ;;  %11470 = vmatpush3.bf16.msra.mxu1 %v14263_v49 }
 0x802   :  { %v5773_v32 = vpop.permute.xlu0 %5772  ;;  %11471 = vmatprep.subr.bf16.mxu1 %v15364_v2 }
 0x803   :  { %v5790_v17 = vmul.f32 %v14280_v44, %v5773_v32  ;;  %v14283_v51 = vpack.c.bf16 %v5949_v34, %v5942_v54  ;;  %v14285_v43 = vsub.f32 %v5789_v27, %v5804_v1  ;;  %v5950_v60 = vsub.f32 %v14265_v8, %v5949_v34 }
 0x805   :  { %v5807_v30 = vand.u32 4294901760, %v5790_v17  ;;  %v5956_v29 = vand.u32 4294901760, %v14285_v43 }
 0x806   :  { %v5777_v45 = vpop.permute.xlu1 %5776 }
 0x807   :  { %v14287_v53 = vpack.c.bf16 %v5807_v30, %v5804_v1  ;;  %v14289_v13 = vsub.f32 %v5790_v17, %v5807_v30  ;;  %v5791_v33 = vmul.f32 %v14294_v37, %v5777_v45  ;;  %v14320_v1 = vld [vmem:[%s15301_s0 + $0x30] sm:$0x3]  ;;  %v5951_v30 = vand.u32 4294901760, %v5950_v60  ;;  %s8286_s0 = sshll.u32 %s12266_s24, 4  ;;  %s8287_s0 = int_to_ptr.vmem [resolvable:$true] %s8286_s0 }
 0x808   :  { %15409 = vst [vmem:[#allocation15_spill] sm:$0xff] %v14320_v1  ;;  %s12237_s25 = scalar_lea.vmem %s8287_s0, 32  ;;  %p12242_p1 = scmp.lt.s32.totalorder %s8287_s0, %s8287_s0 }
 0x809   :  { %v5963_v14 = vand.u32 4294901760, %v14289_v13  ;;  %v5810_v47 = vand.u32 4294901760, %v5791_v33  ;;  %11473 = vmatpush3.bf16.msra.mxu1 %v14287_v53  ;;  %p12238_p0 = scmp.ne.s32.totalorder %s8287_s0, %s12237_s25  ;;  %p12243_p2 = scmp.lt.s32.totalorder %s12237_s25, %s12237_s25 }
 0x80a   :  { %v5781_v35 = vpop.permute.xlu0 %5780  ;;  %11474 = vmatprep.subr.bf16.mxu1 %v15364_v2 }
 0x80b   :  { %v5792_v38 = vmul.f32 %v14304_v56, %v5781_v35  ;;  %v14307_v11 = vpack.c.bf16 %v5963_v14, %v5956_v29  ;;  %v14310_v24 = vsub.f32 %v5791_v33, %v5810_v47  ;;  %v5964_v45 = vsub.f32 %v14289_v13, %v5963_v14  ;;  %p12244_p3 = por %p12243_p2, %p12242_p1 }
 0x80d   :  { %v5813_v58 = vand.u32 4294901760, %v5792_v38  ;;  %v5970_v33 = vand.u32 4294901760, %v14310_v24  ;;  %v5965_v62 = vand.u32 4294901760, %v5964_v45  ;;  %p12245_p4 = pnand %p12244_p3, %p12238_p0 }
 0x80e   :  { %v5785_v12 = vpop.permute.xlu1 %5784 }
 0x80f   :  { %v14313_v18 = vpack.c.bf16 %v5813_v58, %v5810_v47  ;;  %v14315_v27 = vsub.f32 %v5792_v38, %v5813_v58  ;;  %v5793_v32 = vmul.f32 %v14320_v1, %v5785_v12  ;;  %v4930_v17 = vpop.permute.xlu0 %4929  ;;  %v5944_v38 = vand.u32 4294901760, %v5943_v15 }
 0x810   :  { %v4962_v34 = vmul.f32 %v14252_v20, %v4930_v17  ;;  %v5957_v58 = vsub.f32 %v14285_v43, %v5956_v29  ;;  %v5971_v29 = vsub.f32 %v14310_v24, %v5970_v33 }
 0x811   :  { %v5977_v54 = vand.u32 4294901760, %v14315_v27  ;;  %v5795_v47 = vsel %vm73_vm1, %v5793_v32, 0  ;;  %11476 = vmatpush3.bf16.msra.mxu1 %v14313_v18  ;;  %v11478_v15 = vpack.c.bf16 %v5951_v30, %v5944_v38 }
 0x812   :  { %v14329_v35 = vand.u32 4294901760, %v5795_v47  ;;  %10569 = vmatprep.subr.mxu1 %v15348_v6  ;;  %v4973_v60 = vand.u32 4294901760, %v4962_v34  ;;  %v5958_v59 = vand.u32 4294901760, %v5957_v58 }
 0x813   :  { %v4945_v12 = vpop.permute.xlu0 %4944  ;;  %v4935_v17 = vpop.permute.xlu1 %4934  ;;  %v14333_v20 = vpack.c.bf16 %v5977_v54, %v5970_v33  ;;  %v5978_v14 = vsub.f32 %v14315_v27, %v5977_v54 }
 0x814   :  { %v4965_v0 = vmul.f32 %v14280_v44, %v4945_v12  ;;  %v4963_v32 = vmul.f32 %v14258_v19, %v4935_v17  ;;  %v14339_v5 = vsub.f32 %v5795_v47, %v14329_v35  ;;  %v14345_v54 = vsub.f32 %v4962_v34, %v4973_v60 }
 0x815   :  { %15410 = vst [vmem:[#allocation16_spill] sm:$0xff] %v14333_v20  ;;  %10570 = vmatpush3.msra.mxu1 %v14329_v35  ;;  %v15411_v17 = vmov 0.0   ;;  %v5979_v47 = vand.u32 4294901760, %v5978_v14  ;;  %v11481_v58 = vpack.c.bf16 %v5965_v62, %v5958_v59  ;;  %v5972_v20 = vand.u32 4294901760, %v5971_v29 }
 0x816   :  { %v4976_v6 = vand.u32 4294901760, %v4963_v32  ;;  %10572 = vmatmul.mubr.f32.vlgmr.msra.gmra.mrb[70].mxu1 %v14001_v52  ;;  %11477 = vmatprep.subr.bf16.mxu1 %v15364_v2  ;;  %v4982_v12 = vand.u32 4294901760, %v4965_v0 }
 0x817   :  { %v4955_v44 = vpop.permute.xlu0 %4954  ;;  %11479 = vmatpush3.bf16.msra.mxu1 %v11478_v15  ;;  %v4940_v45 = vpop.permute.xlu1 %4939  ;;  %10574 = vmatprep.mubr.msk.f32.mxu1 %vm12262_vm0, %v15411_v17  ;;  %v11484_v59 = vpack.c.bf16 %v5979_v47, %v5972_v20 }
 0x818   :  { %v14349_v19 = vpack.c.bf16 %v4976_v6, %v4973_v60  ;;  %v14351_v30 = vsub.f32 %v4963_v32, %v4976_v6  ;;  %11480 = vmatprep.subr.bf16.mxu1 %v15364_v2  ;;  %v4967_v38 = vmul.f32 %v14304_v56, %v4955_v44  ;;  %v4964_v34 = vmul.f32 %v14270_v23, %v4940_v45 }
 0x819   :  { %v5117_v60 = vand.u32 4294901760, %v14345_v54  ;;  %v14361_v6 = vsub.f32 %v4965_v0, %v4982_v12  ;;  %v15412_v0 = vand.u32 4294901760, %v14339_v5 }
 0x81a   :  { %v5124_v15 = vand.u32 4294901760, %v14351_v30  ;;  %11416 = vmatpush3.bf16.msra.mxu0 %v14349_v19  ;;  %10575 = vmatmul.mubr.f32.gmra.mrb[72].mxu1 %v14024_v36  ;;  %v4988_v14 = vand.u32 4294901760, %v4967_v38  ;;  %v4979_v32 = vand.u32 4294901760, %v4964_v34 }
 0x81b   :  { %11482 = vmatpush3.bf16.msra.mxu1 %v11481_v58  ;;  %v4950_v33 = vpop.permute.xlu1 %4949  ;;  %11417 = vmatprep.subr.bf16.mxu0 %v15364_v2  ;;  %v5985_v45 = vsub.f32 %v14339_v5, %v15412_v0 }
 0x81c   :  { %v4966_v44 = vmul.f32 %v14294_v37, %v4950_v33  ;;  %10577 = vmatprep.mubr.msk.f32.mxu1 %vm12262_vm0, %v15411_v17  ;;  %11483 = vmatprep.subr.bf16.mxu1 %v15364_v2  ;;  %v14368_v62 = vpack.c.bf16 %v4982_v12, %v4979_v32  ;;  %v14370_v29 = vsub.f32 %v4964_v34, %v4979_v32  ;;  %v5138_v33 = vand.u32 4294901760, %v14361_v6 }
 0x81d   :  { %v14375_v58 = vpack.c.bf16 %v5124_v15, %v5117_v60  ;;  %v14377_v56 = vsub.f32 %v4967_v38, %v4988_v14  ;;  %v5125_v37 = vsub.f32 %v14351_v30, %v5124_v15  ;;  %v5118_v32 = vsub.f32 %v14345_v54, %v5117_v60 }
 0x81e   :  { %v4985_v23 = vand.u32 4294901760, %v4966_v44  ;;  %10578 = vmatmul.mubr.f32.gmra.mrb[74].mxu1 %v14038_v48  ;;  %v5131_v20 = vand.u32 4294901760, %v14370_v29  ;;  %11419 = vmatpush3.bf16.msra.mxu0 %v14368_v62  ;;  %v5986_v15 = vand.u32 4294901760, %v5985_v45 }
 0x81f   :  { %11485 = vmatpush3.bf16.msra.mxu1 %v11484_v59  ;;  %v4960_v12 = vpop.permute.xlu1 %4959  ;;  %11420 = vmatprep.subr.bf16.mxu0 %v15364_v2  ;;  %v5152_v59 = vand.u32 4294901760, %v14377_v56  ;;  %v5119_v45 = vand.u32 4294901760, %v5118_v32 }
 0x820   :  { %v14384_v47 = vpack.c.bf16 %v4988_v14, %v4985_v23  ;;  %v14386_v34 = vsub.f32 %v4966_v44, %v4985_v23  ;;  %v4968_v38 = vmul.f32 %v14320_v1, %v4960_v12  ;;  %10580 = vmatprep.mubr.msk.f32.mxu1 %vm12262_vm0, %v15411_v17  ;;  %10604 = vmatprep.subr.mxu1 %v15411_v17  ;;  %v5126_v44 = vand.u32 4294901760, %v5125_v37 }
 0x821   :  { %v14394_v0 = vpack.c.bf16 %v5138_v33, %v5131_v20  ;;  %v5132_v12 = vsub.f32 %v14370_v29, %v5131_v20  ;;  %v5153_v32 = vsub.f32 %v14377_v56, %v5152_v59 }
 0x822   :  { %v5145_v14 = vand.u32 4294901760, %v14386_v34  ;;  %v4970_v23 = vsel %vm73_vm1, %v4968_v38, 0  ;;  %10581 = vmatmul.mubr.f32.gmra.mrb[76].mxu1 %v14059_v4  ;;  %11422 = vmatpush3.bf16.msra.mxu0 %v14384_v47  ;;  %v5139_v38 = vsub.f32 %v14361_v6, %v5138_v33 }
 0x823   :  { %15413 = vst [vmem:[#allocation17_spill] sm:$0xff] %v14394_v0  ;;  %v14401_v1 = vand.u32 4294901760, %v4970_v23  ;;  %10605 = vmatpush3.msra.mxu1 %v5986_v15  ;;  %10359 = vmatprep.subr.mxu0 %v15411_v17  ;;  %v5133_v37 = vand.u32 4294901760, %v5132_v12  ;;  %v11424_v15 = vpack.c.bf16 %v5126_v44, %v5119_v45 }
 0x824   :  { %10583 = vmatprep.mubr.msk.f32.mxu1 %vm12262_vm0, %v15411_v17  ;;  %v14407_v60 = vpack.c.bf16 %v5152_v59, %v5145_v14  ;;  %11486 = vmatprep.subr.bf16.mxu1 %v15364_v2  ;;  %v5146_v20 = vsub.f32 %v14386_v34, %v5145_v14  ;;  %v5140_v33 = vand.u32 4294901760, %v5139_v38 }
 0x825   :  { %v14414_v0 = vsub.f32 %v4970_v23, %v14401_v1 }
 0x826   :  { %10584 = vmatmul.mubr.f32.gmra.mrb[78].mxu1 %v14073_v61  ;;  %10360 = vmatpush3.msra.mxu0 %v14401_v1  ;;  %v5147_v14 = vand.u32 4294901760, %v5146_v20  ;;  %v11427_v44 = vpack.c.bf16 %v5140_v33, %v5133_v37  ;;  %v6834_v37 = vld [vmem:[%s15302_s1 + $0x1f8] sm:$0xff]  ;;  %v6835_v20 = vld [vmem:[%s15302_s1 + $0x200] sm:$0xff] }
 0x827   :  { %10586 = vmatprep.mubr.msk.f32.mxu1 %vm12262_vm0, %v15411_v17  ;;  %10362 = vmatmul.mubr.f32.vlgmr.msra.gmra.mrb[56].mxu0 %v14001_v52  ;;  %v5159_v23 = vand.u32 4294901760, %v14414_v0  ;;  %v5154_v52 = vand.u32 4294901760, %v5153_v32  ;;  %v11538_v33 = vpack.c.bf16 %v6835_v20, %v6834_v37 }
 0x828   :  { %11423 = vmatprep.subr.bf16.mxu0 %v15364_v2  ;;  %10364 = vmatprep.mubr.msk.f32.mxu0 %vm12262_vm0, %v15411_v17 }
 0x829   :  { %11425 = vmatpush3.bf16.msra.mxu0 %v11424_v15  ;;  %v11430_v59 = vpack.c.bf16 %v5154_v52, %v5147_v14  ;;  %v5160_v12 = vsub.f32 %v14414_v0, %v5159_v23 }
 0x82a   :  { %10587 = vmatmul.mubr.f32.gmra.mrb[80].mxu1 %v14084_v39  ;;  %11426 = vmatprep.subr.bf16.mxu0 %v15364_v2 }
 0x82b   :  { %10589 = vmatprep.mubr.msk.f32.mxu1 %vm12262_vm0, %v15411_v17  ;;  %10365 = vmatmul.mubr.f32.gmra.mrb[58].mxu0 %v14024_v36  ;;  %v11487_v36 = vpack.c.bf16 %v14265_v8, %v14261_v10  ;;  %v5161_v45 = vand.u32 4294901760, %v5160_v12 }
 0x82c   :  { %10367 = vmatprep.mubr.msk.f32.mxu0 %vm12262_vm0, %v15411_v17 }
 0x82d   :  { %11428 = vmatpush3.bf16.msra.mxu0 %v11427_v44  ;;  %v6836_v44 = vld [vmem:[%s15302_s1 + $0x208] sm:$0x3] }
 0x82e   :  { %10590 = vmatmul.mubr.f32.gmra.mrb[82].mxu1 %v14091_v46  ;;  %11429 = vmatprep.subr.bf16.mxu0 %v15364_v2 }
 0x82f   :  { %10606 = vmatprep.mubr.msk.f32.mxu1 %vm12262_vm0, %v15411_v17  ;;  %10368 = vmatmul.mubr.f32.gmra.mrb[60].mxu0 %v14038_v48  ;;  %v11490_v48 = vpack.c.bf16 %v14289_v13, %v14285_v43 }
 0x830   :  { %10370 = vmatprep.mubr.msk.f32.mxu0 %vm12262_vm0, %v15411_v17 }
 0x831   :  { %11431 = vmatpush3.bf16.msra.mxu0 %v11430_v59 }
 0x832   :  { %10607 = vmatmul.mubr.f32.vlgmr.msra.gmra.mrb[70].mxu1 %v13904_v41  ;;  %10394 = vmatprep.subr.mxu0 %v15411_v17 }
 0x833   :  { %11488 = vmatpush3.bf16.msra.mxu1 %v11487_v36  ;;  %10609 = vmatprep.mubr.msk.f32.mxu1 %vm12262_vm0, %v15411_v17 }
 0x834   :  { %10371 = vmatmul.mubr.f32.gmra.mrb[62].mxu0 %v14059_v4  ;;  %11489 = vmatprep.subr.bf16.mxu1 %v15364_v2  ;;  %v11493_v4 = vpack.c.bf16 %v14315_v27, %v14310_v24 }
 0x835   :  { %10395 = vmatpush3.msra.mxu0 %v5161_v45  ;;  %10373 = vmatprep.mubr.msk.f32.mxu0 %vm12262_vm0, %v15411_v17  ;;  %v15421_v45 = vld [vmem:[#allocation8_spill] sm:$0xff] }
 0x836   :  { %10610 = vmatmul.mubr.f32.gmra.mrb[72].mxu1 %v13930_v25  ;;  %11432 = vmatprep.subr.bf16.mxu0 %v15364_v2 }
 0x837   :  { %11491 = vmatpush3.bf16.msra.mxu1 %v11490_v48  ;;  %10612 = vmatprep.mubr.msk.f32.mxu1 %vm12262_vm0, %v15411_v17  ;;  %v15422_v48 = vld [vmem:[#allocation10_spill] sm:$0xff] }
 0x838   :  { %10374 = vmatmul.mubr.f32.gmra.mrb[64].mxu0 %v14073_v61  ;;  %11492 = vmatprep.subr.bf16.mxu1 %v15364_v2  ;;  %v11433_v61 = vpack.c.bf16 %v14351_v30, %v14345_v54 }
 0x839   :  { %10376 = vmatprep.mubr.msk.f32.mxu0 %vm12262_vm0, %v15411_v17 }
 0x83a   :  { %10613 = vmatmul.mubr.f32.gmra.mrb[74].mxu1 %v13938_v55 }
 0x83b   :  { %11494 = vmatpush3.bf16.msra.mxu1 %v11493_v4  ;;  %10615 = vmatprep.mubr.msk.f32.mxu1 %vm12262_vm0, %v15411_v17  ;;  %v15423_v4 = vld [vmem:[#allocation11_spill] sm:$0xff] }
 0x83c   :  { %10377 = vmatmul.mubr.f32.gmra.mrb[66].mxu0 %v14084_v39  ;;  %10639 = vmatprep.subr.mxu1 %v15411_v17  ;;  %v11436_v39 = vpack.c.bf16 %v14361_v6, %v14370_v29  ;;  %v6832_v29 = vld [vmem:[%s15302_s1 + $0x1e8] sm:$0xff] }
 0x83d   :  { %10379 = vmatprep.mubr.msk.f32.mxu0 %vm12262_vm0, %v15411_v17 }
 0x83e   :  { %10616 = vmatmul.mubr.f32.gmra.mrb[76].mxu1 %v13984_v63 }
 0x83f   :  { %10640 = vmatpush3.msra.mxu1 %v14339_v5  ;;  %10618 = vmatprep.mubr.msk.f32.mxu1 %vm12262_vm0, %v15411_v17 }
 0x840   :  { %10380 = vmatmul.mubr.f32.gmra.mrb[68].mxu0 %v14091_v46  ;;  %11495 = vmatprep.subr.bf16.mxu1 %v15364_v2  ;;  %v11439_v46 = vpack.c.bf16 %v14377_v56, %v14386_v34 }
 0x841   :  { %10396 = vmatprep.mubr.msk.f32.mxu0 %vm12262_vm0, %v15411_v17 }
 0x842   :  { %10619 = vmatmul.mubr.f32.gmra.mrb[78].mxu1 %v14008_v31 }
 0x843   :  { %10621 = vmatprep.mubr.msk.f32.mxu1 %vm12262_vm0, %v15411_v17 }
 0x844   :  { %10397 = vmatmul.mubr.f32.vlgmr.msra.gmra.mrb[56].mxu0 %v13904_v41 }
 0x845   :  { %11434 = vmatpush3.bf16.msra.mxu0 %v11433_v61  ;;  %10399 = vmatprep.mubr.msk.f32.mxu0 %vm12262_vm0, %v15411_v17  ;;  %v15424_v61 = vld [vmem:[#allocation12_spill] sm:$0xff] }
 0x846   :  { %11435 = vmatprep.subr.bf16.mxu0 %v15364_v2  ;;  %10622 = vmatmul.mubr.f32.gmra.mrb[80].mxu1 %v14032_v50 }
 0x847   :  { %10624 = vmatprep.mubr.msk.f32.mxu1 %vm12262_vm0, %v15411_v17 }
 0x848   :  { %10400 = vmatmul.mubr.f32.gmra.mrb[58].mxu0 %v13930_v25 }
 0x849   :  { %11437 = vmatpush3.bf16.msra.mxu0 %v11436_v39  ;;  %10402 = vmatprep.mubr.msk.f32.mxu0 %vm12262_vm0, %v15411_v17  ;;  %v15425_v39 = vld [vmem:[#allocation13_spill] sm:$0xff] }
 0x84a   :  { %11438 = vmatprep.subr.bf16.mxu0 %v15364_v2  ;;  %10625 = vmatmul.mubr.f32.gmra.mrb[82].mxu1 %v14050_v28 }
 0x84b   :  { %10641 = vmatprep.mubr.msk.f32.mxu1 %vm12262_vm0, %v15411_v17 }
 0x84c   :  { %10403 = vmatmul.mubr.f32.gmra.mrb[60].mxu0 %v13938_v55 }
 0x84d   :  { %11440 = vmatpush3.bf16.msra.mxu0 %v11439_v46  ;;  %10405 = vmatprep.mubr.msk.f32.mxu0 %vm12262_vm0, %v15411_v17  ;;  %v15426_v46 = vld [vmem:[#allocation14_spill] sm:$0xff] }
 0x84e   :  { %10429 = vmatprep.subr.mxu0 %v15411_v17  ;;  %10642 = vmatmul.mubr.f32.vlgmr.msra.gmra.mrb[70].mxu1 %v13928_v16 }
 0x84f   :  { %11497 = vmatpush3.bf16.msra.mxu1 %v14263_v49  ;;  %10644 = vmatprep.mubr.msk.f32.mxu1 %vm12262_vm0, %v15411_v17 }
 0x850   :  { %10406 = vmatmul.mubr.f32.gmra.mrb[62].mxu0 %v13984_v63  ;;  %11498 = vmatprep.subr.bf16.mxu1 %v15364_v2 }
 0x851   :  { %10430 = vmatpush3.msra.mxu0 %v14414_v0  ;;  %10408 = vmatprep.mubr.msk.f32.mxu0 %vm12262_vm0, %v15411_v17 }
 0x852   :  { %10645 = vmatmul.mubr.f32.gmra.mrb[72].mxu1 %v13956_v9  ;;  %11441 = vmatprep.subr.bf16.mxu0 %v15364_v2 }
 0x853   :  { %11500 = vmatpush3.bf16.msra.mxu1 %v14287_v53  ;;  %10647 = vmatprep.mubr.msk.f32.mxu1 %vm12262_vm0, %v15411_v17 }
 0x854   :  { %10409 = vmatmul.mubr.f32.gmra.mrb[64].mxu0 %v14008_v31  ;;  %11501 = vmatprep.subr.bf16.mxu1 %v15364_v2 }
 0x855   :  { %10411 = vmatprep.mubr.msk.f32.mxu0 %vm12262_vm0, %v15411_v17 }
 0x856   :  { %10648 = vmatmul.mubr.f32.gmra.mrb[74].mxu1 %v13964_v57 }
 0x857   :  { %11503 = vmatpush3.bf16.msra.mxu1 %v14313_v18  ;;  %10650 = vmatprep.mubr.msk.f32.mxu1 %vm12262_vm0, %v15411_v17 }
 0x858   :  { %10412 = vmatmul.mubr.f32.gmra.mrb[66].mxu0 %v14032_v50  ;;  %10674 = vmatprep.subr.mxu1 %v15411_v17 }
 0x859   :  { %10414 = vmatprep.mubr.msk.f32.mxu0 %vm12262_vm0, %v15411_v17 }
 0x85a   :  { %10651 = vmatmul.mubr.f32.gmra.mrb[76].mxu1 %v14006_v22 }
 0x85b   :  { %10675 = vmatpush3.msra.mxu1 %v14329_v35  ;;  %10653 = vmatprep.mubr.msk.f32.mxu1 %vm12262_vm0, %v15411_v17 }
 0x85c   :  { %10415 = vmatmul.mubr.f32.gmra.mrb[68].mxu0 %v14050_v28  ;;  %11504 = vmatprep.subr.bf16.mxu1 %v15364_v2 }
 0x85d   :  { %10431 = vmatprep.mubr.msk.f32.mxu0 %vm12262_vm0, %v15411_v17 }
 0x85e   :  { %10654 = vmatmul.mubr.f32.gmra.mrb[78].mxu1 %v14030_v21 }
 0x85f   :  { %10656 = vmatprep.mubr.msk.f32.mxu1 %vm12262_vm0, %v15411_v17 }
 0x860   :  { %10432 = vmatmul.mubr.f32.vlgmr.msra.gmra.mrb[56].mxu0 %v13928_v16  ;;  %v15414_v16 = vld [vmem:[#allocation16_spill] sm:$0xff] }
 0x861   :  { %11443 = vmatpush3.bf16.msra.mxu0 %v14349_v19  ;;  %10434 = vmatprep.mubr.msk.f32.mxu0 %vm12262_vm0, %v15411_v17 }
 0x862   :  { %11444 = vmatprep.subr.bf16.mxu0 %v15364_v2  ;;  %10657 = vmatmul.mubr.f32.gmra.mrb[80].mxu1 %v14048_v7 }
 0x863   :  { %10659 = vmatprep.mubr.msk.f32.mxu1 %vm12262_vm0, %v15411_v17 }
 0x864   :  { %10435 = vmatmul.mubr.f32.gmra.mrb[58].mxu0 %v13956_v9  ;;  %v15415_v9 = vld [vmem:[#allocation9_spill] sm:$0xff] }
 0x865   :  { %11446 = vmatpush3.bf16.msra.mxu0 %v14368_v62  ;;  %10437 = vmatprep.mubr.msk.f32.mxu0 %vm12262_vm0, %v15411_v17 }
 0x866   :  { %11447 = vmatprep.subr.bf16.mxu0 %v15364_v2  ;;  %10660 = vmatmul.mubr.f32.gmra.mrb[82].mxu1 %v14067_v40 }
 0x867   :  { %10676 = vmatprep.mubr.msk.f32.mxu1 %vm12262_vm0, %v15411_v17 }
 0x868   :  { %10438 = vmatmul.mubr.f32.gmra.mrb[60].mxu0 %v13964_v57  ;;  %v15416_v57 = vand.u32 4294901760, %v14339_v5  ;;  %v15419_v5 = vld [vmem:[#allocation17_spill] sm:$0xff] }
 0x869   :  { %11449 = vmatpush3.bf16.msra.mxu0 %v14384_v47  ;;  %10440 = vmatprep.mubr.msk.f32.mxu0 %vm12262_vm0, %v15411_v17 }
 0x86a   :  { %10464 = vmatprep.subr.mxu0 %v15411_v17  ;;  %10677 = vmatmul.mubr.f32.vlgmr.msra.gmra.mrb[70].mxu1 %v13953_v26 }
 0x86b   :  { %11506 = vmatpush3.bf16.msra.mxu1 %v14283_v51  ;;  %10679 = vmatprep.mubr.msk.f32.mxu1 %vm12262_vm0, %v15411_v17 }
 0x86c   :  { %10441 = vmatmul.mubr.f32.gmra.mrb[62].mxu0 %v14006_v22  ;;  %11507 = vmatprep.subr.bf16.mxu1 %v15364_v2  ;;  %v15417_v22 = vld [vmem:[#allocation5_spill] sm:$0xff] }
 0x86d   :  { %10465 = vmatpush3.msra.mxu0 %v14401_v1  ;;  %10443 = vmatprep.mubr.msk.f32.mxu0 %vm12262_vm0, %v15411_v17 }
 0x86e   :  { %10680 = vmatmul.mubr.f32.gmra.mrb[72].mxu1 %v13982_v42  ;;  %11450 = vmatprep.subr.bf16.mxu0 %v15364_v2 }
 0x86f   :  { %11509 = vmatpush3.bf16.msra.mxu1 %v14307_v11  ;;  %10682 = vmatprep.mubr.msk.f32.mxu1 %vm12262_vm0, %v15411_v17 }
 0x870   :  { %10444 = vmatmul.mubr.f32.gmra.mrb[64].mxu0 %v14030_v21  ;;  %11510 = vmatprep.subr.bf16.mxu1 %v15364_v2  ;;  %v15418_v21 = vld [vmem:[#allocation6_spill] sm:$0xff] }
 0x871   :  { %10446 = vmatprep.mubr.msk.f32.mxu0 %vm12262_vm0, %v15411_v17 }
 0x872   :  { %10683 = vmatmul.mubr.f32.gmra.mrb[74].mxu1 %v13993_v3 }
 0x873   :  { %11512 = vmatpush3.bf16.msra.mxu1 %v15414_v16  ;;  %10685 = vmatprep.mubr.msk.f32.mxu1 %vm12262_vm0, %v15411_v17  ;;  %v15427_v16 = vld [vmem:[#allocation15_spill] sm:$0xff] }
 0x874   :  { %10447 = vmatmul.mubr.f32.gmra.mrb[66].mxu0 %v14048_v7  ;;  %10709 = vmatprep.subr.mxu1 %v15411_v17 }
 0x875   :  { %10449 = vmatprep.mubr.msk.f32.mxu0 %vm12262_vm0, %v15411_v17 }
 0x876   :  { %10686 = vmatmul.mubr.f32.gmra.mrb[76].mxu1 %v15415_v9 }
 0x877   :  { %10710 = vmatpush3.msra.mxu1 %v15416_v57  ;;  %10688 = vmatprep.mubr.msk.f32.mxu1 %vm12262_vm0, %v15411_v17 }
 0x878   :  { %10450 = vmatmul.mubr.f32.gmra.mrb[68].mxu0 %v14067_v40  ;;  %11513 = vmatprep.subr.bf16.mxu1 %v15364_v2  ;;  %v6581_v40 = vld [vmem:[%s15302_s1 + $0x1d0] sm:$0xff] }
 0x879   :  { %10466 = vmatprep.mubr.msk.f32.mxu0 %vm12262_vm0, %v15411_v17 }
 0x87a   :  { %10689 = vmatmul.mubr.f32.gmra.mrb[78].mxu1 %v15417_v22 }
 0x87b   :  { %10691 = vmatprep.mubr.msk.f32.mxu1 %vm12262_vm0, %v15411_v17 }
 0x87c   :  { %10467 = vmatmul.mubr.f32.vlgmr.msra.gmra.mrb[56].mxu0 %v13953_v26  ;;  %v15420_v26 = vld [vmem:[#allocation7_spill] sm:$0xff] }
 0x87d   :  { %11452 = vmatpush3.bf16.msra.mxu0 %v14375_v58  ;;  %10469 = vmatprep.mubr.msk.f32.mxu0 %vm12262_vm0, %v15411_v17  ;;  %v6833_v58 = vld [vmem:[%s15302_s1 + $0x1f0] sm:$0xff] }
 0x87e   :  { %11453 = vmatprep.subr.bf16.mxu0 %v15364_v2  ;;  %10692 = vmatmul.mubr.f32.gmra.mrb[80].mxu1 %v15418_v21 }
 0x87f   :  { %10694 = vmatprep.mubr.msk.f32.mxu1 %vm12262_vm0, %v15411_v17 }
 0x880   :  { %10470 = vmatmul.mubr.f32.gmra.mrb[58].mxu0 %v13982_v42  ;;  %v6579_v42 = vld [vmem:[%s15302_s1 + $0x1c0] sm:$0xff] }
 0x881   :  { %11455 = vmatpush3.bf16.msra.mxu0 %v15419_v5  ;;  %10472 = vmatprep.mubr.msk.f32.mxu0 %vm12262_vm0, %v15411_v17 }
 0x882   :  { %11456 = vmatprep.subr.bf16.mxu0 %v15364_v2  ;;  %10695 = vmatmul.mubr.f32.gmra.mrb[82].mxu1 %v15420_v26 }
 0x883   :  { %10711 = vmatprep.mubr.msk.f32.mxu1 %vm12262_vm0, %v15411_v17 }
 0x884   :  { %10473 = vmatmul.mubr.f32.gmra.mrb[60].mxu0 %v13993_v3  ;;  %v6580_v3 = vld [vmem:[%s15302_s1 + $0x1c8] sm:$0xff] }
 0x885   :  { %11458 = vmatpush3.bf16.msra.mxu0 %v14407_v60  ;;  %10475 = vmatprep.mubr.msk.f32.mxu0 %vm12262_vm0, %v15411_v17  ;;  %v11523_v7 = vpack.c.bf16 %v6580_v3, %v6579_v42  ;;  %v11535_v60 = vpack.c.bf16 %v6833_v58, %v6832_v29  ;;  %v8347_v29 = vld [vmem:[%s15302_s1 + $0x210] ss:$0 sm:$0xff] }
 0x886   :  { %10499 = vmatprep.subr.mxu0 %v15411_v17  ;;  %10712 = vmatmul.mubr.f32.vlgmr.msra.gmra.mrb[70].mxu1 %v13904_v41 }
 0x887   :  { %11515 = vmatpush3.bf16.msra.mxu1 %v14263_v49  ;;  %10714 = vmatprep.mubr.msk.f32.mxu1 %vm12262_vm0, %v15411_v17 }
 0x888   :  { %10476 = vmatmul.mubr.f32.gmra.mrb[62].mxu0 %v15415_v9  ;;  %11516 = vmatprep.subr.bf16.mxu1 %v15364_v2 }
 0x889   :  { %10500 = vmatpush3.msra.mxu0 %v5159_v23  ;;  %10478 = vmatprep.mubr.msk.f32.mxu0 %vm12262_vm0, %v15411_v17 }
 0x88a   :  { %10715 = vmatmul.mubr.f32.gmra.mrb[72].mxu1 %v13930_v25  ;;  %11459 = vmatprep.subr.bf16.mxu0 %v15364_v2 }
 0x88b   :  { %11518 = vmatpush3.bf16.msra.mxu1 %v14287_v53  ;;  %10717 = vmatprep.mubr.msk.f32.mxu1 %vm12262_vm0, %v15411_v17  ;;  %v5758_v53 = vld [vmem:[%s15302_s1 + $0x1b8] sm:$0x3] }
 0x88c   :  { %10479 = vmatmul.mubr.f32.gmra.mrb[64].mxu0 %v15417_v22  ;;  %11519 = vmatprep.subr.bf16.mxu1 %v15364_v2 }
 0x88d   :  { %10481 = vmatprep.mubr.msk.f32.mxu0 %vm12262_vm0, %v15411_v17 }
 0x88e   :  { %10718 = vmatmul.mubr.f32.gmra.mrb[74].mxu1 %v13938_v55 }
 0x88f   :  { %11521 = vmatpush3.bf16.msra.mxu1 %v14313_v18  ;;  %10720 = vmatprep.mubr.msk.f32.mxu1 %vm12262_vm0, %v15411_v17 }
 0x890   :  { %10482 = vmatmul.mubr.f32.gmra.mrb[66].mxu0 %v15418_v21  ;;  %10744 = vmatprep.subr.mxu1 %v15411_v17 }
 0x891   :  { %10484 = vmatprep.mubr.msk.f32.mxu0 %vm12262_vm0, %v15411_v17 }
 0x892   :  { %10721 = vmatmul.mubr.f32.gmra.mrb[76].mxu1 %v13984_v63 }
 0x893   :  { %10745 = vmatpush3.msra.mxu1 %v14329_v35  ;;  %10723 = vmatprep.mubr.msk.f32.mxu1 %vm12262_vm0, %v15411_v17 }
 0x894   :  { %10485 = vmatmul.mubr.f32.gmra.mrb[68].mxu0 %v15420_v26  ;;  %11606 = vmatprep.subr.bf16.mxu1 %v15364_v2 }
 0x895   :  { %10501 = vmatprep.mubr.msk.f32.mxu0 %vm12262_vm0, %v15411_v17 }
 0x896   :  { %10724 = vmatmul.mubr.f32.gmra.mrb[78].mxu1 %v14008_v31 }
 0x897   :  { %10726 = vmatprep.mubr.msk.f32.mxu1 %vm12262_vm0, %v15411_v17 }
 0x898   :  { %10502 = vmatmul.mubr.f32.vlgmr.msra.gmra.mrb[56].mxu0 %v13904_v41 }
 0x899   :  { %11461 = vmatpush3.bf16.msra.mxu0 %v14349_v19  ;;  %10504 = vmatprep.mubr.msk.f32.mxu0 %vm12262_vm0, %v15411_v17  ;;  %v6582_v19 = vld [vmem:[%s15302_s1 + $0x1d8] sm:$0xff] }
 0x89a   :  { %11462 = vmatprep.subr.bf16.mxu0 %v15364_v2  ;;  %10727 = vmatmul.mubr.f32.gmra.mrb[80].mxu1 %v14032_v50  ;;  %v11526_v10 = vpack.c.bf16 %v6582_v19, %v6581_v40 }
 0x89b   :  { %10729 = vmatprep.mubr.msk.f32.mxu1 %vm12262_vm0, %v15411_v17 }
 0x89c   :  { %10505 = vmatmul.mubr.f32.gmra.mrb[58].mxu0 %v13930_v25 }
 0x89d   :  { %11464 = vmatpush3.bf16.msra.mxu0 %v14368_v62  ;;  %10507 = vmatprep.mubr.msk.f32.mxu0 %vm12262_vm0, %v15411_v17 }
 0x89e   :  { %11465 = vmatprep.subr.bf16.mxu0 %v15364_v2  ;;  %10730 = vmatmul.mubr.f32.gmra.mrb[82].mxu1 %v14050_v28 }
 0x89f   :  { %10746 = vmatprep.mubr.msk.f32.mxu1 %vm12262_vm0, %v15411_v17 }
 0x8a0   :  { %10508 = vmatmul.mubr.f32.gmra.mrb[60].mxu0 %v13938_v55 }
 0x8a1   :  { %11467 = vmatpush3.bf16.msra.mxu0 %v14384_v47  ;;  %10510 = vmatprep.mubr.msk.f32.mxu0 %vm12262_vm0, %v15411_v17 }
 0x8a2   :  { %10534 = vmatprep.subr.mxu0 %v15411_v17  ;;  %10747 = vmatmul.mubr.f32.vlgmr.msra.gmra.mrb[70].mxu1 %v13904_v41 }
 0x8a3   :  { %10749 = vmatprep.mubr.msk.f32.mxu1 %vm12262_vm0, %v15411_v17 }
 0x8a4   :  { %10511 = vmatmul.mubr.f32.gmra.mrb[62].mxu0 %v13984_v63 }
 0x8a5   :  { %10535 = vmatpush3.msra.mxu0 %v14401_v1  ;;  %10513 = vmatprep.mubr.msk.f32.mxu0 %vm12262_vm0, %v15411_v17 }
 0x8a6   :  { %10750 = vmatmul.mubr.f32.gmra.mrb[72].mxu1 %v13930_v25  ;;  %11522 = vmatprep.subr.bf16.mxu0 %v15364_v2 }
 0x8a7   :  { %10752 = vmatprep.mubr.msk.f32.mxu1 %vm12262_vm0, %v15411_v17 }
 0x8a8   :  { %10514 = vmatmul.mubr.f32.gmra.mrb[64].mxu0 %v14008_v31 }
 0x8a9   :  { %10516 = vmatprep.mubr.msk.f32.mxu0 %vm12262_vm0, %v15411_v17 }
 0x8aa   :  { %10753 = vmatmul.mubr.f32.gmra.mrb[74].mxu1 %v13938_v55 }
 0x8ab   :  { %10755 = vmatprep.mubr.msk.f32.mxu1 %vm12262_vm0, %v15411_v17 }
 0x8ac   :  { %10517 = vmatmul.mubr.f32.gmra.mrb[66].mxu0 %v14032_v50 }
 0x8ad   :  { %10519 = vmatprep.mubr.msk.f32.mxu0 %vm12262_vm0, %v15411_v17 }
 0x8ae   :  { %10756 = vmatmul.mubr.f32.gmra.mrb[76].mxu1 %v13984_v63 }
 0x8af   :  { %10758 = vmatprep.mubr.msk.f32.mxu1 %vm12262_vm0, %v15411_v17 }
 0x8b0   :  { %10520 = vmatmul.mubr.f32.gmra.mrb[68].mxu0 %v14050_v28 }
 0x8b1   :  { %10536 = vmatprep.mubr.msk.f32.mxu0 %vm12262_vm0, %v15411_v17 }
 0x8b2   :  { %10759 = vmatmul.mubr.f32.gmra.mrb[78].mxu1 %v14008_v31 }
 0x8b3   :  { %10761 = vmatprep.mubr.msk.f32.mxu1 %vm12262_vm0, %v15411_v17 }
 0x8b4   :  { %10537 = vmatmul.mubr.f32.vlgmr.msra.gmra.mrb[56].mxu0 %v13904_v41  ;;  %v6583_v41 = vld [vmem:[%s15302_s1 + $0x1e0] sm:$0x3] }
 0x8b5   :  { %10539 = vmatprep.mubr.msk.f32.mxu0 %vm12262_vm0, %v15411_v17  ;;  %11524 = vmatpush3.bf16.msra.mxu0 %v11523_v7 }
 0x8b6   :  { %10762 = vmatmul.mubr.f32.gmra.mrb[80].mxu1 %v14032_v50  ;;  %11525 = vmatprep.subr.bf16.mxu0 %v15364_v2 }
 0x8b7   :  { %10764 = vmatprep.mubr.msk.f32.mxu1 %vm12262_vm0, %v15411_v17 }
 0x8b8   :  { %10540 = vmatmul.mubr.f32.gmra.mrb[58].mxu0 %v13930_v25  ;;  %v5754_v25 = vld [vmem:[%s15302_s1 + $0x198] sm:$0xff] }
 0x8b9   :  { %10542 = vmatprep.mubr.msk.f32.mxu0 %vm12262_vm0, %v15411_v17  ;;  %11527 = vmatpush3.bf16.msra.mxu0 %v11526_v10 }
 0x8ba   :  { %10765 = vmatmul.mubr.f32.gmra.mrb[82].mxu1 %v14050_v28  ;;  %10775 = vmatprep.subr.mxu0 %v15411_v17 }
 0x8bb   :  { %11028 = vmatprep.mubr.msk.f32.mxu1 %vm12262_vm0, %v15411_v17 }
 0x8bc   :  { %10543 = vmatmul.mubr.f32.gmra.mrb[60].mxu0 %v13938_v55  ;;  %v5755_v55 = vld [vmem:[%s15302_s1 + $0x1a0] sm:$0xff] }
 0x8bd   :  { %10545 = vmatprep.mubr.msk.f32.mxu0 %vm12262_vm0, %v15411_v17  ;;  %10776 = vmatpush3.msk.msra.mxu0 %vm73_vm1, %v6583_v41 }
 0x8be   :  { %11528 = vmatprep.subr.bf16.mxu0 %v15364_v2 }
 0x8c0   :  { %10546 = vmatmul.mubr.f32.gmra.mrb[62].mxu0 %v13984_v63  ;;  %v11529_v63 = vpack.c.bf16 %v5755_v55, %v5754_v25 }
 0x8c1   :  { %10548 = vmatprep.mubr.msk.f32.mxu0 %vm12262_vm0, %v15411_v17 }
 0x8c4   :  { %10549 = vmatmul.mubr.f32.gmra.mrb[64].mxu0 %v14008_v31  ;;  %v5756_v31 = vld [vmem:[%s15302_s1 + $0x1a8] sm:$0xff] }
 0x8c5   :  { %10551 = vmatprep.mubr.msk.f32.mxu0 %vm12262_vm0, %v15411_v17 }
 0x8c8   :  { %10552 = vmatmul.mubr.f32.gmra.mrb[66].mxu0 %v14032_v50  ;;  %v5757_v50 = vld [vmem:[%s15302_s1 + $0x1b0] sm:$0xff] }
 0x8c9   :  { %10554 = vmatprep.mubr.msk.f32.mxu0 %vm12262_vm0, %v15411_v17  ;;  %v11532_v8 = vpack.c.bf16 %v5757_v50, %v5756_v31 }
 0x8cc   :  { %10555 = vmatmul.mubr.f32.gmra.mrb[68].mxu0 %v14050_v28 }
 0x8cd   :  { %10777 = vmatprep.mubr.msk.f32.mxu0 %vm12262_vm0, %v15411_v17 }
 0x975   :  { %v6539_v28 = vpop.f32.mrb[70].mxu1 }
 0x976   :  { %v10748_v49 = vpop.f32.mrb[71].mxu1  ;;  %10778 = vmatmul.mubr.msk.f32.vlgmr.msra.gmra.mrb[70].mxu0 %vm51_vm2, %v6539_v28 }
 0x977   :  { %10780 = vmatprep.mubr.msk.f32.mxu0 %vm12262_vm0, %v15411_v17  ;;  %11530 = vmatpush3.bf16.msra.mxu0 %v11529_v63 }
 0x978   :  { %11531 = vmatprep.subr.bf16.mxu0 %v15364_v2 }
 0x979   :  { %v6545_v51 = vpop.f32.mrb[72].mxu1 }
 0x97a   :  { %v10751_v43 = vpop.f32.mrb[73].mxu1  ;;  %10781 = vmatmul.mubr.msk.f32.gmra.mrb[72].mxu0 %vm51_vm2, %v6545_v51 }
 0x97b   :  { %10783 = vmatprep.mubr.msk.f32.mxu0 %vm12262_vm0, %v15411_v17  ;;  %11533 = vmatpush3.bf16.msra.mxu0 %v11532_v8 }
 0x97c   :  { %10806 = vmatprep.subr.mxu0 %v15411_v17 }
 0x97d   :  { %v6551_v13 = vpop.f32.mrb[74].mxu1 }
 0x97e   :  { %v10754_v56 = vpop.f32.mrb[75].mxu1  ;;  %10784 = vmatmul.mubr.msk.f32.gmra.mrb[74].mxu0 %vm51_vm2, %v6551_v13 }
 0x97f   :  { %10786 = vmatprep.mubr.msk.f32.mxu0 %vm12262_vm0, %v15411_v17  ;;  %10807 = vmatpush3.msk.msra.mxu0 %vm73_vm1, %v5758_v53 }
 0x980   :  { %11534 = vmatprep.subr.bf16.mxu0 %v15364_v2 }
 0x981   :  { %v6557_v11 = vpop.f32.mrb[76].mxu1 }
 0x982   :  { %v10757_v24 = vpop.f32.mrb[77].mxu1  ;;  %10787 = vmatmul.mubr.msk.f32.gmra.mrb[76].mxu0 %vm51_vm2, %v6557_v11 }
 0x983   :  { %10789 = vmatprep.mubr.msk.f32.mxu0 %vm12262_vm0, %v15411_v17 }
 0x985   :  { %v6563_v18 = vpop.f32.mrb[78].mxu1 }
 0x986   :  { %v10760_v27 = vpop.f32.mrb[79].mxu1  ;;  %10790 = vmatmul.mubr.msk.f32.gmra.mrb[78].mxu0 %vm51_vm2, %v6563_v18 }
 0x987   :  { %v5714_v1 = vpop.f32.mrb[56].mxu0  ;;  %10792 = vmatprep.mubr.msk.f32.mxu0 %vm12262_vm0, %v15411_v17 }
 0x988   :  { %v10538_v35 = vpop.f32.mrb[57].mxu0 }
 0x989   :  { %v6569_v54 = vpop.f32.mrb[80].mxu1 }
 0x98a   :  { %v10763_v30 = vpop.f32.mrb[81].mxu1  ;;  %10793 = vmatmul.mubr.msk.f32.gmra.mrb[80].mxu0 %vm51_vm2, %v6569_v54 }
 0x98b   :  { %v5720_v6 = vpop.f32.mrb[58].mxu0  ;;  %10795 = vmatprep.mubr.msk.f32.mxu0 %vm12262_vm0, %v15411_v17 }
 0x98c   :  { %v10541_v62 = vpop.f32.mrb[59].mxu0 }
 0x98d   :  { %v6575_v47 = vpop.f32.mrb[82].mxu1 }
 0x98e   :  { %v10766_v34 = vpop.f32.mrb[83].mxu1  ;;  %10796 = vmatmul.mubr.msk.f32.gmra.mrb[82].mxu0 %vm51_vm2, %v6575_v47 }
 0x98f   :  { %v5726_v0 = vpop.f32.mrb[60].mxu0  ;;  %10808 = vmatprep.mubr.msk.f32.mxu0 %vm12262_vm0, %v15411_v17 }
 0x990   :  { %v10544_v38 = vpop.f32.mrb[61].mxu0 }
 0x992   :  { %10809 = vmatmul.mubr.msk.f32.vlgmr.msra.gmra.mrb[84].mxu0 %vm51_vm2, %v5714_v1 }
 0x993   :  { %v5732_v15 = vpop.f32.mrb[62].mxu0  ;;  %10811 = vmatprep.mubr.msk.f32.mxu0 %vm12262_vm0, %v15411_v17  ;;  %11536 = vmatpush3.bf16.msra.mxu0 %v11535_v60 }
 0x994   :  { %v10547_v32 = vpop.f32.mrb[63].mxu0  ;;  %11537 = vmatprep.subr.bf16.mxu0 %v15364_v2 }
 0x996   :  { %10812 = vmatmul.mubr.msk.f32.gmra.mrb[86].mxu0 %vm51_vm2, %v5720_v6 }
 0x997   :  { %v5738_v14 = vpop.f32.mrb[64].mxu0  ;;  %10814 = vmatprep.mubr.msk.f32.mxu0 %vm12262_vm0, %v15411_v17  ;;  %11539 = vmatpush3.bf16.msra.mxu0 %v11538_v33 }
 0x998   :  { %v10550_v23 = vpop.f32.mrb[65].mxu0  ;;  %10837 = vmatprep.subr.mxu0 %v15411_v17 }
 0x99a   :  { %10815 = vmatmul.mubr.msk.f32.gmra.mrb[88].mxu0 %vm51_vm2, %v5726_v0 }
 0x99b   :  { %v5744_v52 = vpop.f32.mrb[66].mxu0  ;;  %10817 = vmatprep.mubr.msk.f32.mxu0 %vm12262_vm0, %v15411_v17  ;;  %10838 = vmatpush3.msk.msra.mxu0 %vm73_vm1, %v6836_v44 }
 0x99c   :  { %v10553_v59 = vpop.f32.mrb[67].mxu0  ;;  %11540 = vmatprep.subr.bf16.mxu0 %v15364_v2 }
 0x99e   :  { %10818 = vmatmul.mubr.msk.f32.gmra.mrb[90].mxu0 %vm51_vm2, %v5732_v15 }
 0x99f   :  { %v5750_v12 = vpop.f32.mrb[68].mxu0  ;;  %10820 = vmatprep.mubr.msk.f32.mxu0 %vm12262_vm0, %v15411_v17 }
 0x9a0   :  { %v10556_v36 = vpop.f32.mrb[69].mxu0 }
 0x9a2   :  { %10821 = vmatmul.mubr.msk.f32.gmra.mrb[92].mxu0 %vm51_vm2, %v5738_v14 }
 0x9a3   :  { %10823 = vmatprep.mubr.msk.f32.mxu0 %vm12262_vm0, %v15411_v17 }
 0x9a6   :  { %10824 = vmatmul.mubr.msk.f32.gmra.mrb[94].mxu0 %vm51_vm2, %v5744_v52 }
 0x9a7   :  { %10826 = vmatprep.mubr.msk.f32.mxu0 %vm12262_vm0, %v15411_v17 }
 0x9aa   :  { %10827 = vmatmul.mubr.msk.f32.gmra.mrb[96].mxu0 %vm51_vm2, %v5750_v12 }
 0x9ab   :  { %10839 = vmatprep.mubr.msk.f32.mxu0 %vm12262_vm0, %v15411_v17 }
 0x9ae   :  { %10840 = vmatmul.mubr.msk.f32.vlgmr.msra.gmra.mrb[98].mxu0 %vm51_vm2, %v15421_v45 }
 0x9af   :  { %10842 = vmatprep.mubr.msk.f32.mxu0 %vm12262_vm0, %v15411_v17 }
 0x9b2   :  { %10843 = vmatmul.mubr.msk.f32.gmra.mrb[100].mxu0 %vm51_vm2, %v15422_v48 }
 0x9b3   :  { %10845 = vmatprep.mubr.msk.f32.mxu0 %vm12262_vm0, %v15411_v17 }
 0x9b6   :  { %10846 = vmatmul.mubr.msk.f32.gmra.mrb[102].mxu0 %vm51_vm2, %v15423_v4 }
 0x9b7   :  { %10848 = vmatprep.mubr.msk.f32.mxu0 %vm12262_vm0, %v15411_v17 }
 0x9ba   :  { %10849 = vmatmul.mubr.msk.f32.gmra.mrb[104].mxu0 %vm51_vm2, %v15424_v61 }
 0x9bb   :  { %10851 = vmatprep.mubr.msk.f32.mxu0 %vm12262_vm0, %v15411_v17 }
 0x9be   :  { %10852 = vmatmul.mubr.msk.f32.gmra.mrb[106].mxu0 %vm51_vm2, %v15425_v39 }
 0x9bf   :  { %10854 = vmatprep.mubr.msk.f32.mxu0 %vm12262_vm0, %v15411_v17 }
 0x9c2   :  { %10855 = vmatmul.mubr.msk.f32.gmra.mrb[108].mxu0 %vm51_vm2, %v15426_v46 }
 0x9c3   :  { %10857 = vmatprep.mubr.msk.f32.mxu0 %vm12262_vm0, %v15411_v17 }
 0x9c6   :  { %10858 = vmatmul.mubr.msk.f32.gmra.mrb[110].mxu0 %vm51_vm2, %v15427_v16  ;;  %vm6961_vm2 = vcmask 261120  }
 0x9c7   :  { %10868 = vmatprep.mubr.msk.f32.mxu0 %vm12262_vm0, %v15411_v17 }
 0xa49   :  { %v6674_v9 = vpop.f32.mrb[70].mxu0 }
 0xa4a   :  { %v10779_v57 = vpop.f32.mrb[71].mxu0 }
 0xa4d   :  { %v6679_v22 = vpop.f32.mrb[72].mxu0 }
 0xa4e   :  { %v10782_v21 = vpop.f32.mrb[73].mxu0 }
 0xa51   :  { %v6684_v5 = vpop.f32.mrb[74].mxu0 }
 0xa52   :  { %v10785_v26 = vpop.f32.mrb[75].mxu0 }
 0xa55   :  { %v6689_v42 = vpop.f32.mrb[76].mxu0 }
 0xa56   :  { %v10788_v3 = vpop.f32.mrb[77].mxu0 }
 0xa59   :  { %v6694_v7 = vpop.f32.mrb[78].mxu0 }
 0xa5a   :  { %v10791_v40 = vpop.f32.mrb[79].mxu0 }
 0xa5d   :  { %v6699_v19 = vpop.f32.mrb[80].mxu0 }
 0xa5e   :  { %v10794_v10 = vpop.f32.mrb[81].mxu0 }
 0xa61   :  { %v6704_v41 = vpop.f32.mrb[82].mxu0 }
 0xa62   :  { %v10797_v25 = vpop.f32.mrb[83].mxu0 }
 0xa65   :  { %v6798_v55 = vpop.f32.mrb[84].mxu0 }
 0xa66   :  { %v6799_v63 = vadd.f32 %v6798_v55, %v6674_v9  ;;  %v10810_v31 = vpop.f32.mrb[85].mxu0 }
 0xa69   :  { %v6803_v50 = vpop.f32.mrb[86].mxu0 }
 0xa6a   :  { %v6804_v28 = vadd.f32 %v6803_v50, %v6679_v22  ;;  %v10813_v49 = vpop.f32.mrb[87].mxu0 }
 0xa6d   :  { %v6808_v8 = vpop.f32.mrb[88].mxu0 }
 0xa6e   :  { %v6809_v51 = vadd.f32 %v6808_v8, %v6684_v5  ;;  %v10816_v43 = vpop.f32.mrb[89].mxu0 }
 0xa71   :  { %v6813_v53 = vpop.f32.mrb[90].mxu0 }
 0xa72   :  { %v6814_v13 = vadd.f32 %v6813_v53, %v6689_v42  ;;  %v10819_v56 = vpop.f32.mrb[91].mxu0 }
 0xa75   :  { %v6818_v11 = vpop.f32.mrb[92].mxu0 }
 0xa76   :  { %v6819_v24 = vadd.f32 %v6818_v11, %v6694_v7  ;;  %v10822_v18 = vpop.f32.mrb[93].mxu0 }
 0xa79   :  { %v6823_v27 = vpop.f32.mrb[94].mxu0 }
 0xa7a   :  { %v6824_v1 = vadd.f32 %v6823_v27, %v6699_v19  ;;  %v10825_v35 = vpop.f32.mrb[95].mxu0 }
 0xa7d   :  { %v6828_v54 = vpop.f32.mrb[96].mxu0 }
 0xa7e   :  { %v6829_v30 = vadd.f32 %v6828_v54, %v6704_v41  ;;  %v10828_v6 = vpop.f32.mrb[97].mxu0 }
 0xa81   :  { %v6906_v62 = vpop.f32.mrb[98].mxu0 }
 0xa82   :  { %v6907_v58 = vadd.f32 %v6906_v62, %v6799_v63  ;;  %v10841_v47 = vpop.f32.mrb[99].mxu0 }
 0xa84   :  { %v6945_v34 = vadd.f32 %v8347_v29, %v6907_v58 }
 0xa85   :  { %v6911_v0 = vpop.f32.mrb[100].mxu0 }
 0xa86   :  { %v6912_v60 = vadd.f32 %v6911_v0, %v6804_v28  ;;  %v10844_v38 = vpop.f32.mrb[101].mxu0  ;;  %v6952_v37 = vmax.f32 %v6945_v34, 0.0 }
 0xa88   :  { %v6946_v20 = vadd.f32 %v8347_v29, %v6912_v60  ;;  %v6962_v15 = vsel %vm6961_vm2, %v6952_v37, 0.0 }
 0xa89   :  { %6963 = vadd.xlane.f32.xlu0 %v6962_v15  ;;  %v6916_v33 = vpop.f32.mrb[102].mxu0 }
 0xa8a   :  { %v6917_v32 = vadd.f32 %v6916_v33, %v6809_v51  ;;  %v10847_v14 = vpop.f32.mrb[103].mxu0  ;;  %v6953_v23 = vmax.f32 %v6946_v20, 0.0 }
 0xa8c   :  { %v6947_v44 = vadd.f32 %v8347_v29, %v6917_v32  ;;  %v6965_v52 = vsel %vm6961_vm2, %v6953_v23, 0.0 }
 0xa8d   :  { %6966 = vadd.xlane.f32.xlu1 %v6965_v52  ;;  %v6921_v59 = vpop.f32.mrb[104].mxu0  ;;  %v7077_v52 = vld [vmem:[%s15302_s1 + $0x228] sm:$0xff] }
 0xa8e   :  { %v6922_v12 = vadd.f32 %v6921_v59, %v6814_v13  ;;  %v10850_v36 = vpop.f32.mrb[105].mxu0  ;;  %v6954_v45 = vmax.f32 %v6947_v44, 0.0  ;;  %v7078_v59 = vld [vmem:[%s15302_s1 + $0x230] sm:$0xff] }
 0xa8f   :  { %v7079_v36 = vld [vmem:[%s15302_s1 + $0x238] sm:$0xff] }
 0xa90   :  { %v6948_v48 = vadd.f32 %v8347_v29, %v6922_v12  ;;  %v6968_v4 = vsel %vm6961_vm2, %v6954_v45, 0.0  ;;  %v11541_v12 = vpack.c.bf16 %v7078_v59, %v7077_v52 }
 0xa91   :  { %6969 = vadd.xlane.f32.xlu0 %v6968_v4  ;;  %v6926_v61 = vpop.f32.mrb[106].mxu0 }
 0xa92   :  { %v6927_v39 = vadd.f32 %v6926_v61, %v6819_v24  ;;  %v10853_v46 = vpop.f32.mrb[107].mxu0  ;;  %v6955_v16 = vmax.f32 %v6948_v48, 0.0  ;;  %11542 = vmatpush3.bf16.msra.mxu0 %v11541_v12 }
 0xa93   :  { %11543 = vmatprep.subr.bf16.mxu0 %v15364_v2 }
 0xa94   :  { %v6949_v9 = vadd.f32 %v8347_v29, %v6927_v39  ;;  %v6971_v57 = vsel %vm6961_vm2, %v6955_v16, 0.0 }
 0xa95   :  { %6972 = vadd.xlane.f32.xlu0 %v6971_v57  ;;  %v6931_v22 = vpop.f32.mrb[108].mxu0 }
 0xa96   :  { %v6932_v21 = vadd.f32 %v6931_v22, %v6824_v1  ;;  %v10856_v5 = vpop.f32.mrb[109].mxu0  ;;  %v6956_v26 = vmax.f32 %v6949_v9, 0.0 }
 0xa98   :  { %v6950_v42 = vadd.f32 %v8347_v29, %v6932_v21  ;;  %v6974_v3 = vsel %vm6961_vm2, %v6956_v26, 0.0 }
 0xa99   :  { %6975 = vadd.xlane.f32.xlu1 %v6974_v3  ;;  %v6936_v7 = vpop.f32.mrb[110].mxu0  ;;  %v8348_v3 = vld [vmem:[%s15302_s1 + $0x218] ss:$0 sm:$0xff] }
 0xa9a   :  { %v6937_v40 = vadd.f32 %v6936_v7, %v6829_v30  ;;  %v6957_v19 = vmax.f32 %v6950_v42, 0.0  ;;  %v10859_v10 = vpop.f32.mrb[111].mxu0 }
 0xa9b   :  { %v8349_v10 = vld [vmem:[%s15302_s1 + $0x220] ss:$0 sm:$0xff] }
 0xa9c   :  { %v6951_v41 = vadd.f32 %v8347_v29, %v6937_v40  ;;  %v6977_v25 = vsel %vm6961_vm2, %v6957_v19, 0.0 }
 0xa9d   :  { %6978 = vadd.xlane.f32.xlu0 %v6977_v25 }
 0xa9e   :  { %v6958_v55 = vmax.f32 %v6951_v41, 0.0 }
 0xaa0   :  { %v6981_v63 = vsel %vm6980_vm14, %v6958_v55, 0.0 }
 0xaa1   :  { %6982 = vadd.xlane.f32.xlu1 %v6981_v63 }
 0xb16   :  { %v6964_v31 = vpop.xlane.xlu0 %6963 }
 0xb17   :  { %v6985_v50 = vmul.f32 0.03125, %v6964_v31 }
 0xb19   :  { %v14875_v28 = vsub.f32 %v6952_v37, %v6985_v50 }
 0xb1a   :  { %v6967_v49 = vpop.xlane.xlu1 %6966 }
 0xb1b   :  { %v6986_v8 = vmul.f32 0.03125, %v6967_v49  ;;  %v6999_v51 = vmul.f32 %v14875_v28, %v14875_v28 }
 0xb1d   :  { %v14879_v43 = vsub.f32 %v6953_v23, %v6986_v8  ;;  %v7006_v53 = vsel %vm6961_vm2, %v6999_v51, 0.0 }
 0xb1e   :  { %v6970_v13 = vpop.xlane.xlu0 %6969  ;;  %7007 = vadd.xlane.f32.xlu0 %v7006_v53 }
 0xb1f   :  { %v6987_v56 = vmul.f32 0.03125, %v6970_v13  ;;  %v7000_v11 = vmul.f32 %v14879_v43, %v14879_v43 }
 0xb21   :  { %v14884_v24 = vsub.f32 %v6954_v45, %v6987_v56  ;;  %v7009_v18 = vsel %vm6961_vm2, %v7000_v11, 0.0  ;;  %v7080_v45 = vld [vmem:[%s15302_s1 + $0x240] sm:$0xff] }
 0xb22   :  { %v6973_v27 = vpop.xlane.xlu0 %6972  ;;  %7010 = vadd.xlane.f32.xlu1 %v7009_v18  ;;  %v11544_v48 = vpack.c.bf16 %v7080_v45, %v7079_v36 }
 0xb23   :  { %v6988_v1 = vmul.f32 0.03125, %v6973_v27  ;;  %v7001_v35 = vmul.f32 %v14884_v24, %v14884_v24 }
 0xb24   :  { %11545 = vmatpush3.bf16.msra.mxu0 %v11544_v48 }
 0xb25   :  { %v14889_v54 = vsub.f32 %v6955_v16, %v6988_v1  ;;  %v7012_v30 = vsel %vm6961_vm2, %v7001_v35, 0.0  ;;  %11546 = vmatprep.subr.bf16.mxu0 %v15364_v2 }
 0xb26   :  { %v6976_v6 = vpop.xlane.xlu1 %6975  ;;  %7013 = vadd.xlane.f32.xlu0 %v7012_v30 }
 0xb27   :  { %v6989_v62 = vmul.f32 0.03125, %v6976_v6  ;;  %v7002_v29 = vmul.f32 %v14889_v54, %v14889_v54 }
 0xb29   :  { %v14894_v58 = vsub.f32 %v6956_v26, %v6989_v62  ;;  %v7015_v47 = vsel %vm6961_vm2, %v7002_v29, 0.0 }
 0xb2a   :  { %v6979_v34 = vpop.xlane.xlu0 %6978  ;;  %7016 = vadd.xlane.f32.xlu1 %v7015_v47 }
 0xb2b   :  { %v6990_v0 = vmul.f32 0.03125, %v6979_v34  ;;  %v7003_v60 = vmul.f32 %v14894_v58, %v14894_v58 }
 0xb2d   :  { %v14899_v38 = vsub.f32 %v6957_v19, %v6990_v0  ;;  %v7018_v37 = vsel %vm6961_vm2, %v7003_v60, 0.0 }
 0xb2e   :  { %7019 = vadd.xlane.f32.xlu0 %v7018_v37  ;;  %v6983_v20 = vpop.xlane.xlu1 %6982 }
 0xb2f   :  { %v6991_v15 = vmul.f32 0.03125, %v6983_v20  ;;  %v7004_v33 = vmul.f32 %v14899_v38, %v14899_v38 }
 0xb31   :  { %v14904_v32 = vsub.f32 %v6958_v55, %v6991_v15  ;;  %v7021_v14 = vsel %vm6961_vm2, %v7004_v33, 0.0 }
 0xb32   :  { %7022 = vadd.xlane.f32.xlu1 %v7021_v14 }
 0xb33   :  { %v7005_v23 = vmul.f32 %v14904_v32, %v14904_v32 }
 0xb35   :  { %v7024_v44 = vsel %vm6980_vm14, %v7005_v23, 0.0 }
 0xb36   :  { %7025 = vadd.xlane.f32.xlu0 %v7024_v44 }
 0xbab   :  { %v7008_v4 = vpop.xlane.xlu0 %7007 }
 0xbac   :  { %v7027_v61 = vmul.f32 0.03125, %v7008_v4 }
 0xbae   :  { %v7034_v39 = vadd.f32 1e-05, %v7027_v61 }
 0xbaf   :  { %v7011_v46 = vpop.xlane.xlu1 %7010 }
 0xbb0   :  { %12188 = vrsqrt.f32 %v7034_v39  ;;  %v7028_v16 = vmul.f32 0.03125, %v7011_v46 }
 0xbb2   :  { %v7035_v9 = vadd.f32 1e-05, %v7028_v16 }
 0xbb3   :  { %v7014_v57 = vpop.xlane.xlu0 %7013 }
 0xbb4   :  { %12190 = vrsqrt.f32 %v7035_v9  ;;  %v7029_v22 = vmul.f32 0.03125, %v7014_v57 }
 0xbb6   :  { %v7036_v21 = vadd.f32 1e-05, %v7029_v22 }
 0xbb7   :  { %v7017_v5 = vpop.xlane.xlu1 %7016 }
 0xbb8   :  { %12192 = vrsqrt.f32 %v7036_v21  ;;  %v7030_v26 = vmul.f32 0.03125, %v7017_v5 }
 0xbba   :  { %v12189_v42 = vpop.eup %12188  ;;  %v7037_v7 = vadd.f32 1e-05, %v7030_v26 }
 0xbbb   :  { %v7048_v40 = vmul.f32 %v12189_v42, %v14875_v28  ;;  %v7020_v19 = vpop.xlane.xlu0 %7019 }
 0xbbc   :  { %12194 = vrsqrt.f32 %v7037_v7  ;;  %v7031_v41 = vmul.f32 0.03125, %v7020_v19 }
 0xbbd   :  { %v7059_v25 = vmul.f32 %v8348_v3, %v7048_v40 }
 0xbbe   :  { %v12191_v55 = vpop.eup %12190  ;;  %v7038_v63 = vadd.f32 1e-05, %v7031_v41 }
 0xbbf   :  { %v7070_v31 = vadd.f32 %v8349_v10, %v7059_v25  ;;  %v7023_v50 = vpop.xlane.xlu1 %7022  ;;  %v7049_v49 = vmul.f32 %v12191_v55, %v14879_v43 }
 0xbc0   :  { %12196 = vrsqrt.f32 %v7038_v63  ;;  %v7032_v8 = vmul.f32 0.03125, %v7023_v50 }
 0xbc1   :  { %10869 = vmatmul.mubr.msk.f32.vlgmr.msra.gmra.mrb[112].mxu0 %vm6961_vm2, %v7070_v31  ;;  %v7060_v51 = vmul.f32 %v8348_v3, %v7049_v49 }
 0xbc2   :  { %v12193_v28 = vpop.eup %12192  ;;  %v7039_v53 = vadd.f32 1e-05, %v7032_v8  ;;  %10871 = vmatprep.mubr.msk.f32.mxu0 %vm12262_vm0, %v15411_v17 }
 0xbc3   :  { %v7026_v13 = vpop.xlane.xlu0 %7025  ;;  %v7071_v56 = vadd.f32 %v8349_v10, %v7060_v51  ;;  %v7050_v11 = vmul.f32 %v12193_v28, %v14884_v24 }
 0xbc4   :  { %12198 = vrsqrt.f32 %v7039_v53  ;;  %v7033_v18 = vmul.f32 0.03125, %v7026_v13 }
 0xbc5   :  { %10872 = vmatmul.mubr.msk.f32.gmra.mrb[114].mxu0 %vm6961_vm2, %v7071_v56  ;;  %v7061_v27 = vmul.f32 %v8348_v3, %v7050_v11 }
 0xbc6   :  { %v12195_v43 = vpop.eup %12194  ;;  %v7040_v1 = vadd.f32 1e-05, %v7033_v18  ;;  %10874 = vmatprep.mubr.msk.f32.mxu0 %vm12262_vm0, %v15411_v17 }
 0xbc7   :  { %v7072_v35 = vadd.f32 %v8349_v10, %v7061_v27  ;;  %v7051_v30 = vmul.f32 %v12195_v43, %v14889_v54 }
 0xbc8   :  { %12200 = vrsqrt.f32 %v7040_v1 }
 0xbc9   :  { %10875 = vmatmul.mubr.msk.f32.gmra.mrb[116].mxu0 %vm6961_vm2, %v7072_v35  ;;  %v7062_v6 = vmul.f32 %v8348_v3, %v7051_v30 }
 0xbca   :  { %v12197_v62 = vpop.eup %12196  ;;  %10877 = vmatprep.mubr.msk.f32.mxu0 %vm12262_vm0, %v15411_v17 }
 0xbcb   :  { %v7073_v24 = vadd.f32 %v8349_v10, %v7062_v6  ;;  %v7052_v29 = vmul.f32 %v12197_v62, %v14894_v58 }
 0xbcd   :  { %10878 = vmatmul.mubr.msk.f32.gmra.mrb[118].mxu0 %vm6961_vm2, %v7073_v24  ;;  %v7063_v47 = vmul.f32 %v8348_v3, %v7052_v29 }
 0xbce   :  { %v12199_v34 = vpop.eup %12198  ;;  %10880 = vmatprep.mubr.msk.f32.mxu0 %vm12262_vm0, %v15411_v17 }
 0xbcf   :  { %v7074_v0 = vadd.f32 %v8349_v10, %v7063_v47  ;;  %v7053_v54 = vmul.f32 %v12199_v34, %v14899_v38  ;;  %v8350_v38 = vld [vmem:[%s15302_s1 + $0x248] ss:$0 sm:$0xff] }
 0xbd1   :  { %10881 = vmatmul.mubr.msk.f32.gmra.mrb[120].mxu0 %vm6961_vm2, %v7074_v0  ;;  %v7064_v60 = vmul.f32 %v8348_v3, %v7053_v54 }
 0xbd2   :  { %v12201_v37 = vpop.eup %12200  ;;  %10883 = vmatprep.mubr.msk.f32.mxu0 %vm12262_vm0, %v15411_v17 }
 0xbd3   :  { %v7075_v20 = vadd.f32 %v8349_v10, %v7064_v60  ;;  %v7054_v58 = vmul.f32 %v12201_v37, %v14904_v32 }
 0xbd5   :  { %10884 = vmatmul.mubr.msk.f32.gmra.mrb[122].mxu0 %vm6961_vm2, %v7075_v20  ;;  %v7065_v15 = vmul.f32 %v8348_v3, %v7054_v58 }
 0xbd6   :  { %10886 = vmatprep.mubr.msk.f32.mxu0 %vm12262_vm0, %v15411_v17 }
 0xbd7   :  { %v7076_v33 = vadd.f32 %v8349_v10, %v7065_v15 }
 0xbd9   :  { %10887 = vmatmul.mubr.msk.f32.gmra.mrb[124].mxu0 %vm6961_vm2, %v7076_v33 }
 0xbda   :  { %10897 = vmatprep.mubr.msk.f32.mxu0 %vm12262_vm0, %v15411_v17 }
 0xc94   :  { %v7173_v14 = vpop.f32.mrb[112].mxu0 }
 0xc95   :  { %v7174_v23 = vadd.f32 %v8350_v38, %v7173_v14  ;;  %v10870_v44 = vpop.f32.mrb[113].mxu0 }
 0xc97   :  { %v7207_v32 = vmax.f32 %v7174_v23, 0.0 }
 0xc98   :  { %v7178_v52 = vpop.f32.mrb[114].mxu0 }
 0xc99   :  { %v7179_v59 = vadd.f32 %v8350_v38, %v7178_v52  ;;  %v10873_v12 = vpop.f32.mrb[115].mxu0  ;;  %v7216_v36 = vsel %vm6961_vm2, %v7207_v32, 0.0 }
 0xc9a   :  { %7217 = vadd.xlane.f32.xlu1 %v7216_v36 }
 0xc9b   :  { %v7208_v45 = vmax.f32 %v7179_v59, 0.0 }
 0xc9c   :  { %v7183_v48 = vpop.f32.mrb[116].mxu0 }
 0xc9d   :  { %v7184_v4 = vadd.f32 %v8350_v38, %v7183_v48  ;;  %v10876_v61 = vpop.f32.mrb[117].mxu0  ;;  %v7219_v39 = vsel %vm6961_vm2, %v7208_v45, 0.0  ;;  %v7330_v48 = vld [vmem:[%s15302_s1 + $0x268] sm:$0xff] }
 0xc9e   :  { %7220 = vadd.xlane.f32.xlu0 %v7219_v39  ;;  %v7331_v61 = vld [vmem:[%s15302_s1 + $0x270] sm:$0xff]  ;;  %v7332_v39 = vld [vmem:[%s15302_s1 + $0x278] sm:$0xff] }
 0xc9f   :  { %v7209_v46 = vmax.f32 %v7184_v4, 0.0 }
 0xca0   :  { %v7188_v16 = vpop.f32.mrb[118].mxu0 }
 0xca1   :  { %v7189_v9 = vadd.f32 %v8350_v38, %v7188_v16  ;;  %v10879_v57 = vpop.f32.mrb[119].mxu0  ;;  %v7222_v22 = vsel %vm6961_vm2, %v7209_v46, 0.0 }
 0xca2   :  { %7223 = vadd.xlane.f32.xlu1 %v7222_v22 }
 0xca3   :  { %v7210_v21 = vmax.f32 %v7189_v9, 0.0 }
 0xca4   :  { %v7193_v5 = vpop.f32.mrb[120].mxu0 }
 0xca5   :  { %v7194_v26 = vadd.f32 %v8350_v38, %v7193_v5  ;;  %v10882_v42 = vpop.f32.mrb[121].mxu0  ;;  %v7225_v3 = vsel %vm6961_vm2, %v7210_v21, 0.0 }
 0xca6   :  { %7226 = vadd.xlane.f32.xlu0 %v7225_v3 }
 0xca7   :  { %v7211_v7 = vmax.f32 %v7194_v26, 0.0 }
 0xca8   :  { %v7198_v40 = vpop.f32.mrb[122].mxu0 }
 0xca9   :  { %v7199_v19 = vadd.f32 %v8350_v38, %v7198_v40  ;;  %v10885_v10 = vpop.f32.mrb[123].mxu0  ;;  %v7228_v41 = vsel %vm6961_vm2, %v7211_v7, 0.0 }
 0xcaa   :  { %7229 = vadd.xlane.f32.xlu1 %v7228_v41  ;;  %v8358_v10 = vld [vmem:[%s15302_s1 + $0x250] ss:$0 sm:$0xff] }
 0xcab   :  { %v7212_v25 = vmax.f32 %v7199_v19, 0.0 }
 0xcac   :  { %v7203_v55 = vpop.f32.mrb[124].mxu0 }
 0xcad   :  { %v7204_v63 = vadd.f32 %v8350_v38, %v7203_v55  ;;  %v10888_v31 = vpop.f32.mrb[125].mxu0  ;;  %v7231_v50 = vsel %vm6961_vm2, %v7212_v25, 0.0 }
 0xcae   :  { %7232 = vadd.xlane.f32.xlu0 %v7231_v50 }
 0xcaf   :  { %v7213_v49 = vmax.f32 %v7204_v63, 0.0  ;;  %v8359_v63 = vld [vmem:[%s15302_s1 + $0x258] ss:$0 sm:$0xff] }
 0xcb1   :  { %v7234_v8 = vsel %vm6980_vm14, %v7213_v49, 0.0 }
 0xcb2   :  { %7235 = vadd.xlane.f32.xlu1 %v7234_v8 }
 0xd27   :  { %v7218_v51 = vpop.xlane.xlu1 %7217 }
 0xd28   :  { %v7237_v28 = vmul.f32 0.03125, %v7218_v51 }
 0xd2a   :  { %v14968_v53 = vsub.f32 %v7207_v32, %v7237_v28 }
 0xd2b   :  { %v7221_v13 = vpop.xlane.xlu0 %7220 }
 0xd2c   :  { %v7238_v56 = vmul.f32 0.03125, %v7221_v13  ;;  %v7251_v11 = vmul.f32 %v14968_v53, %v14968_v53 }
 0xd2e   :  { %v14972_v18 = vsub.f32 %v7208_v45, %v7238_v56  ;;  %v7258_v27 = vsel %vm6961_vm2, %v7251_v11, 0.0  ;;  %v7329_v45 = vld [vmem:[%s15302_s1 + $0x260] sm:$0xff] }
 0xd2f   :  { %v7224_v43 = vpop.xlane.xlu1 %7223  ;;  %7259 = vadd.xlane.f32.xlu0 %v7258_v27  ;;  %v11547_v4 = vpack.c.bf16 %v7330_v48, %v7329_v45 }
 0xd30   :  { %v7239_v1 = vmul.f32 0.03125, %v7224_v43  ;;  %v7252_v35 = vmul.f32 %v14972_v18, %v14972_v18 }
 0xd31   :  { %11548 = vmatpush3.bf16.msra.mxu0 %v11547_v4 }
 0xd32   :  { %v14977_v30 = vsub.f32 %v7209_v46, %v7239_v1  ;;  %v7261_v6 = vsel %vm6961_vm2, %v7252_v35, 0.0  ;;  %11549 = vmatprep.subr.bf16.mxu0 %v15364_v2  ;;  %v11550_v46 = vpack.c.bf16 %v7332_v39, %v7331_v61 }
 0xd33   :  { %v7227_v62 = vpop.xlane.xlu0 %7226  ;;  %7262 = vadd.xlane.f32.xlu1 %v7261_v6 }
 0xd34   :  { %v7240_v24 = vmul.f32 0.03125, %v7227_v62  ;;  %v7253_v29 = vmul.f32 %v14977_v30, %v14977_v30 }
 0xd35   :  { %11551 = vmatpush3.bf16.msra.mxu0 %v11550_v46 }
 0xd36   :  { %v14982_v47 = vsub.f32 %v7210_v21, %v7240_v24  ;;  %v7264_v34 = vsel %vm6961_vm2, %v7253_v29, 0.0  ;;  %11552 = vmatprep.subr.bf16.mxu0 %v15364_v2 }
 0xd37   :  { %v7230_v0 = vpop.xlane.xlu1 %7229  ;;  %7265 = vadd.xlane.f32.xlu0 %v7264_v34 }
 0xd38   :  { %v7241_v54 = vmul.f32 0.03125, %v7230_v0  ;;  %v7254_v60 = vmul.f32 %v14982_v47, %v14982_v47 }
 0xd3a   :  { %v14987_v37 = vsub.f32 %v7211_v7, %v7241_v54  ;;  %v7267_v20 = vsel %vm6961_vm2, %v7254_v60, 0.0 }
 0xd3b   :  { %v7233_v58 = vpop.xlane.xlu0 %7232  ;;  %7268 = vadd.xlane.f32.xlu1 %v7267_v20 }
 0xd3c   :  { %v7242_v15 = vmul.f32 0.03125, %v7233_v58  ;;  %v7255_v33 = vmul.f32 %v14987_v37, %v14987_v37 }
 0xd3e   :  { %v14992_v38 = vsub.f32 %v7212_v25, %v7242_v15  ;;  %v7270_v14 = vsel %vm6961_vm2, %v7255_v33, 0.0 }
 0xd3f   :  { %7271 = vadd.xlane.f32.xlu0 %v7270_v14  ;;  %v7236_v23 = vpop.xlane.xlu1 %7235 }
 0xd40   :  { %v7243_v44 = vmul.f32 0.03125, %v7236_v23  ;;  %v7256_v32 = vmul.f32 %v14992_v38, %v14992_v38 }
 0xd42   :  { %v14997_v52 = vsub.f32 %v7213_v49, %v7243_v44  ;;  %v7273_v59 = vsel %vm6961_vm2, %v7256_v32, 0.0 }
 0xd43   :  { %7274 = vadd.xlane.f32.xlu1 %v7273_v59 }
 0xd44   :  { %v7257_v12 = vmul.f32 %v14997_v52, %v14997_v52 }
 0xd46   :  { %v7276_v36 = vsel %vm6980_vm14, %v7257_v12, 0.0 }
 0xd47   :  { %7277 = vadd.xlane.f32.xlu0 %v7276_v36 }
 0xdbc   :  { %v7260_v16 = vpop.xlane.xlu0 %7259 }
 0xdbd   :  { %v7279_v9 = vmul.f32 0.03125, %v7260_v16 }
 0xdbf   :  { %v7286_v57 = vadd.f32 1e-05, %v7279_v9 }
 0xdc0   :  { %v7263_v22 = vpop.xlane.xlu1 %7262 }
 0xdc1   :  { %12202 = vrsqrt.f32 %v7286_v57  ;;  %v7280_v21 = vmul.f32 0.03125, %v7263_v22 }
 0xdc3   :  { %v7287_v5 = vadd.f32 1e-05, %v7280_v21 }
 0xdc4   :  { %v7266_v26 = vpop.xlane.xlu0 %7265 }
 0xdc5   :  { %12204 = vrsqrt.f32 %v7287_v5  ;;  %v7281_v42 = vmul.f32 0.03125, %v7266_v26 }
 0xdc7   :  { %v7288_v3 = vadd.f32 1e-05, %v7281_v42 }
 0xdc8   :  { %v7269_v7 = vpop.xlane.xlu1 %7268 }
 0xdc9   :  { %12206 = vrsqrt.f32 %v7288_v3  ;;  %v7282_v40 = vmul.f32 0.03125, %v7269_v7 }
 0xdcb   :  { %v12203_v19 = vpop.eup %12202  ;;  %v7289_v41 = vadd.f32 1e-05, %v7282_v40 }
 0xdcc   :  { %v7300_v25 = vmul.f32 %v12203_v19, %v14968_v53  ;;  %v7272_v55 = vpop.xlane.xlu0 %7271 }
 0xdcd   :  { %12208 = vrsqrt.f32 %v7289_v41  ;;  %v7283_v31 = vmul.f32 0.03125, %v7272_v55 }
 0xdce   :  { %v7311_v50 = vmul.f32 %v8358_v10, %v7300_v25 }
 0xdcf   :  { %v12205_v49 = vpop.eup %12204  ;;  %v7290_v8 = vadd.f32 1e-05, %v7283_v31 }
 0xdd0   :  { %v7322_v51 = vadd.f32 %v8359_v63, %v7311_v50  ;;  %v7275_v28 = vpop.xlane.xlu1 %7274  ;;  %v7301_v13 = vmul.f32 %v12205_v49, %v14972_v18 }
 0xdd1   :  { %12210 = vrsqrt.f32 %v7290_v8  ;;  %v7284_v56 = vmul.f32 0.03125, %v7275_v28 }
 0xdd2   :  { %10898 = vmatmul.mubr.msk.f32.vlgmr.msra.gmra.mrb[126].mxu0 %vm6961_vm2, %v7322_v51  ;;  %v7312_v11 = vmul.f32 %v8358_v10, %v7301_v13 }
 0xdd3   :  { %v12207_v53 = vpop.eup %12206  ;;  %v7291_v27 = vadd.f32 1e-05, %v7284_v56  ;;  %10900 = vmatprep.mubr.msk.f32.mxu0 %vm12262_vm0, %v15411_v17 }
 0xdd4   :  { %v7278_v43 = vpop.xlane.xlu0 %7277  ;;  %v7323_v1 = vadd.f32 %v8359_v63, %v7312_v11  ;;  %v7302_v35 = vmul.f32 %v12207_v53, %v14977_v30 }
 0xdd5   :  { %12212 = vrsqrt.f32 %v7291_v27  ;;  %v7285_v6 = vmul.f32 0.03125, %v7278_v43 }
 0xdd6   :  { %10901 = vmatmul.mubr.msk.f32.gmra.mrb[128].mxu0 %vm6961_vm2, %v7323_v1  ;;  %v7313_v62 = vmul.f32 %v8358_v10, %v7302_v35 }
 0xdd7   :  { %v12209_v18 = vpop.eup %12208  ;;  %v7292_v24 = vadd.f32 1e-05, %v7285_v6  ;;  %10903 = vmatprep.mubr.msk.f32.mxu0 %vm12262_vm0, %v15411_v17 }
 0xdd8   :  { %v7324_v29 = vadd.f32 %v8359_v63, %v7313_v62  ;;  %v7303_v34 = vmul.f32 %v12209_v18, %v14982_v47 }
 0xdd9   :  { %12214 = vrsqrt.f32 %v7292_v24 }
 0xdda   :  { %10904 = vmatmul.mubr.msk.f32.gmra.mrb[130].mxu0 %vm6961_vm2, %v7324_v29  ;;  %v7314_v0 = vmul.f32 %v8358_v10, %v7303_v34 }
 0xddb   :  { %v12211_v54 = vpop.eup %12210  ;;  %10906 = vmatprep.mubr.msk.f32.mxu0 %vm12262_vm0, %v15411_v17 }
 0xddc   :  { %v7325_v30 = vadd.f32 %v8359_v63, %v7314_v0  ;;  %v7304_v60 = vmul.f32 %v12211_v54, %v14987_v37 }
 0xdde   :  { %10907 = vmatmul.mubr.msk.f32.gmra.mrb[132].mxu0 %vm6961_vm2, %v7325_v30  ;;  %v7315_v20 = vmul.f32 %v8358_v10, %v7304_v60 }
 0xddf   :  { %v12213_v58 = vpop.eup %12212  ;;  %10909 = vmatprep.mubr.msk.f32.mxu0 %vm12262_vm0, %v15411_v17 }
 0xde0   :  { %v7326_v15 = vadd.f32 %v8359_v63, %v7315_v20  ;;  %v7305_v47 = vmul.f32 %v12213_v58, %v14992_v38  ;;  %v8360_v38 = vld [vmem:[%s15302_s1 + $0x280] ss:$0 sm:$0xff] }
 0xde2   :  { %10910 = vmatmul.mubr.msk.f32.gmra.mrb[134].mxu0 %vm6961_vm2, %v7326_v15  ;;  %v7316_v33 = vmul.f32 %v8358_v10, %v7305_v47 }
 0xde3   :  { %v12215_v14 = vpop.eup %12214  ;;  %10912 = vmatprep.mubr.msk.f32.mxu0 %vm12262_vm0, %v15411_v17 }
 0xde4   :  { %v7327_v23 = vadd.f32 %v8359_v63, %v7316_v33  ;;  %v7306_v37 = vmul.f32 %v12215_v14, %v14997_v52 }
 0xde6   :  { %10913 = vmatmul.mubr.msk.f32.gmra.mrb[136].mxu0 %vm6961_vm2, %v7327_v23  ;;  %v7317_v44 = vmul.f32 %v8358_v10, %v7306_v37 }
 0xde7   :  { %10915 = vmatprep.mubr.msk.f32.mxu0 %vm12262_vm0, %v15411_v17 }
 0xde8   :  { %v7328_v32 = vadd.f32 %v8359_v63, %v7317_v44 }
 0xdea   :  { %10916 = vmatmul.mubr.msk.f32.gmra.mrb[138].mxu0 %vm6961_vm2, %v7328_v32 }
 0xdeb   :  { %10932 = vmatprep.mubr.msk.f32.mxu0 %vm12262_vm0, %v15411_v17 }
 0xea5   :  { %v7425_v59 = vpop.f32.mrb[126].mxu0 }
 0xea6   :  { %v7426_v12 = vadd.f32 %v8360_v38, %v7425_v59  ;;  %v10899_v36 = vpop.f32.mrb[127].mxu0 }
 0xea8   :  { %v7459_v52 = vmax.f32 %v7426_v12, 0.0 }
 0xea9   :  { %v7430_v45 = vpop.f32.mrb[128].mxu0 }
 0xeaa   :  { %v7431_v48 = vadd.f32 %v8360_v38, %v7430_v45  ;;  %v10902_v4 = vpop.f32.mrb[129].mxu0  ;;  %v7468_v61 = vsel %vm6961_vm2, %v7459_v52, 0.0 }
 0xeab   :  { %7469 = vadd.xlane.f32.xlu1 %v7468_v61 }
 0xeac   :  { %v7460_v39 = vmax.f32 %v7431_v48, 0.0 }
 0xead   :  { %v7435_v46 = vpop.f32.mrb[130].mxu0 }
 0xeae   :  { %v7436_v16 = vadd.f32 %v8360_v38, %v7435_v46  ;;  %v10905_v9 = vpop.f32.mrb[131].mxu0  ;;  %v7471_v57 = vsel %vm6961_vm2, %v7460_v39, 0.0  ;;  %v8113_v46 = vld [vmem:[%s15302_s1 + $0x2a0] sm:$0xff] }
 0xeaf   :  { %7472 = vadd.xlane.f32.xlu0 %v7471_v57  ;;  %v8115_v57 = vld [vmem:[%s15302_s1 + $0x2b0] sm:$0xff] }
 0xeb0   :  { %v7461_v22 = vmax.f32 %v7436_v16, 0.0  ;;  %v8114_v16 = vld [vmem:[%s15302_s1 + $0x2a8] sm:$0xff] }
 0xeb1   :  { %v7440_v21 = vpop.f32.mrb[132].mxu0 }
 0xeb2   :  { %v7441_v5 = vadd.f32 %v8360_v38, %v7440_v21  ;;  %v10908_v26 = vpop.f32.mrb[133].mxu0  ;;  %v7474_v42 = vsel %vm6961_vm2, %v7461_v22, 0.0 }
 0xeb3   :  { %7475 = vadd.xlane.f32.xlu1 %v7474_v42 }
 0xeb4   :  { %v7462_v3 = vmax.f32 %v7441_v5, 0.0 }
 0xeb5   :  { %v7445_v7 = vpop.f32.mrb[134].mxu0 }
 0xeb6   :  { %v7446_v40 = vadd.f32 %v8360_v38, %v7445_v7  ;;  %v10911_v19 = vpop.f32.mrb[135].mxu0  ;;  %v7477_v10 = vsel %vm6961_vm2, %v7462_v3, 0.0 }
 0xeb7   :  { %7478 = vadd.xlane.f32.xlu0 %v7477_v10 }
 0xeb8   :  { %v7463_v41 = vmax.f32 %v7446_v40, 0.0 }
 0xeb9   :  { %v7450_v25 = vpop.f32.mrb[136].mxu0 }
 0xeba   :  { %v7451_v55 = vadd.f32 %v8360_v38, %v7450_v25  ;;  %v10914_v63 = vpop.f32.mrb[137].mxu0  ;;  %v7480_v31 = vsel %vm6961_vm2, %v7463_v41, 0.0 }
 0xebb   :  { %7481 = vadd.xlane.f32.xlu1 %v7480_v31  ;;  %v15113_v31 = vld [vmem:[%s15302_s1 + $0x288] ss:$0 sm:$0xff] }
 0xebc   :  { %v7464_v50 = vmax.f32 %v7451_v55, 0.0 }
 0xebd   :  { %v7455_v49 = vpop.f32.mrb[138].mxu0 }
 0xebe   :  { %v7456_v8 = vadd.f32 %v8360_v38, %v7455_v49  ;;  %v10917_v51 = vpop.f32.mrb[139].mxu0  ;;  %v7483_v28 = vsel %vm6961_vm2, %v7464_v50, 0.0 }
 0xebf   :  { %7484 = vadd.xlane.f32.xlu0 %v7483_v28 }
 0xec0   :  { %v7465_v13 = vmax.f32 %v7456_v8, 0.0 }
 0xec2   :  { %v7486_v56 = vsel %vm6980_vm14, %v7465_v13, 0.0 }
 0xec3   :  { %7487 = vadd.xlane.f32.xlu1 %v7486_v56  ;;  %v15120_v56 = vld [vmem:[%s15302_s1 + $0x290] ss:$0 sm:$0xff] }
 0xf38   :  { %v7470_v11 = vpop.xlane.xlu1 %7469 }
 0xf39   :  { %v7489_v53 = vmul.f32 0.03125, %v7470_v11 }
 0xf3b   :  { %v15061_v27 = vsub.f32 %v7459_v52, %v7489_v53 }
 0xf3c   :  { %v7473_v43 = vpop.xlane.xlu0 %7472 }
 0xf3d   :  { %v7490_v1 = vmul.f32 0.03125, %v7473_v43  ;;  %v7503_v35 = vmul.f32 %v15061_v27, %v15061_v27 }
 0xf3f   :  { %v15065_v6 = vsub.f32 %v7460_v39, %v7490_v1  ;;  %v7510_v62 = vsel %vm6961_vm2, %v7503_v35, 0.0  ;;  %v8112_v39 = vld [vmem:[%s15302_s1 + $0x298] sm:$0xff] }
 0xf40   :  { %v7476_v18 = vpop.xlane.xlu1 %7475  ;;  %7511 = vadd.xlane.f32.xlu0 %v7510_v62  ;;  %v11607_v9 = vpack.c.bf16 %v8113_v46, %v8112_v39 }
 0xf41   :  { %v7491_v24 = vmul.f32 0.03125, %v7476_v18  ;;  %v7504_v29 = vmul.f32 %v15065_v6, %v15065_v6 }
 0xf42   :  { %11608 = vmatpush3.bf16.msra.mxu1 %v11607_v9 }
 0xf43   :  { %v15070_v34 = vsub.f32 %v7461_v22, %v7491_v24  ;;  %v7513_v0 = vsel %vm6961_vm2, %v7504_v29, 0.0  ;;  %v11610_v22 = vpack.c.bf16 %v8115_v57, %v8114_v16  ;;  %11609 = vmatprep.subr.bf16.mxu1 %v15364_v2 }
 0xf44   :  { %v7479_v54 = vpop.xlane.xlu0 %7478  ;;  %7514 = vadd.xlane.f32.xlu1 %v7513_v0 }
 0xf45   :  { %v7492_v30 = vmul.f32 0.03125, %v7479_v54  ;;  %v7505_v60 = vmul.f32 %v15070_v34, %v15070_v34 }
 0xf46   :  { %11611 = vmatpush3.bf16.msra.mxu1 %v11610_v22 }
 0xf47   :  { %v15075_v20 = vsub.f32 %v7462_v3, %v7492_v30  ;;  %v7516_v58 = vsel %vm6961_vm2, %v7505_v60, 0.0  ;;  %11612 = vmatprep.subr.bf16.mxu1 %v15364_v2 }
 0xf48   :  { %v7482_v15 = vpop.xlane.xlu1 %7481  ;;  %7517 = vadd.xlane.f32.xlu0 %v7516_v58 }
 0xf49   :  { %v7493_v47 = vmul.f32 0.03125, %v7482_v15  ;;  %v7506_v33 = vmul.f32 %v15075_v20, %v15075_v20 }
 0xf4b   :  { %v15080_v14 = vsub.f32 %v7463_v41, %v7493_v47  ;;  %v7519_v23 = vsel %vm6961_vm2, %v7506_v33, 0.0 }
 0xf4c   :  { %v7485_v37 = vpop.xlane.xlu0 %7484  ;;  %7520 = vadd.xlane.f32.xlu1 %v7519_v23 }
 0xf4d   :  { %v7494_v44 = vmul.f32 0.03125, %v7485_v37  ;;  %v7507_v32 = vmul.f32 %v15080_v14, %v15080_v14 }
 0xf4f   :  { %v15085_v38 = vsub.f32 %v7464_v50, %v7494_v44  ;;  %v7522_v59 = vsel %vm6961_vm2, %v7507_v32, 0.0 }
 0xf50   :  { %7523 = vadd.xlane.f32.xlu0 %v7522_v59  ;;  %v7488_v12 = vpop.xlane.xlu1 %7487 }
 0xf51   :  { %v7495_v36 = vmul.f32 0.03125, %v7488_v12  ;;  %v7508_v52 = vmul.f32 %v15085_v38, %v15085_v38 }
 0xf53   :  { %v15090_v45 = vsub.f32 %v7465_v13, %v7495_v36  ;;  %v7525_v48 = vsel %vm6961_vm2, %v7508_v52, 0.0 }
 0xf54   :  { %7526 = vadd.xlane.f32.xlu1 %v7525_v48 }
 0xf55   :  { %v7509_v4 = vmul.f32 %v15090_v45, %v15090_v45 }
 0xf57   :  { %v7528_v61 = vsel %vm6980_vm14, %v7509_v4, 0.0 }
 0xf58   :  { %7529 = vadd.xlane.f32.xlu0 %v7528_v61 }
 0xfcd   :  { %v7512_v21 = vpop.xlane.xlu0 %7511 }
 0xfce   :  { %v7531_v5 = vmul.f32 0.03125, %v7512_v21 }
 0xfd0   :  { %v7538_v26 = vadd.f32 1e-05, %v7531_v5 }
 0xfd1   :  { %v7515_v42 = vpop.xlane.xlu1 %7514 }
 0xfd2   :  { %12216 = vrsqrt.f32 %v7538_v26  ;;  %v7532_v3 = vmul.f32 0.03125, %v7515_v42 }
 0xfd4   :  { %v7539_v7 = vadd.f32 1e-05, %v7532_v3 }
 0xfd5   :  { %v7518_v40 = vpop.xlane.xlu0 %7517 }
 0xfd6   :  { %12218 = vrsqrt.f32 %v7539_v7  ;;  %v7533_v19 = vmul.f32 0.03125, %v7518_v40 }
 0xfd8   :  { %v7540_v10 = vadd.f32 1e-05, %v7533_v19 }
 0xfd9   :  { %v7521_v41 = vpop.xlane.xlu1 %7520 }
 0xfda   :  { %12220 = vrsqrt.f32 %v7540_v10  ;;  %v7534_v25 = vmul.f32 0.03125, %v7521_v41 }
 0xfdc   :  { %v12217_v55 = vpop.eup %12216  ;;  %v7541_v63 = vadd.f32 1e-05, %v7534_v25 }
 0xfdd   :  { %v7552_v50 = vmul.f32 %v12217_v55, %v15061_v27  ;;  %v7524_v49 = vpop.xlane.xlu0 %7523 }
 0xfde   :  { %12222 = vrsqrt.f32 %v7541_v63  ;;  %v7535_v8 = vmul.f32 0.03125, %v7524_v49 }
 0xfdf   :  { %v7563_v51 = vmul.f32 %v15113_v31, %v7552_v50 }
 0xfe0   :  { %v12219_v28 = vpop.eup %12218  ;;  %v7542_v13 = vadd.f32 1e-05, %v7535_v8 }
 0xfe1   :  { %v7553_v11 = vmul.f32 %v12219_v28, %v15065_v6  ;;  %v7527_v53 = vpop.xlane.xlu1 %7526  ;;  %v7574_v27 = vadd.f32 %v15120_v56, %v7563_v51  ;;  %v7581_v6 = vld [vmem:[%s15302_s1 + $0x158] sm:$0x3] }
 0xfe2   :  { %12224 = vrsqrt.f32 %v7542_v13  ;;  %v7536_v43 = vmul.f32 0.03125, %v7527_v53 }
 0xfe3   :  { %v7564_v1 = vmul.f32 %v15113_v31, %v7553_v11  ;;  %v7589_v54 = vand.u32 4294901760, %v7574_v27 }
 0xfe4   :  { %v12221_v35 = vpop.eup %12220  ;;  %v7543_v62 = vadd.f32 1e-05, %v7536_v43 }
 0xfe5   :  { %v7554_v18 = vmul.f32 %v12221_v35, %v15070_v34  ;;  %v7530_v24 = vpop.xlane.xlu0 %7529  ;;  %v7575_v29 = vadd.f32 %v15120_v56, %v7564_v1  ;;  %v7583_v34 = vsel %vm4106_vm13, %v7581_v6, 0  ;;  %v15146_v61 = vsub.f32 %v7574_v27, %v7589_v54 }
 0xfe6   :  { %12226 = vrsqrt.f32 %v7543_v62  ;;  %v7537_v0 = vmul.f32 0.03125, %v7530_v24  ;;  %v15139_v32 = vand.u32 4294901760, %v7583_v34 }
 0xfe7   :  { %v7592_v30 = vand.u32 4294901760, %v7575_v29  ;;  %v7565_v60 = vmul.f32 %v15113_v31, %v7554_v18 }
 0xfe8   :  { %v12223_v58 = vpop.eup %12222  ;;  %v7544_v15 = vadd.f32 1e-05, %v7537_v0  ;;  %v15149_v39 = vsub.f32 %v7583_v34, %v15139_v32 }
 0xfe9   :  { %v7555_v47 = vmul.f32 %v12223_v58, %v15075_v20  ;;  %v15132_v33 = vpack.c.bf16 %v7592_v30, %v7589_v54  ;;  %v7576_v37 = vadd.f32 %v15120_v56, %v7565_v60  ;;  %v15143_v12 = vsub.f32 %v7575_v29, %v7592_v30 }
 0xfea   :  { %12228 = vrsqrt.f32 %v7544_v15  ;;  %v7662_v26 = vand.u32 4294901760, %v15149_v39 }
 0xfeb   :  { %11554 = vmatpush3.bf16.msra.mxu0 %v15132_v33  ;;  %v7566_v23 = vmul.f32 %v15113_v31, %v7555_v47  ;;  %v7595_v36 = vand.u32 4294901760, %v7576_v37  ;;  %v7680_v22 = vand.u32 4294901760, %v15143_v12  ;;  %v11571_v47 = vpack.c.bf16 %v15143_v12, %v15146_v61 }
 0xfec   :  { %v12225_v44 = vpop.eup %12224  ;;  %11555 = vmatprep.subr.bf16.mxu0 %v15364_v2  ;;  %v7663_v25 = vsub.f32 %v15149_v39, %v7662_v26 }
 0xfed   :  { %v7556_v59 = vmul.f32 %v12225_v44, %v15080_v14  ;;  %v7577_v20 = vadd.f32 %v15120_v56, %v7566_v23  ;;  %v15160_v5 = vsub.f32 %v7576_v37, %v7595_v36  ;;  %v7681_v10 = vsub.f32 %v15143_v12, %v7680_v22 }
 0xfee   :  { %v7664_v53 = vand.u32 4294901760, %v7663_v25 }
 0xfef   :  { %v7598_v52 = vand.u32 4294901760, %v7577_v20  ;;  %v7567_v48 = vmul.f32 %v15113_v31, %v7556_v59  ;;  %v7687_v55 = vand.u32 4294901760, %v15160_v5  ;;  %v7682_v51 = vand.u32 4294901760, %v7681_v10 }
 0xff0   :  { %v12227_v4 = vpop.eup %12226 }
 0xff1   :  { %v7557_v46 = vmul.f32 %v12227_v4, %v15085_v38  ;;  %v15152_v16 = vpack.c.bf16 %v7598_v52, %v7595_v36  ;;  %v7578_v14 = vadd.f32 %v15120_v56, %v7567_v48  ;;  %v15156_v9 = vsub.f32 %v7577_v20, %v7598_v52  ;;  %v8196_v20 = vld [vmem:[%s15302_s1 + $0x2c8] sm:$0xff]  ;;  %v8198_v48 = vld [vmem:[%s15302_s1 + $0x2d8] sm:$0xff] }
 0xff2   :  { %v7673_v38 = vand.u32 4294901760, %v15146_v61 }
 0xff3   :  { %11557 = vmatpush3.bf16.msra.mxu0 %v15152_v16  ;;  %v7568_v57 = vmul.f32 %v15113_v31, %v7557_v46  ;;  %v7601_v7 = vand.u32 4294901760, %v7578_v14  ;;  %v7694_v41 = vand.u32 4294901760, %v15156_v9  ;;  %v11574_v34 = vpack.c.bf16 %v15156_v9, %v15160_v5 }
 0xff4   :  { %v12229_v21 = vpop.eup %12228  ;;  %11558 = vmatprep.subr.bf16.mxu0 %v15364_v2  ;;  %v11589_v37 = vpack.c.bf16 %v7680_v22, %v7673_v38 }
 0xff5   :  { %v7558_v42 = vmul.f32 %v12229_v21, %v15090_v45  ;;  %v7579_v3 = vadd.f32 %v15120_v56, %v7568_v57  ;;  %v7674_v45 = vsub.f32 %v15146_v61, %v7673_v38  ;;  %v15181_v50 = vsub.f32 %v7578_v14, %v7601_v7  ;;  %v8370_v61 = vld [vmem:[%s15302_s1 + $0x2b8] ss:$0 sm:$0xff] }
 0xff6   :  { %v7695_v28 = vsub.f32 %v15156_v9, %v7694_v41  ;;  %v11592_v44 = vpack.c.bf16 %v7694_v41, %v7687_v55 }
 0xff7   :  { %v7604_v40 = vand.u32 4294901760, %v7579_v3  ;;  %v7569_v19 = vmul.f32 %v15113_v31, %v7558_v42  ;;  %v7675_v43 = vand.u32 4294901760, %v7674_v45  ;;  %v7701_v1 = vand.u32 4294901760, %v15181_v50 }
 0xff8   :  { %v7696_v62 = vand.u32 4294901760, %v7695_v28 }
 0xff9   :  { %v15179_v63 = vpack.c.bf16 %v7604_v40, %v7601_v7  ;;  %v15183_v31 = vsub.f32 %v7579_v3, %v7604_v40  ;;  %v7580_v49 = vadd.f32 %v15120_v56, %v7569_v19  ;;  %v7688_v56 = vsub.f32 %v15160_v5, %v7687_v55 }
 0xffa   :  { %v11562_v35 = vpack.c.bf16 %v7682_v51, %v7675_v43  ;;  %v7702_v29 = vsub.f32 %v15181_v50, %v7701_v1 }
 0xffb   :  { %11560 = vmatpush3.bf16.msra.mxu0 %v15179_v63  ;;  %v7586_v8 = vsel %vm73_vm1, %v7580_v49, 0  ;;  %v7708_v13 = vand.u32 4294901760, %v15183_v31  ;;  %v7689_v24 = vand.u32 4294901760, %v7688_v56  ;;  %v11577_v23 = vpack.c.bf16 %v15183_v31, %v15181_v50 }
 0xffc   :  { %10930 = vmatprep.subr.mxu0 %v15411_v17  ;;  %v15193_v11 = vand.u32 4294901760, %v7586_v8  ;;  %v7703_v30 = vand.u32 4294901760, %v7702_v29 }
 0xffd   :  { %v7709_v18 = vsub.f32 %v15183_v31, %v7708_v13  ;;  %v11565_v0 = vpack.c.bf16 %v7696_v62, %v7689_v24  ;;  %v11595_v59 = vpack.c.bf16 %v7708_v13, %v7701_v1 }
 0xffe   :  { %v7714_v27 = vsub.f32 %v7586_v8, %v15193_v11 }
 0xfff   :  { %10931 = vmatpush3.msra.mxu0 %v15193_v11  ;;  %v7710_v6 = vand.u32 4294901760, %v7709_v18 }
0x1000   :  { %11561 = vmatprep.subr.bf16.mxu0 %v15364_v2  ;;  %10933 = vmatmul.mubr.f32.vlgmr.msra.gmra.mrb[140].mxu0 %v7664_v53  ;;  %v7715_v54 = vand.u32 4294901760, %v7714_v27 }
0x1001   :  { %11563 = vmatpush3.bf16.msra.mxu0 %v11562_v35  ;;  %10949 = vmatprep.mubr.msk.f32.mxu0 %vm12262_vm0, %v15411_v17  ;;  %v11568_v60 = vpack.c.bf16 %v7710_v6, %v7703_v30 }
0x1002   :  { %11564 = vmatprep.subr.bf16.mxu0 %v15364_v2  ;;  %v7716_v58 = vsub.f32 %v7714_v27, %v7715_v54 }
0x1004   :  { %v7717_v15 = vand.u32 4294901760, %v7716_v58 }
0x1005   :  { %11566 = vmatpush3.bf16.msra.mxu0 %v11565_v0 }
0x1006   :  { %11567 = vmatprep.subr.bf16.mxu0 %v15364_v2 }
0x1009   :  { %11569 = vmatpush3.bf16.msra.mxu0 %v11568_v60 }
0x100a   :  { %10947 = vmatprep.subr.mxu0 %v15411_v17 }
0x100d   :  { %10948 = vmatpush3.msra.mxu0 %v7717_v15 }
0x100e   :  { %11570 = vmatprep.subr.bf16.mxu0 %v15364_v2  ;;  %10950 = vmatmul.mubr.f32.vlgmr.msra.gmra.mrb[140].mxu0 %v15139_v32 }
0x100f   :  { %11572 = vmatpush3.bf16.msra.mxu0 %v11571_v47  ;;  %10966 = vmatprep.mubr.msk.f32.mxu0 %vm12262_vm0, %v15411_v17 }
0x1010   :  { %11573 = vmatprep.subr.bf16.mxu0 %v15364_v2 }
0x1013   :  { %11575 = vmatpush3.bf16.msra.mxu0 %v11574_v34 }
0x1014   :  { %11576 = vmatprep.subr.bf16.mxu0 %v15364_v2 }
0x1017   :  { %11578 = vmatpush3.bf16.msra.mxu0 %v11577_v23 }
0x1018   :  { %10964 = vmatprep.subr.mxu0 %v15411_v17 }
0x101b   :  { %10965 = vmatpush3.msra.mxu0 %v7714_v27 }
0x101c   :  { %11579 = vmatprep.subr.bf16.mxu0 %v15364_v2  ;;  %10967 = vmatmul.mubr.f32.vlgmr.msra.gmra.mrb[140].mxu0 %v15149_v39 }
0x101d   :  { %11581 = vmatpush3.bf16.msra.mxu0 %v15132_v33  ;;  %10983 = vmatprep.mubr.msk.f32.mxu0 %vm12262_vm0, %v15411_v17 }
0x101e   :  { %11582 = vmatprep.subr.bf16.mxu0 %v15364_v2 }
0x1021   :  { %11584 = vmatpush3.bf16.msra.mxu0 %v15152_v16 }
0x1022   :  { %11585 = vmatprep.subr.bf16.mxu0 %v15364_v2 }
0x1025   :  { %11587 = vmatpush3.bf16.msra.mxu0 %v15179_v63 }
0x1026   :  { %10981 = vmatprep.subr.mxu0 %v15411_v17 }
0x1029   :  { %10982 = vmatpush3.msra.mxu0 %v15193_v11 }
0x102a   :  { %11588 = vmatprep.subr.bf16.mxu0 %v15364_v2  ;;  %10984 = vmatmul.mubr.f32.vlgmr.msra.gmra.mrb[140].mxu0 %v7662_v26 }
0x102b   :  { %11590 = vmatpush3.bf16.msra.mxu0 %v11589_v37  ;;  %11000 = vmatprep.mubr.msk.f32.mxu0 %vm12262_vm0, %v15411_v17 }
0x102c   :  { %11591 = vmatprep.subr.bf16.mxu0 %v15364_v2 }
0x102f   :  { %11593 = vmatpush3.bf16.msra.mxu0 %v11592_v44 }
0x1030   :  { %11594 = vmatprep.subr.bf16.mxu0 %v15364_v2 }
0x1033   :  { %11596 = vmatpush3.bf16.msra.mxu0 %v11595_v59 }
0x1034   :  { %10998 = vmatprep.subr.mxu0 %v15411_v17 }
0x1037   :  { %10999 = vmatpush3.msra.mxu0 %v7715_v54 }
0x1038   :  { %11597 = vmatprep.subr.bf16.mxu0 %v15364_v2  ;;  %11001 = vmatmul.mubr.f32.vlgmr.msra.gmra.mrb[140].mxu0 %v15139_v32 }
0x1039   :  { %11599 = vmatpush3.bf16.msra.mxu0 %v15132_v33  ;;  %11017 = vmatprep.mubr.msk.f32.mxu0 %vm12262_vm0, %v15411_v17  ;;  %v8195_v33 = vld [vmem:[%s15302_s1 + $0x2c0] sm:$0xff] }
0x103a   :  { %11600 = vmatprep.subr.bf16.mxu0 %v15364_v2  ;;  %v11613_v12 = vpack.c.bf16 %v8196_v20, %v8195_v33 }
0x103d   :  { %11602 = vmatpush3.bf16.msra.mxu0 %v15152_v16 }
0x103e   :  { %11603 = vmatprep.subr.bf16.mxu0 %v15364_v2 }
0x1041   :  { %11605 = vmatpush3.bf16.msra.mxu0 %v15179_v63 }
0x1042   :  { %11015 = vmatprep.subr.mxu0 %v15411_v17 }
0x1045   :  { %11016 = vmatpush3.msra.mxu0 %v15193_v11 }
0x1046   :  { %11018 = vmatmul.mubr.f32.vlgmr.msra.gmra.mrb[140].mxu0 %v15139_v32  ;;  %v8197_v32 = vld [vmem:[%s15302_s1 + $0x2d0] sm:$0xff] }
0x1047   :  { %v11616_v4 = vpack.c.bf16 %v8198_v48, %v8197_v32 }
0x1119   :  { %v8108_v36 = vpop.f32.mrb[140].mxu0 }
0x111a   :  { %v11019_v52 = vpop.f32.mrb[141].mxu0  ;;  %11029 = vmatmul.mubr.msk.f32.vlgmr.msra.gmra.mrb[84].mxu1 %vm6961_vm2, %v8108_v36 }
0x111b   :  { %11614 = vmatpush3.bf16.msra.mxu1 %v11613_v12  ;;  %11039 = vmatprep.mubr.msk.f32.mxu1 %vm12262_vm0, %v15411_v17 }
0x111c   :  { %11615 = vmatprep.subr.bf16.mxu1 %v15364_v2  ;;  %v8372_v2 = vld [vmem:[%s15302_s1 + $0x2e0] ss:$0 sm:$0xff] }
0x111f   :  { %11617 = vmatpush3.bf16.msra.mxu1 %v11616_v4 }
0x11ed   :  { %v8190_v39 = vpop.f32.mrb[84].mxu1 }
0x11ee   :  { %v8191_v46 = vadd.f32 %v8370_v61, %v8190_v39  ;;  %v11030_v16 = vpop.f32.mrb[85].mxu1 }
0x11f0   :  { %v8194_v17 = vmax.f32 %v8191_v46, 0.0 }
0x11f2   :  { %11040 = vmatmul.mubr.msk.f32.vlgmr.msra.gmra.mrb[86].mxu1 %vm6961_vm2, %v8194_v17 }
0x12c5   :  { %v8273_v14 = vpop.f32.mrb[86].mxu1 }
0x12c6   :  { %v8274_v9 = vadd.f32 %v8372_v2, %v8273_v14  ;;  %v11041_v57 = vpop.f32.mrb[87].mxu1 }
0x12c8   :  { %v8277_v22 = vmax.f32 %v8274_v9, 0.0 }
0x12ca   :  { %v8278_v21 = vmax.f32 %v8277_v22, 0.0 }
0x12cc   :  { %8279 = vst.msk [vmem:[#allocation2] sm:$0x3] %vm6980_vm14, %v8278_v21 }
0x12cd   :  { %12248 = shalt.err (!%p12245_p4)
}
0x12ce   :  { %s12249_s1 = scalar_lea.hbm %s15303_s2, 32 }
0x12cf   :  { %p12250_p5 = scmp.ne.s32.totalorder %s15303_s2, %s12249_s1  ;;  %p12253_p6 = scmp.lt.u32.totalorder %s12249_s1, %s15303_s2 }
0x12d1   :  { %p12255_p7 = pnand %p12253_p6, %p12250_p5 }
0x12d3   :  { %12258 = shalt.err (!%p12255_p7)
}
0x12d4   :  { %8289 = dma.vmem_to_hbm [thread:$0]  %s8287_s0, 32, %s15303_s2, [#allocation3]  }
0x12d5   :  { %12259 = dma.done.wait [#allocation3], 32  }
0x12d6   :  { %12260 = vsyncadd [#allocation3], 4294967264 }
0x12d7   :  { %8293 = vsyncpa [#allocation3], 1 }

</bundles_post_ra>
